<compile_context>
chip_gen: v6e
topology: v6e:2x2x1
jax: 0.10.0
libtpu: 0.0.40
codegen_flags: <defaults>
</compile_context>

<pallas_src>
import math
from functools import partial

import numpy as np
import jax
import jax.numpy as jnp
from jax import lax
from jax.experimental import pallas as pl
from jax.experimental.pallas import tpu as pltpu


_BIG_NEG = 1e9      # dtype-safe large negative for masked_fill
_LN_EPS = 1e-5


# --------------------------- in-kernel helpers --------------------------------

def _gelu(x):
    # TODO(synk): PyTorch nn.GELU defaults to the exact erf form; the tanh
    # approximation is used here (EUP-only lowering, small numeric deviation).
    c = math.sqrt(2.0 / math.pi)
    return 0.5 * x * (1.0 + jnp.tanh(c * (x + 0.044715 * x * x * x)))


def _layernorm(x, g, b, eps=_LN_EPS):
    mu = jnp.mean(x, axis=-1, keepdims=True)
    xc = x - mu
    var = jnp.mean(xc * xc, axis=-1, keepdims=True)
    return xc * lax.rsqrt(var + eps) * g + b


# --------------------------- geometry-bias kernel -----------------------------

def _geom_bias_kernel(wgT_ref, embT_ref, bg_ref, o_ref):
    # (h, 64) @ (64, n*n) -> (h, n*n): lane-dense output; relu + log fused so
    # the attention stage never redoes this EUP work (batch/layer invariant).
    y = jnp.dot(wgT_ref[...].astype(jnp.bfloat16), embT_ref[...].astype(jnp.bfloat16),
                preferred_element_type=jnp.float32) + bg_ref[...]
    y = jnp.maximum(y, 0.0)                       # F.relu(relative_geometry_weights)
    o_ref[...] = jnp.log(jnp.maximum(y, 1e-6))    # log-clamped box-relational bias


def geometry_log_bias(embT, wgT, bg):
    h, nn = wgT.shape[0], embT.shape[1]
    vmem = pl.BlockSpec(memory_space=pltpu.MemorySpace.VMEM)
    out = pl.pallas_call(
        _geom_bias_kernel,
        out_shape=jax.ShapeDtypeStruct((h, nn), jnp.float32),
        in_specs=[vmem, vmem, vmem],
        out_specs=vmem,
    )(wgT, embT, bg)
    n = int(math.isqrt(nn))
    return out.reshape(h, n, n)


# --------------------------- fully fused encoder kernel ------------------------

def _fused_mle_kernel(
        x_ref, mask_ref, geom_ref,
        wqkv_ref, bqkv_ref, wo_ref, bo_ref, ln1g_ref, ln1b_ref,
        tcat_ref, lpw_ref, lpb_ref, ln2g_ref, ln2b_ref,
        ffw1_ref, ffb1_ref, ffw2_ref, ffb2_ref, ln3g_ref, ln3b_ref,
        a1_ref, r1_ref, a2_ref, r2_ref,
        s2w1_ref, s2b1_ref, s2w2_ref, s2b2_ref,
        o_ref, *, n_layers, h, d_k, d_v, deltas1, deltas2):
    bf16 = jnp.bfloat16
    x = x_ref[0].astype(jnp.float32)                       # (n, d_model)
    n, d_model = x.shape
    scale = 1.0 / math.sqrt(d_k)
    # key-mask bias, hoisted once for all layers/heads (masked_fill, bf16-safe)
    neg = mask_ref[...].astype(jnp.float32) * _BIG_NEG     # (1, 1, n)
    geom = geom_ref[...]                                   # (h, n, n) log-geometry bias
    tcat = tcat_ref[...]                                   # (n, 9n) bf16 tap matrix
    qd = h * d_k

    outs = []
    y = x
    for l in range(n_layers):
        # ---- fused QKV projection: single bf16 MXU pass ------------------------
        qkv = jnp.dot(y.astype(bf16), wqkv_ref[l],
                      preferred_element_type=jnp.float32) + bqkv_ref[l]
        # stack heads onto a leading batch axis -> (h, n, d)
        q3 = jnp.concatenate(
            [qkv[None, :, i * d_k:(i + 1) * d_k] for i in range(h)], axis=0)
        k3 = jnp.concatenate(
            [qkv[None, :, qd + i * d_k: qd + (i + 1) * d_k] for i in range(h)], axis=0)
        v3 = jnp.concatenate(
            [qkv[None, :, 2 * qd + i * d_v: 2 * qd + (i + 1) * d_v] for i in range(h)],
            axis=0)

        # ---- box-relational attention, ALL heads batched -----------------------
        s = jnp.einsum('hnd,hmd->hnm', q3.astype(bf16), k3.astype(bf16),
                       preferred_element_type=jnp.float32) * scale
        s = s + geom - neg                                  # geometry bias + mask
        s = s - jnp.max(s, axis=-1, keepdims=True)
        p = jnp.exp(s)
        p = p * pl.reciprocal(jnp.sum(p, axis=-1, keepdims=True), approx=True)
        o3 = jnp.einsum('hnm,hmv->hnv', p.astype(bf16), v3.astype(bf16),
                        preferred_element_type=jnp.float32)
        # output projection: batched per-head matmul + sum (no lane concat)
        att = jnp.sum(jnp.einsum('hnv,hvm->hnm', o3.astype(bf16), wo_ref[l],
                                 preferred_element_type=jnp.float32),
                      axis=0) + bo_ref[l]
        y1 = _layernorm(y + att, ln1g_ref[l], ln1b_ref[l])  # lnorm(q + dropout(att))

        # ---- LocalPerceptron: depthwise 3x3 (zero-pad halo) == ONE K=9n matmul --
        # (T_t @ y) * w_t == T_t @ (y * w_t)  ->  T_cat (n,9n) @ stacked (9n,d)
        y9 = (y1[None, :, :] * lpw_ref[l][:, None, :]).reshape(9 * n, d_model)
        lp = jnp.dot(tcat, y9.astype(bf16),
                     preferred_element_type=jnp.float32) + lpb_ref[l]
        lp = _gelu(lp)
        y2 = _layernorm(y1 + lp, ln2g_ref[l], ln2b_ref[l])

        # ---- position-wise FFN + residual + LN3 --------------------------------
        f1 = jnp.maximum(jnp.dot(y2.astype(bf16), ffw1_ref[l],
                                 preferred_element_type=jnp.float32) + ffb1_ref[l], 0.0)
        f2 = jnp.dot(f1.astype(bf16), ffw2_ref[l],
                     preferred_element_type=jnp.float32) + ffb2_ref[l]
        y = _layernorm(y2 + f2, ln3g_ref[l], ln3b_ref[l])
        outs.append(y)

    # ---- S2Fuse: roll-based quarter-channel spatial shifts + folded 1x1 convs ---
    def shift_mix(a, amask, rmask_ref, deltas):
        # out = keep-mask*a + sum_k colmask_k * roll(a, delta_k)
        acc = a * amask
        for k in range(4):
            acc = acc + rmask_ref[k] * pltpu.roll(a, shift=deltas[k] % n, axis=0)
        return acc

    x1 = shift_mix(outs[0], a1_ref[...], r1_ref, deltas1)   # spatial_shift1
    x2 = shift_mix(outs[1], a2_ref[...], r2_ref, deltas2)   # spatial_shift2
    xall = jnp.concatenate([x1, x2, outs[2]], axis=-1)      # (n, 3*d_model)
    h1 = jnp.maximum(jnp.dot(xall.astype(bf16), s2w1_ref[...],
                             preferred_element_type=jnp.float32) + s2b1_ref[...], 0.0)
    h2 = jnp.dot(h1.astype(bf16), s2w2_ref[...],
                 preferred_element_type=jnp.float32) + s2b2_ref[...]
    o_ref[0] = (outs[-1] + 0.2 * h2).astype(o_ref.dtype)    # out = out + 0.2*stack_out


# --------------------------- host-side constants -------------------------------

def _conv3x3_tap_cat(H, W):
    """(n, 9n) hconcat of the 9 depthwise-3x3 token-shift matrices (zero padding)."""
    n = H * W
    mats = np.zeros((9, n, n), np.float32)
    for ti in range(3):
        for tj in range(3):
            t = 3 * ti + tj
            for i in range(H):
                for j in range(W):
                    si, sj = i + ti - 1, j + tj - 1
                    if 0 <= si < H and 0 <= sj < W:
                        mats[t, i * W + j, si * W + sj] = 1.0
    return jnp.asarray(np.concatenate(list(mats), axis=1), dtype=jnp.bfloat16)


def _s2_shift_masks(H, W, d_model):
    """Static roll amounts + dense select masks reproducing spatial_shift1/2.

    out = a * amask + sum_k rmask[k] * roll(a, deltas[k])  with "keep original
    at the boundary" semantics on quarter-channel groups.
    TODO(synk): the reference shifts are overlapping in-place torch slice
    assignments (undefined cascade order); standard non-cascading S2-MLP shift
    semantics are used here.
    """
    n = H * W
    q = d_model // 4
    p = np.arange(n)
    gi, gj = p // W, p % W

    def keep(delta):
        if delta == W:
            return gi == 0
        if delta == -W:
            return gi == H - 1
        if delta == 1:
            return gj == 0
        if delta == -1:
            return gj == W - 1
        raise ValueError(delta)

    def build(deltas):
        amask = np.zeros((n, d_model), np.float32)
        rmask = np.zeros((4, n, d_model), np.float32)
        for k, d in enumerate(deltas):
            cm = np.zeros((d_model,), np.float32)
            cm[k * q:(k + 1) * q] = 1.0
            kp = keep(d).astype(np.float32)[:, None]
            amask += kp * cm[None, :]
            rmask[k] = (1.0 - kp) * cm[None, :]
        return jnp.asarray(amask), jnp.asarray(rmask)

    deltas1 = (W, -W, 1, -1)        # spatial_shift1 quarter-channel shifts
    deltas2 = (1, -1, W, -W)        # spatial_shift2 quarter-channel shifts
    a1, r1 = build(deltas1)
    a2, r2 = build(deltas2)
    return deltas1, deltas2, a1, r1, a2, r2


def grid_relational_embedding(grid_size, dim_g=64, wave_len=1000.0):
    """Batch-free sinusoidal relative-geometry embedding of a grid.

    TODO(synk): GridRelationalEmbedding is not in the provided source; the
    standard grid-box (object-relation-transformer style) version is used.
    """
    a = jnp.arange(grid_size, dtype=jnp.float32)
    c1 = jnp.repeat(a, grid_size)
    c2 = jnp.tile(a, grid_size)
    c3 = c1 + 1.0
    c4 = c2 + 1.0
    n = grid_size * grid_size
    f = lambda v: v.reshape(n, 1) / grid_size
    x_min, y_min, x_max, y_max = f(c1), f(c2), f(c3), f(c4)
    cx = (x_min + x_max) * 0.5
    cy = (y_min + y_max) * 0.5
    w = (x_max - x_min) + 1.0
    h = (y_max - y_min) + 1.0
    delta_x = jnp.log(jnp.maximum(jnp.abs((cx - cx.T) / w), 1e-3))
    delta_y = jnp.log(jnp.maximum(jnp.abs((cy - cy.T) / h), 1e-3))
    delta_w = jnp.log(w / w.T)
    delta_h = jnp.log(h / h.T)
    pos = jnp.stack([delta_x, delta_y, delta_w, delta_h], axis=-1)   # (n, n, 4)
    feat_range = jnp.arange(dim_g // 8, dtype=jnp.float32)
    dim_mat = 1.0 / (wave_len ** (feat_range / (dim_g / 8.0)))       # (8,)
    mul = 100.0 * pos[..., None] * dim_mat                           # (n, n, 4, 8)
    mul = mul.reshape(n, n, -1)
    return jnp.concatenate([jnp.sin(mul), jnp.cos(mul)], axis=-1)    # (n, n, 64)


# --------------------------- full forward pass ---------------------------------

def multi_level_encoder(x, params, *, N, d_model, d_k, d_v, h, d_ff):
    B, n, dm = x.shape
    assert dm == d_model and N == 3                   # S2Fuse is built with k = 3
    H = W = int(math.isqrt(n))
    qkv_dim = h * (2 * d_k + d_v)
    c_big = 3 * d_model

    # Literal reference mask semantics: token masked if ANY feature elem is 0.
    mask_bool = (jnp.sum((x == 0.0).astype(jnp.int32), axis=-1) != 0)     # (B, n)
    mask_f = mask_bool.astype(jnp.float32).reshape(B, 1, n)

    # Batch-invariant geometry: embed once, project + relu + log once, broadcast.
    emb = grid_relational_embedding(H)                # (n, n, 64)
    embT = emb.reshape(n * n, 64).T                   # (64, n*n) lane-dense operand
    geom_log = geometry_log_bias(embT, params["wg_T"], params["bg"])      # (h, n, n)

    # trace-time constants (baked once)
    tcat = _conv3x3_tap_cat(H, W)                     # (n, 9n) bf16
    deltas1, deltas2, a1, r1, a2, r2 = _s2_shift_masks(H, W, d_model)

    row3 = lambda b: (b, 0, 0)
    c2 = lambda b: (0, 0)
    c3 = lambda b: (0, 0, 0)
    c4 = lambda b: (0, 0, 0, 0)

    flops = B * (N * (2 * n * d_model * qkv_dim
                      + 2 * h * n * n * (d_k + d_v)
                      + 2 * n * h * d_v * d_model
                      + 2 * n * (9 * n) * d_model
                      + 4 * n * d_model * d_ff)
                 + 2 * n * c_big * c_big + 2 * n * c_big * d_model)
    trans = B * N * (h * n * n + n * d_model + 3 * n)

    operands = (x, mask_f, geom_log,
                params["wqkv"], params["bqkv"], params["wo"], params["bo"],
                params["ln1_g"], params["ln1_b"],
                tcat, params["lp_w"], params["lp_b"], params["ln2_g"], params["ln2_b"],
                params["ff_w1"], params["ff_b1"], params["ff_w2"], params["ff_b2"],
                params["ln3_g"], params["ln3_b"],
                a1, r1, a2, r2,
                params["s2_w1"], params["s2_b1"], params["s2_w2"], params["s2_b2"])
    bytes_acc = sum(int(np.prod(a.shape)) * a.dtype.itemsize for a in operands) \
        + B * n * d_model * 4

    out = pl.pallas_call(
        partial(_fused_mle_kernel, n_layers=N, h=h, d_k=d_k, d_v=d_v,
                deltas1=deltas1, deltas2=deltas2),
        out_shape=jax.ShapeDtypeStruct((B, n, d_model), jnp.float32),
        grid=(B,),
        in_specs=[
            pl.BlockSpec((1, n, d_model), row3),          # x
            pl.BlockSpec((1, 1, n), row3),                # key mask
            pl.BlockSpec((h, n, n), c3),                  # log-geometry bias (broadcast)
            pl.BlockSpec((N, d_model, qkv_dim), c3),      # fused Wqkv (layer-stacked)
            pl.BlockSpec((N, 1, qkv_dim), c3),
            pl.BlockSpec((N, h, d_v, d_model), c4),       # Wo as (h, d_v, d_model)
            pl.BlockSpec((N, 1, d_model), c3),
            pl.BlockSpec((N, 1, d_model), c3),            # ln1 gamma
            pl.BlockSpec((N, 1, d_model), c3),            # ln1 beta
            pl.BlockSpec((n, 9 * n), c2),                 # hconcat depthwise-3x3 taps
            pl.BlockSpec((N, 9, d_model), c3),            # depthwise weights
            pl.BlockSpec((N, 1, d_model), c3),            # depthwise bias
            pl.BlockSpec((N, 1, d_model), c3),            # ln2 gamma
            pl.BlockSpec((N, 1, d_model), c3),            # ln2 beta
            pl.BlockSpec((N, d_model, d_ff), c3),         # FFN W1
            pl.BlockSpec((N, 1, d_ff), c3),
            pl.BlockSpec((N, d_ff, d_model), c3),         # FFN W2
            pl.BlockSpec((N, 1, d_model), c3),
            pl.BlockSpec((N, 1, d_model), c3),            # ln3 gamma
            pl.BlockSpec((N, 1, d_model), c3),            # ln3 beta
            pl.BlockSpec((n, d_model), c2),               # S2 keep-mask (shift1)
            pl.BlockSpec((4, n, d_model), c3),            # S2 roll-masks (shift1)
            pl.BlockSpec((n, d_model), c2),               # S2 keep-mask (shift2)
            pl.BlockSpec((4, n, d_model), c3),            # S2 roll-masks (shift2)
            pl.BlockSpec((c_big, c_big), c2),             # S2 conv1 (BN folded)
            pl.BlockSpec((1, c_big), c2),
            pl.BlockSpec((c_big, d_model), c2),           # S2 conv2 (BN folded)
            pl.BlockSpec((1, d_model), c2),
        ],
        out_specs=pl.BlockSpec((1, n, d_model), row3),
        compiler_params=pltpu.CompilerParams(
            dimension_semantics=("parallel",),
            vmem_limit_bytes=8 * 1024 * 1024),
        cost_estimate=pl.CostEstimate(flops=int(flops), transcendentals=int(trans),
                                      bytes_accessed=int(bytes_acc)),
    )(*operands)

    attention_mask = mask_bool[:, None, None, :]          # (B, 1, 1, n) bool
    return out, attention_mask


# --------------------------- parameter init ------------------------------------

def init_params(key, N, d_model, d_k, d_v, h, d_ff):
    keys = iter(jax.random.split(key, 32))

    def lin(shape, s=0.05, dtype=jnp.float32):
        return (jax.random.normal(next(keys), shape, jnp.float32) * s).astype(dtype)

    bf = jnp.bfloat16
    qkv_dim = h * (2 * d_k + d_v)
    c_big = 3 * d_model
    bn_scale = 1.0 / math.sqrt(1.0 + 1e-5)   # eval-mode BN fold (fresh running stats)
    params = {
        # h stacked Linear(64,1) geometry projections (weights transposed)
        "wg_T": lin((h, 64)),
        "bg": lin((h, 1)),
        # per-layer weights stacked on a leading layer axis; MXU operands in bf16
        "wqkv": lin((N, d_model, qkv_dim), dtype=bf),
        "bqkv": lin((N, 1, qkv_dim)),
        "wo": lin((N, h, d_v, d_model), dtype=bf),
        "bo": lin((N, 1, d_model)),
        "ln1_g": jnp.ones((N, 1, d_model), jnp.float32),
        "ln1_b": jnp.zeros((N, 1, d_model), jnp.float32),
        "lp_w": lin((N, 9, d_model)),
        "lp_b": lin((N, 1, d_model)),
        "ln2_g": jnp.ones((N, 1, d_model), jnp.float32),
        "ln2_b": jnp.zeros((N, 1, d_model), jnp.float32),
        "ff_w1": lin((N, d_model, d_ff), dtype=bf),
        "ff_b1": lin((N, 1, d_ff)),
        "ff_w2": lin((N, d_ff, d_model), dtype=bf),
        "ff_b2": lin((N, 1, d_model)),
        "ln3_g": jnp.ones((N, 1, d_model), jnp.float32),
        "ln3_b": jnp.zeros((N, 1, d_model), jnp.float32),
        # S2Fuse mlp (k=3): Conv1x1+BN+ReLU+Conv1x1+BN, eval-mode BN folded
        "s2_w1": (lin((c_big, c_big)) * bn_scale).astype(bf),
        "s2_b1": jnp.zeros((1, c_big), jnp.float32),
        "s2_w2": (lin((c_big, d_model)) * bn_scale).astype(bf),
        "s2_b2": jnp.zeros((1, d_model), jnp.float32),
    }
    return params


# --------------------------------- main -----------------------------------------

if __name__ == "__main__":
    # batch=2, 16 tokens (4x4 grid), d_model=32, h=4 heads, d_k=d_v=8, d_ff=64,
    # N=3 encoder layers (N must equal S2Fuse's k=3).
    B, n, d_model = 2, 16, 32
    N, d_k, d_v, h, d_ff = 3, 8, 8, 4, 64

    key = jax.random.PRNGKey(0)
    kx, kp = jax.random.split(key)
    x = jax.random.normal(kx, (B, n, d_model), jnp.float32)
    params = init_params(kp, N, d_model, d_k, d_v, h, d_ff)

    fwd = jax.jit(partial(multi_level_encoder, N=N, d_model=d_model,
                          d_k=d_k, d_v=d_v, h=h, d_ff=d_ff))
    out, attn_mask = fwd(x, params)
    out = jax.block_until_ready(out)
    attn_mask = jax.block_until_ready(attn_mask)

    assert out.shape == (B, n, d_model)
    assert attn_mask.shape == (B, 1, 1, n)
    assert bool(jnp.all(jnp.isfinite(out)))
    print("KERNEL_OK")
</pallas_src>

<mosaic_0001>
module attributes {stable_mosaic.version = 11 : i64} {
  func.func @_geom_bias_kernel(%arg0: memref<4x64xf32, #tpu.memory_space<vmem>>, %arg1: memref<64x256xf32, #tpu.memory_space<vmem>>, %arg2: memref<4x1xf32, #tpu.memory_space<vmem>>, %arg3: memref<4x256xf32, #tpu.memory_space<vmem>>) attributes {dimension_semantics = [], scalar_prefetch = 0 : i64, scratch_operands = 0 : i64, tpu.core_type = #tpu.core_type<tc>} {
    %c0 = arith.constant 0 : index
    %c0_0 = arith.constant 0 : index
    %0 = vector.load %arg0[%c0, %c0_0] : memref<4x64xf32, #tpu.memory_space<vmem>>, vector<4x64xf32>
    %1 = arith.truncf %0 : vector<4x64xf32> to vector<4x64xbf16>
    %c0_1 = arith.constant 0 : index
    %c0_2 = arith.constant 0 : index
    %2 = vector.load %arg1[%c0_1, %c0_2] : memref<64x256xf32, #tpu.memory_space<vmem>>, vector<64x256xf32>
    %3 = arith.truncf %2 : vector<64x256xf32> to vector<64x256xbf16>
    %cst = arith.constant dense<0.000000e+00> : vector<4x256xf32>
    %4 = tpu.matmul %1, %3, %cst {dimension_numbers = #tpu.dot_dimension_numbers<[1], [0], [0], [1], [0, 0, 1, 1], [], []>} : vector<4x64xbf16>, vector<64x256xbf16>, vector<4x256xf32> -> vector<4x256xf32>
    %c0_3 = arith.constant 0 : index
    %c0_4 = arith.constant 0 : index
    %5 = vector.load %arg2[%c0_3, %c0_4] : memref<4x1xf32, #tpu.memory_space<vmem>>, vector<4x1xf32>
    %6 = vector.broadcast %5 : vector<4x1xf32> to vector<4x256xf32>
    %7 = arith.addf %4, %6 : vector<4x256xf32>
    %cst_5 = arith.constant 0.000000e+00 : f32
    %8 = vector.broadcast %cst_5 : f32 to vector<4x256xf32>
    %9 = arith.maximumf %7, %8 : vector<4x256xf32>
    %cst_6 = arith.constant 9.99999997E-7 : f32
    %10 = vector.broadcast %cst_6 : f32 to vector<4x256xf32>
    %11 = arith.maximumf %9, %10 : vector<4x256xf32>
    %12 = math.log %11 : vector<4x256xf32>
    %c0_7 = arith.constant 0 : index
    %c0_8 = arith.constant 0 : index
    %13 = vector.load %arg3[%c0_7, %c0_8] : memref<4x256xf32, #tpu.memory_space<vmem>>, vector<4x256xf32>
    tpu.vector_store %arg3[%c0_7, %c0_8], %12 {strides = array<i32>} : memref<4x256xf32, #tpu.memory_space<vmem>>, vector<4x256xf32>,
    return
  }
}

module attributes {stable_mosaic.version = 11 : i64} {
  func.func @_fused_mle_kernel(%arg0: i32, %arg1: memref<1x16x32xf32, #tpu.memory_space<vmem>>, %arg2: memref<1x1x16xf32, #tpu.memory_space<vmem>>, %arg3: memref<4x16x16xf32, #tpu.memory_space<vmem>>, %arg4: memref<3x32x96xbf16, #tpu.memory_space<vmem>>, %arg5: memref<3x1x96xf32, #tpu.memory_space<vmem>>, %arg6: memref<3x4x8x32xbf16, #tpu.memory_space<vmem>>, %arg7: memref<3x1x32xf32, #tpu.memory_space<vmem>>, %arg8: memref<3x1x32xf32, #tpu.memory_space<vmem>>, %arg9: memref<3x1x32xf32, #tpu.memory_space<vmem>>, %arg10: memref<16x144xbf16, #tpu.memory_space<vmem>>, %arg11: memref<3x9x32xf32, #tpu.memory_space<vmem>>, %arg12: memref<3x1x32xf32, #tpu.memory_space<vmem>>, %arg13: memref<3x1x32xf32, #tpu.memory_space<vmem>>, %arg14: memref<3x1x32xf32, #tpu.memory_space<vmem>>, %arg15: memref<3x32x64xbf16, #tpu.memory_space<vmem>>, %arg16: memref<3x1x64xf32, #tpu.memory_space<vmem>>, %arg17: memref<3x64x32xbf16, #tpu.memory_space<vmem>>, %arg18: memref<3x1x32xf32, #tpu.memory_space<vmem>>, %arg19: memref<3x1x32xf32, #tpu.memory_space<vmem>>, %arg20: memref<3x1x32xf32, #tpu.memory_space<vmem>>, %arg21: memref<16x32xf32, #tpu.memory_space<vmem>>, %arg22: memref<4x16x32xf32, #tpu.memory_space<vmem>>, %arg23: memref<16x32xf32, #tpu.memory_space<vmem>>, %arg24: memref<4x16x32xf32, #tpu.memory_space<vmem>>, %arg25: memref<96x96xbf16, #tpu.memory_space<vmem>>, %arg26: memref<1x96xf32, #tpu.memory_space<vmem>>, %arg27: memref<96x32xbf16, #tpu.memory_space<vmem>>, %arg28: memref<1x32xf32, #tpu.memory_space<vmem>>, %arg29: memref<1x16x32xf32, #tpu.memory_space<vmem>>) attributes {dimension_semantics = [#tpu.dimension_semantics<parallel>], iteration_bounds = array<i64: 2>, scalar_prefetch = 0 : i64, scratch_operands = 0 : i64, tpu.core_type = #tpu.core_type<tc>, window_params = [{transform_indices = @transform_0, window_bounds = array<i64: 1, 16, 32>}, {transform_indices = @transform_1, window_bounds = array<i64: 1, 1, 16>}, {pipeline_mode = #tpu.pipeline_mode<synchronous>, transform_indices = @transform_2, window_bounds = array<i64: 4, 16, 16>}, {pipeline_mode = #tpu.pipeline_mode<synchronous>, transform_indices = @transform_3, window_bounds = array<i64: 3, 32, 96>}, {pipeline_mode = #tpu.pipeline_mode<synchronous>, transform_indices = @transform_4, window_bounds = array<i64: 3, 1, 96>}, {pipeline_mode = #tpu.pipeline_mode<synchronous>, transform_indices = @transform_5, window_bounds = array<i64: 3, 4, 8, 32>}, {pipeline_mode = #tpu.pipeline_mode<synchronous>, transform_indices = @transform_6, window_bounds = array<i64: 3, 1, 32>}, {pipeline_mode = #tpu.pipeline_mode<synchronous>, transform_indices = @transform_7, window_bounds = array<i64: 3, 1, 32>}, {pipeline_mode = #tpu.pipeline_mode<synchronous>, transform_indices = @transform_8, window_bounds = array<i64: 3, 1, 32>}, {pipeline_mode = #tpu.pipeline_mode<synchronous>, transform_indices = @transform_9, window_bounds = array<i64: 16, 144>}, {pipeline_mode = #tpu.pipeline_mode<synchronous>, transform_indices = @transform_10, window_bounds = array<i64: 3, 9, 32>}, {pipeline_mode = #tpu.pipeline_mode<synchronous>, transform_indices = @transform_11, window_bounds = array<i64: 3, 1, 32>}, {pipeline_mode = #tpu.pipeline_mode<synchronous>, transform_indices = @transform_12, window_bounds = array<i64: 3, 1, 32>}, {pipeline_mode = #tpu.pipeline_mode<synchronous>, transform_indices = @transform_13, window_bounds = array<i64: 3, 1, 32>}, {pipeline_mode = #tpu.pipeline_mode<synchronous>, transform_indices = @transform_14, window_bounds = array<i64: 3, 32, 64>}, {pipeline_mode = #tpu.pipeline_mode<synchronous>, transform_indices = @transform_15, window_bounds = array<i64: 3, 1, 64>}, {pipeline_mode = #tpu.pipeline_mode<synchronous>, transform_indices = @transform_16, window_bounds = array<i64: 3, 64, 32>}, {pipeline_mode = #tpu.pipeline_mode<synchronous>, transform_indices = @transform_17, window_bounds = array<i64: 3, 1, 32>}, {pipeline_mode = #tpu.pipeline_mode<synchronous>, transform_indices = @transform_18, window_bounds = array<i64: 3, 1, 32>}, {pipeline_mode = #tpu.pipeline_mode<synchronous>, transform_indices = @transform_19, window_bounds = array<i64: 3, 1, 32>}, {pipeline_mode = #tpu.pipeline_mode<synchronous>, transform_indices = @transform_20, window_bounds = array<i64: 16, 32>}, {pipeline_mode = #tpu.pipeline_mode<synchronous>, transform_indices = @transform_21, window_bounds = array<i64: 4, 16, 32>}, {pipeline_mode = #tpu.pipeline_mode<synchronous>, transform_indices = @transform_22, window_bounds = array<i64: 16, 32>}, {pipeline_mode = #tpu.pipeline_mode<synchronous>, transform_indices = @transform_23, window_bounds = array<i64: 4, 16, 32>}, {pipeline_mode = #tpu.pipeline_mode<synchronous>, transform_indices = @transform_24, window_bounds = array<i64: 96, 96>}, {pipeline_mode = #tpu.pipeline_mode<synchronous>, transform_indices = @transform_25, window_bounds = array<i64: 1, 96>}, {pipeline_mode = #tpu.pipeline_mode<synchronous>, transform_indices = @transform_26, window_bounds = array<i64: 96, 32>}, {pipeline_mode = #tpu.pipeline_mode<synchronous>, transform_indices = @transform_27, window_bounds = array<i64: 1, 32>}, {transform_indices = @transform_28, window_bounds = array<i64: 1, 16, 32>}]} {
    %c0 = arith.constant 0 : index
    %c0_0 = arith.constant 0 : index
    %c0_1 = arith.constant 0 : index
    %0 = vector.load %arg1[%c0, %c0_0, %c0_1] : memref<1x16x32xf32, #tpu.memory_space<vmem>>, vector<1x16x32xf32>
    %1 = vector.shape_cast %0 : vector<1x16x32xf32> to vector<16x32xf32>
    %c0_2 = arith.constant 0 : index
    %c0_3 = arith.constant 0 : index
    %c0_4 = arith.constant 0 : index
    %2 = vector.load %arg2[%c0_2, %c0_3, %c0_4] : memref<1x1x16xf32, #tpu.memory_space<vmem>>, vector<1x1x16xf32>
    %cst = arith.constant 1.000000e+09 : f32
    %3 = vector.broadcast %cst : f32 to vector<1x1x16xf32>
    %4 = arith.mulf %2, %3 : vector<1x1x16xf32>
    %c0_5 = arith.constant 0 : index
    %c0_6 = arith.constant 0 : index
    %c0_7 = arith.constant 0 : index
    %5 = vector.load %arg3[%c0_5, %c0_6, %c0_7] : memref<4x16x16xf32, #tpu.memory_space<vmem>>, vector<4x16x16xf32>
    %c0_8 = arith.constant 0 : index
    %c0_9 = arith.constant 0 : index
    %6 = vector.load %arg10[%c0_8, %c0_9] : memref<16x144xbf16, #tpu.memory_space<vmem>>, vector<16x144xbf16>
    %7 = arith.truncf %1 : vector<16x32xf32> to vector<16x32xbf16>
    %c0_10 = arith.constant 0 : index
    %c0_11 = arith.constant 0 : index
    %c0_12 = arith.constant 0 : index
    %8 = vector.load %arg4[%c0_10, %c0_11, %c0_12] : memref<3x32x96xbf16, #tpu.memory_space<vmem>>, vector<1x32x96xbf16>
    %9 = vector.shape_cast %8 : vector<1x32x96xbf16> to vector<32x96xbf16>
    %cst_13 = arith.constant dense<0.000000e+00> : vector<16x96xf32>
    %10 = tpu.matmul %7, %9, %cst_13 {dimension_numbers = #tpu.dot_dimension_numbers<[1], [0], [0], [1], [0, 0, 1, 1], [], []>} : vector<16x32xbf16>, vector<32x96xbf16>, vector<16x96xf32> -> vector<16x96xf32>
    %c0_14 = arith.constant 0 : index
    %c0_15 = arith.constant 0 : index
    %c0_16 = arith.constant 0 : index
    %11 = vector.load %arg5[%c0_14, %c0_15, %c0_16] : memref<3x1x96xf32, #tpu.memory_space<vmem>>, vector<1x1x96xf32>
    %12 = vector.shape_cast %11 : vector<1x1x96xf32> to vector<1x96xf32>
    %13 = vector.broadcast %12 : vector<1x96xf32> to vector<16x96xf32>
    %14 = arith.addf %10, %13 : vector<16x96xf32>
    %15 = vector.extract_strided_slice %14 {offsets = [0, 0], sizes = [16, 8], strides = [1, 1]} : vector<16x96xf32> to vector<16x8xf32>
    %16 = vector.shape_cast %15 : vector<16x8xf32> to vector<1x16x8xf32>
    %17 = vector.extract_strided_slice %14 {offsets = [0, 8], sizes = [16, 8], strides = [1, 1]} : vector<16x96xf32> to vector<16x8xf32>
    %18 = vector.shape_cast %17 : vector<16x8xf32> to vector<1x16x8xf32>
    %19 = vector.extract_strided_slice %14 {offsets = [0, 16], sizes = [16, 8], strides = [1, 1]} : vector<16x96xf32> to vector<16x8xf32>
    %20 = vector.shape_cast %19 : vector<16x8xf32> to vector<1x16x8xf32>
    %21 = vector.extract_strided_slice %14 {offsets = [0, 24], sizes = [16, 8], strides = [1, 1]} : vector<16x96xf32> to vector<16x8xf32>
    %22 = vector.shape_cast %21 : vector<16x8xf32> to vector<1x16x8xf32>
    %23 = tpu.concatenate %16, %18, %20, %22 in 0 : vector<1x16x8xf32>, vector<1x16x8xf32>, vector<1x16x8xf32>, vector<1x16x8xf32> -> vector<4x16x8xf32>
    %24 = vector.extract_strided_slice %14 {offsets = [0, 32], sizes = [16, 8], strides = [1, 1]} : vector<16x96xf32> to vector<16x8xf32>
    %25 = vector.shape_cast %24 : vector<16x8xf32> to vector<1x16x8xf32>
    %26 = vector.extract_strided_slice %14 {offsets = [0, 40], sizes = [16, 8], strides = [1, 1]} : vector<16x96xf32> to vector<16x8xf32>
    %27 = vector.shape_cast %26 : vector<16x8xf32> to vector<1x16x8xf32>
    %28 = vector.extract_strided_slice %14 {offsets = [0, 48], sizes = [16, 8], strides = [1, 1]} : vector<16x96xf32> to vector<16x8xf32>
    %29 = vector.shape_cast %28 : vector<16x8xf32> to vector<1x16x8xf32>
    %30 = vector.extract_strided_slice %14 {offsets = [0, 56], sizes = [16, 8], strides = [1, 1]} : vector<16x96xf32> to vector<16x8xf32>
    %31 = vector.shape_cast %30 : vector<16x8xf32> to vector<1x16x8xf32>
    %32 = tpu.concatenate %25, %27, %29, %31 in 0 : vector<1x16x8xf32>, vector<1x16x8xf32>, vector<1x16x8xf32>, vector<1x16x8xf32> -> vector<4x16x8xf32>
    %33 = vector.extract_strided_slice %14 {offsets = [0, 64], sizes = [16, 8], strides = [1, 1]} : vector<16x96xf32> to vector<16x8xf32>
    %34 = vector.shape_cast %33 : vector<16x8xf32> to vector<1x16x8xf32>
    %35 = vector.extract_strided_slice %14 {offsets = [0, 72], sizes = [16, 8], strides = [1, 1]} : vector<16x96xf32> to vector<16x8xf32>
    %36 = vector.shape_cast %35 : vector<16x8xf32> to vector<1x16x8xf32>
    %37 = vector.extract_strided_slice %14 {offsets = [0, 80], sizes = [16, 8], strides = [1, 1]} : vector<16x96xf32> to vector<16x8xf32>
    %38 = vector.shape_cast %37 : vector<16x8xf32> to vector<1x16x8xf32>
    %39 = vector.extract_strided_slice %14 {offsets = [0, 88], sizes = [16, 8], strides = [1, 1]} : vector<16x96xf32> to vector<16x8xf32>
    %40 = vector.shape_cast %39 : vector<16x8xf32> to vector<1x16x8xf32>
    %41 = tpu.concatenate %34, %36, %38, %40 in 0 : vector<1x16x8xf32>, vector<1x16x8xf32>, vector<1x16x8xf32>, vector<1x16x8xf32> -> vector<4x16x8xf32>
    %42 = arith.truncf %23 : vector<4x16x8xf32> to vector<4x16x8xbf16>
    %43 = arith.truncf %32 : vector<4x16x8xf32> to vector<4x16x8xbf16>
    "tpu.trace_start"() <{level = 10 : i32, message = "hnd,hmd->hnm"}> : () -> ()
    %cst_17 = arith.constant dense<0.000000e+00> : vector<4x16x16xf32>
    %44 = tpu.matmul %42, %43, %cst_17 {dimension_numbers = #tpu.dot_dimension_numbers<[2], [2], [1], [1], [0, 0, 0, 1, 1, 1], [0], [0]>} : vector<4x16x8xbf16>, vector<4x16x8xbf16>, vector<4x16x16xf32> -> vector<4x16x16xf32>
    "tpu.trace_stop"() : () -> ()
    %cst_18 = arith.constant 0.353553385 : f32
    %45 = vector.broadcast %cst_18 : f32 to vector<4x16x16xf32>
    %46 = arith.mulf %44, %45 : vector<4x16x16xf32>
    %47 = arith.addf %46, %5 : vector<4x16x16xf32>
    %48 = vector.broadcast %4 : vector<1x1x16xf32> to vector<4x16x16xf32>
    %49 = arith.subf %47, %48 : vector<4x16x16xf32>
    %cst_19 = arith.constant dense<0xFF800000> : vector<4x16xf32>
    %50 = vector.multi_reduction <maximumf>, %49, %cst_19 [2] : vector<4x16x16xf32> to vector<4x16xf32>
    %51 = vector.shape_cast %50 : vector<4x16xf32> to vector<4x16x1xf32>
    %52 = vector.broadcast %51 : vector<4x16x1xf32> to vector<4x16x16xf32>
    %53 = arith.subf %49, %52 : vector<4x16x16xf32>
    %54 = math.exp %53 : vector<4x16x16xf32>
    %cst_20 = arith.constant dense<0.000000e+00> : vector<4x16xf32>
    %55 = vector.multi_reduction <add>, %54, %cst_20 [2] : vector<4x16x16xf32> to vector<4x16xf32>
    %56 = vector.shape_cast %55 : vector<4x16xf32> to vector<4x16x1xf32>
    %57 = tpu.reciprocal %56 {approx = true} : vector<4x16x1xf32> -> vector<4x16x1xf32>
    %58 = vector.broadcast %57 : vector<4x16x1xf32> to vector<4x16x16xf32>
    %59 = arith.mulf %54, %58 : vector<4x16x16xf32>
    %60 = arith.truncf %59 : vector<4x16x16xf32> to vector<4x16x16xbf16>
    %61 = arith.truncf %41 : vector<4x16x8xf32> to vector<4x16x8xbf16>
    "tpu.trace_start"() <{level = 10 : i32, message = "hnm,hmv->hnv"}> : () -> ()
    %cst_21 = arith.constant dense<0.000000e+00> : vector<4x16x8xf32>
    %62 = tpu.matmul %60, %61, %cst_21 {dimension_numbers = #tpu.dot_dimension_numbers<[2], [1], [1], [2], [0, 0, 0, 1, 1, 2], [0], [0]>} : vector<4x16x16xbf16>, vector<4x16x8xbf16>, vector<4x16x8xf32> -> vector<4x16x8xf32>
    "tpu.trace_stop"() : () -> ()
    %63 = arith.truncf %62 : vector<4x16x8xf32> to vector<4x16x8xbf16>
    %c0_22 = arith.constant 0 : index
    %c0_23 = arith.constant 0 : index
    %c0_24 = arith.constant 0 : index
    %c0_25 = arith.constant 0 : index
    %64 = vector.load %arg6[%c0_22, %c0_23, %c0_24, %c0_25] : memref<3x4x8x32xbf16, #tpu.memory_space<vmem>>, vector<1x4x8x32xbf16>
    %65 = vector.shape_cast %64 : vector<1x4x8x32xbf16> to vector<4x8x32xbf16>
    "tpu.trace_start"() <{level = 10 : i32, message = "hnv,hvm->hnm"}> : () -> ()
    %cst_26 = arith.constant dense<0.000000e+00> : vector<4x16x32xf32>
    %66 = tpu.matmul %63, %65, %cst_26 {dimension_numbers = #tpu.dot_dimension_numbers<[2], [1], [1], [2], [0, 0, 0, 1, 1, 2], [0], [0]>} : vector<4x16x8xbf16>, vector<4x8x32xbf16>, vector<4x16x32xf32> -> vector<4x16x32xf32>
    "tpu.trace_stop"() : () -> ()
    %cst_27 = arith.constant dense<0.000000e+00> : vector<16x32xf32>
    %67 = vector.multi_reduction <add>, %66, %cst_27 [0] : vector<4x16x32xf32> to vector<16x32xf32>
    %c0_28 = arith.constant 0 : index
    %c0_29 = arith.constant 0 : index
    %c0_30 = arith.constant 0 : index
    %68 = vector.load %arg7[%c0_28, %c0_29, %c0_30] : memref<3x1x32xf32, #tpu.memory_space<vmem>>, vector<1x1x32xf32>
    %69 = vector.shape_cast %68 : vector<1x1x32xf32> to vector<1x32xf32>
    %70 = vector.broadcast %69 : vector<1x32xf32> to vector<16x32xf32>
    %71 = arith.addf %67, %70 : vector<16x32xf32>
    %72 = arith.addf %1, %71 : vector<16x32xf32>
    %c0_31 = arith.constant 0 : index
    %c0_32 = arith.constant 0 : index
    %c0_33 = arith.constant 0 : index
    %73 = vector.load %arg8[%c0_31, %c0_32, %c0_33] : memref<3x1x32xf32, #tpu.memory_space<vmem>>, vector<1x1x32xf32>
    %74 = vector.shape_cast %73 : vector<1x1x32xf32> to vector<1x32xf32>
    %c0_34 = arith.constant 0 : index
    %c0_35 = arith.constant 0 : index
    %c0_36 = arith.constant 0 : index
    %75 = vector.load %arg9[%c0_34, %c0_35, %c0_36] : memref<3x1x32xf32, #tpu.memory_space<vmem>>, vector<1x1x32xf32>
    %76 = vector.shape_cast %75 : vector<1x1x32xf32> to vector<1x32xf32>
    %cst_37 = arith.constant dense<0.000000e+00> : vector<16xf32>
    %77 = vector.multi_reduction <add>, %72, %cst_37 [1] : vector<16x32xf32> to vector<16xf32>
    %78 = vector.shape_cast %77 : vector<16xf32> to vector<16x1xf32>
    %cst_38 = arith.constant 3.200000e+01 : f32
    %79 = vector.broadcast %cst_38 : f32 to vector<16x1xf32>
    %80 = arith.divf %78, %79 : vector<16x1xf32>
    %81 = vector.broadcast %80 : vector<16x1xf32> to vector<16x32xf32>
    %82 = arith.subf %72, %81 : vector<16x32xf32>
    %83 = arith.mulf %82, %82 : vector<16x32xf32>
    %cst_39 = arith.constant dense<0.000000e+00> : vector<16xf32>
    %84 = vector.multi_reduction <add>, %83, %cst_39 [1] : vector<16x32xf32> to vector<16xf32>
    %85 = vector.shape_cast %84 : vector<16xf32> to vector<16x1xf32>
    %cst_40 = arith.constant 3.200000e+01 : f32
    %86 = vector.broadcast %cst_40 : f32 to vector<16x1xf32>
    %87 = arith.divf %85, %86 : vector<16x1xf32>
    %cst_41 = arith.constant 9.99999974E-6 : f32
    %88 = vector.broadcast %cst_41 : f32 to vector<16x1xf32>
    %89 = arith.addf %87, %88 : vector<16x1xf32>
    %90 = math.rsqrt %89 : vector<16x1xf32>
    %91 = vector.broadcast %90 : vector<16x1xf32> to vector<16x32xf32>
    %92 = arith.mulf %82, %91 : vector<16x32xf32>
    %93 = vector.broadcast %74 : vector<1x32xf32> to vector<16x32xf32>
    %94 = arith.mulf %92, %93 : vector<16x32xf32>
    %95 = vector.broadcast %76 : vector<1x32xf32> to vector<16x32xf32>
    %96 = arith.addf %94, %95 : vector<16x32xf32>
    %97 = vector.shape_cast %96 : vector<16x32xf32> to vector<1x16x32xf32>
    %c0_42 = arith.constant 0 : index
    %c0_43 = arith.constant 0 : index
    %c0_44 = arith.constant 0 : index
    %98 = vector.load %arg11[%c0_42, %c0_43, %c0_44] : memref<3x9x32xf32, #tpu.memory_space<vmem>>, vector<1x9x32xf32>
    %99 = vector.shape_cast %98 : vector<1x9x32xf32> to vector<9x32xf32>
    %100 = vector.shape_cast %99 : vector<9x32xf32> to vector<9x1x32xf32>
    %101 = vector.broadcast %97 : vector<1x16x32xf32> to vector<9x16x32xf32>
    %102 = vector.broadcast %100 : vector<9x1x32xf32> to vector<9x16x32xf32>
    %103 = arith.mulf %101, %102 : vector<9x16x32xf32>
    %104 = vector.shape_cast %103 : vector<9x16x32xf32> to vector<144x32xf32>
    %105 = arith.truncf %104 : vector<144x32xf32> to vector<144x32xbf16>
    %cst_45 = arith.constant dense<0.000000e+00> : vector<16x32xf32>
    %106 = tpu.matmul %6, %105, %cst_45 {dimension_numbers = #tpu.dot_dimension_numbers<[1], [0], [0], [1], [0, 0, 1, 1], [], []>} : vector<16x144xbf16>, vector<144x32xbf16>, vector<16x32xf32> -> vector<16x32xf32>
    %c0_46 = arith.constant 0 : index
    %c0_47 = arith.constant 0 : index
    %c0_48 = arith.constant 0 : index
    %107 = vector.load %arg12[%c0_46, %c0_47, %c0_48] : memref<3x1x32xf32, #tpu.memory_space<vmem>>, vector<1x1x32xf32>
    %108 = vector.shape_cast %107 : vector<1x1x32xf32> to vector<1x32xf32>
    %109 = vector.broadcast %108 : vector<1x32xf32> to vector<16x32xf32>
    %110 = arith.addf %106, %109 : vector<16x32xf32>
    %cst_49 = arith.constant 5.000000e-01 : f32
    %111 = vector.broadcast %cst_49 : f32 to vector<16x32xf32>
    %112 = arith.mulf %111, %110 : vector<16x32xf32>
    %cst_50 = arith.constant 4.471500e-02 : f32
    %113 = vector.broadcast %cst_50 : f32 to vector<16x32xf32>
    %114 = arith.mulf %113, %110 : vector<16x32xf32>
    %115 = arith.mulf %114, %110 : vector<16x32xf32>
    %116 = arith.mulf %115, %110 : vector<16x32xf32>
    %117 = arith.addf %110, %116 : vector<16x32xf32>
    %cst_51 = arith.constant 0.797884583 : f32
    %118 = vector.broadcast %cst_51 : f32 to vector<16x32xf32>
    %119 = arith.mulf %118, %117 : vector<16x32xf32>
    %120 = math.tanh %119 : vector<16x32xf32>
    %cst_52 = arith.constant 1.000000e+00 : f32
    %121 = vector.broadcast %cst_52 : f32 to vector<16x32xf32>
    %122 = arith.addf %121, %120 : vector<16x32xf32>
    %123 = arith.mulf %112, %122 : vector<16x32xf32>
    %124 = arith.addf %96, %123 : vector<16x32xf32>
    %c0_53 = arith.constant 0 : index
    %c0_54 = arith.constant 0 : index
    %c0_55 = arith.constant 0 : index
    %125 = vector.load %arg13[%c0_53, %c0_54, %c0_55] : memref<3x1x32xf32, #tpu.memory_space<vmem>>, vector<1x1x32xf32>
    %126 = vector.shape_cast %125 : vector<1x1x32xf32> to vector<1x32xf32>
    %c0_56 = arith.constant 0 : index
    %c0_57 = arith.constant 0 : index
    %c0_58 = arith.constant 0 : index
    %127 = vector.load %arg14[%c0_56, %c0_57, %c0_58] : memref<3x1x32xf32, #tpu.memory_space<vmem>>, vector<1x1x32xf32>
    %128 = vector.shape_cast %127 : vector<1x1x32xf32> to vector<1x32xf32>
    %cst_59 = arith.constant dense<0.000000e+00> : vector<16xf32>
    %129 = vector.multi_reduction <add>, %124, %cst_59 [1] : vector<16x32xf32> to vector<16xf32>
    %130 = vector.shape_cast %129 : vector<16xf32> to vector<16x1xf32>
    %cst_60 = arith.constant 3.200000e+01 : f32
    %131 = vector.broadcast %cst_60 : f32 to vector<16x1xf32>
    %132 = arith.divf %130, %131 : vector<16x1xf32>
    %133 = vector.broadcast %132 : vector<16x1xf32> to vector<16x32xf32>
    %134 = arith.subf %124, %133 : vector<16x32xf32>
    %135 = arith.mulf %134, %134 : vector<16x32xf32>
    %cst_61 = arith.constant dense<0.000000e+00> : vector<16xf32>
    %136 = vector.multi_reduction <add>, %135, %cst_61 [1] : vector<16x32xf32> to vector<16xf32>
    %137 = vector.shape_cast %136 : vector<16xf32> to vector<16x1xf32>
    %cst_62 = arith.constant 3.200000e+01 : f32
    %138 = vector.broadcast %cst_62 : f32 to vector<16x1xf32>
    %139 = arith.divf %137, %138 : vector<16x1xf32>
    %cst_63 = arith.constant 9.99999974E-6 : f32
    %140 = vector.broadcast %cst_63 : f32 to vector<16x1xf32>
    %141 = arith.addf %139, %140 : vector<16x1xf32>
    %142 = math.rsqrt %141 : vector<16x1xf32>
    %143 = vector.broadcast %142 : vector<16x1xf32> to vector<16x32xf32>
    %144 = arith.mulf %134, %143 : vector<16x32xf32>
    %145 = vector.broadcast %126 : vector<1x32xf32> to vector<16x32xf32>
    %146 = arith.mulf %144, %145 : vector<16x32xf32>
    %147 = vector.broadcast %128 : vector<1x32xf32> to vector<16x32xf32>
    %148 = arith.addf %146, %147 : vector<16x32xf32>
    %149 = arith.truncf %148 : vector<16x32xf32> to vector<16x32xbf16>
    %c0_64 = arith.constant 0 : index
    %c0_65 = arith.constant 0 : index
    %c0_66 = arith.constant 0 : index
    %150 = vector.load %arg15[%c0_64, %c0_65, %c0_66] : memref<3x32x64xbf16, #tpu.memory_space<vmem>>, vector<1x32x64xbf16>
    %151 = vector.shape_cast %150 : vector<1x32x64xbf16> to vector<32x64xbf16>
    %cst_67 = arith.constant dense<0.000000e+00> : vector<16x64xf32>
    %152 = tpu.matmul %149, %151, %cst_67 {dimension_numbers = #tpu.dot_dimension_numbers<[1], [0], [0], [1], [0, 0, 1, 1], [], []>} : vector<16x32xbf16>, vector<32x64xbf16>, vector<16x64xf32> -> vector<16x64xf32>
    %c0_68 = arith.constant 0 : index
    %c0_69 = arith.constant 0 : index
    %c0_70 = arith.constant 0 : index
    %153 = vector.load %arg16[%c0_68, %c0_69, %c0_70] : memref<3x1x64xf32, #tpu.memory_space<vmem>>, vector<1x1x64xf32>
    %154 = vector.shape_cast %153 : vector<1x1x64xf32> to vector<1x64xf32>
    %155 = vector.broadcast %154 : vector<1x64xf32> to vector<16x64xf32>
    %156 = arith.addf %152, %155 : vector<16x64xf32>
    %cst_71 = arith.constant 0.000000e+00 : f32
    %157 = vector.broadcast %cst_71 : f32 to vector<16x64xf32>
    %158 = arith.maximumf %156, %157 : vector<16x64xf32>
    %159 = arith.truncf %158 : vector<16x64xf32> to vector<16x64xbf16>
    %c0_72 = arith.constant 0 : index
    %c0_73 = arith.constant 0 : index
    %c0_74 = arith.constant 0 : index
    %160 = vector.load %arg17[%c0_72, %c0_73, %c0_74] : memref<3x64x32xbf16, #tpu.memory_space<vmem>>, vector<1x64x32xbf16>
    %161 = vector.shape_cast %160 : vector<1x64x32xbf16> to vector<64x32xbf16>
    %cst_75 = arith.constant dense<0.000000e+00> : vector<16x32xf32>
    %162 = tpu.matmul %159, %161, %cst_75 {dimension_numbers = #tpu.dot_dimension_numbers<[1], [0], [0], [1], [0, 0, 1, 1], [], []>} : vector<16x64xbf16>, vector<64x32xbf16>, vector<16x32xf32> -> vector<16x32xf32>
    %c0_76 = arith.constant 0 : index
    %c0_77 = arith.constant 0 : index
    %c0_78 = arith.constant 0 : index
    %163 = vector.load %arg18[%c0_76, %c0_77, %c0_78] : memref<3x1x32xf32, #tpu.memory_space<vmem>>, vector<1x1x32xf32>
    %164 = vector.shape_cast %163 : vector<1x1x32xf32> to vector<1x32xf32>
    %165 = vector.broadcast %164 : vector<1x32xf32> to vector<16x32xf32>
    %166 = arith.addf %162, %165 : vector<16x32xf32>
    %167 = arith.addf %148, %166 : vector<16x32xf32>
    %c0_79 = arith.constant 0 : index
    %c0_80 = arith.constant 0 : index
    %c0_81 = arith.constant 0 : index
    %168 = vector.load %arg19[%c0_79, %c0_80, %c0_81] : memref<3x1x32xf32, #tpu.memory_space<vmem>>, vector<1x1x32xf32>
    %169 = vector.shape_cast %168 : vector<1x1x32xf32> to vector<1x32xf32>
    %c0_82 = arith.constant 0 : index
    %c0_83 = arith.constant 0 : index
    %c0_84 = arith.constant 0 : index
    %170 = vector.load %arg20[%c0_82, %c0_83, %c0_84] : memref<3x1x32xf32, #tpu.memory_space<vmem>>, vector<1x1x32xf32>
    %171 = vector.shape_cast %170 : vector<1x1x32xf32> to vector<1x32xf32>
    %cst_85 = arith.constant dense<0.000000e+00> : vector<16xf32>
    %172 = vector.multi_reduction <add>, %167, %cst_85 [1] : vector<16x32xf32> to vector<16xf32>
    %173 = vector.shape_cast %172 : vector<16xf32> to vector<16x1xf32>
    %cst_86 = arith.constant 3.200000e+01 : f32
    %174 = vector.broadcast %cst_86 : f32 to vector<16x1xf32>
    %175 = arith.divf %173, %174 : vector<16x1xf32>
    %176 = vector.broadcast %175 : vector<16x1xf32> to vector<16x32xf32>
    %177 = arith.subf %167, %176 : vector<16x32xf32>
    %178 = arith.mulf %177, %177 : vector<16x32xf32>
    %cst_87 = arith.constant dense<0.000000e+00> : vector<16xf32>
    %179 = vector.multi_reduction <add>, %178, %cst_87 [1] : vector<16x32xf32> to vector<16xf32>
    %180 = vector.shape_cast %179 : vector<16xf32> to vector<16x1xf32>
    %cst_88 = arith.constant 3.200000e+01 : f32
    %181 = vector.broadcast %cst_88 : f32 to vector<16x1xf32>
    %182 = arith.divf %180, %181 : vector<16x1xf32>
    %cst_89 = arith.constant 9.99999974E-6 : f32
    %183 = vector.broadcast %cst_89 : f32 to vector<16x1xf32>
    %184 = arith.addf %182, %183 : vector<16x1xf32>
    %185 = math.rsqrt %184 : vector<16x1xf32>
    %186 = vector.broadcast %185 : vector<16x1xf32> to vector<16x32xf32>
    %187 = arith.mulf %177, %186 : vector<16x32xf32>
    %188 = vector.broadcast %169 : vector<1x32xf32> to vector<16x32xf32>
    %189 = arith.mulf %187, %188 : vector<16x32xf32>
    %190 = vector.broadcast %171 : vector<1x32xf32> to vector<16x32xf32>
    %191 = arith.addf %189, %190 : vector<16x32xf32>
    %192 = arith.truncf %191 : vector<16x32xf32> to vector<16x32xbf16>
    %c1 = arith.constant 1 : index
    %c0_90 = arith.constant 0 : index
    %c0_91 = arith.constant 0 : index
    %193 = vector.load %arg4[%c1, %c0_90, %c0_91] : memref<3x32x96xbf16, #tpu.memory_space<vmem>>, vector<1x32x96xbf16>
    %194 = vector.shape_cast %193 : vector<1x32x96xbf16> to vector<32x96xbf16>
    %cst_92 = arith.constant dense<0.000000e+00> : vector<16x96xf32>
    %195 = tpu.matmul %192, %194, %cst_92 {dimension_numbers = #tpu.dot_dimension_numbers<[1], [0], [0], [1], [0, 0, 1, 1], [], []>} : vector<16x32xbf16>, vector<32x96xbf16>, vector<16x96xf32> -> vector<16x96xf32>
    %c1_93 = arith.constant 1 : index
    %c0_94 = arith.constant 0 : index
    %c0_95 = arith.constant 0 : index
    %196 = vector.load %arg5[%c1_93, %c0_94, %c0_95] : memref<3x1x96xf32, #tpu.memory_space<vmem>>, vector<1x1x96xf32>
    %197 = vector.shape_cast %196 : vector<1x1x96xf32> to vector<1x96xf32>
    %198 = vector.broadcast %197 : vector<1x96xf32> to vector<16x96xf32>
    %199 = arith.addf %195, %198 : vector<16x96xf32>
    %200 = vector.extract_strided_slice %199 {offsets = [0, 0], sizes = [16, 8], strides = [1, 1]} : vector<16x96xf32> to vector<16x8xf32>
    %201 = vector.shape_cast %200 : vector<16x8xf32> to vector<1x16x8xf32>
    %202 = vector.extract_strided_slice %199 {offsets = [0, 8], sizes = [16, 8], strides = [1, 1]} : vector<16x96xf32> to vector<16x8xf32>
    %203 = vector.shape_cast %202 : vector<16x8xf32> to vector<1x16x8xf32>
    %204 = vector.extract_strided_slice %199 {offsets = [0, 16], sizes = [16, 8], strides = [1, 1]} : vector<16x96xf32> to vector<16x8xf32>
    %205 = vector.shape_cast %204 : vector<16x8xf32> to vector<1x16x8xf32>
    %206 = vector.extract_strided_slice %199 {offsets = [0, 24], sizes = [16, 8], strides = [1, 1]} : vector<16x96xf32> to vector<16x8xf32>
    %207 = vector.shape_cast %206 : vector<16x8xf32> to vector<1x16x8xf32>
    %208 = tpu.concatenate %201, %203, %205, %207 in 0 : vector<1x16x8xf32>, vector<1x16x8xf32>, vector<1x16x8xf32>, vector<1x16x8xf32> -> vector<4x16x8xf32>
    %209 = vector.extract_strided_slice %199 {offsets = [0, 32], sizes = [16, 8], strides = [1, 1]} : vector<16x96xf32> to vector<16x8xf32>
    %210 = vector.shape_cast %209 : vector<16x8xf32> to vector<1x16x8xf32>
    %211 = vector.extract_strided_slice %199 {offsets = [0, 40], sizes = [16, 8], strides = [1, 1]} : vector<16x96xf32> to vector<16x8xf32>
    %212 = vector.shape_cast %211 : vector<16x8xf32> to vector<1x16x8xf32>
    %213 = vector.extract_strided_slice %199 {offsets = [0, 48], sizes = [16, 8], strides = [1, 1]} : vector<16x96xf32> to vector<16x8xf32>
    %214 = vector.shape_cast %213 : vector<16x8xf32> to vector<1x16x8xf32>
    %215 = vector.extract_strided_slice %199 {offsets = [0, 56], sizes = [16, 8], strides = [1, 1]} : vector<16x96xf32> to vector<16x8xf32>
    %216 = vector.shape_cast %215 : vector<16x8xf32> to vector<1x16x8xf32>
    %217 = tpu.concatenate %210, %212, %214, %216 in 0 : vector<1x16x8xf32>, vector<1x16x8xf32>, vector<1x16x8xf32>, vector<1x16x8xf32> -> vector<4x16x8xf32>
    %218 = vector.extract_strided_slice %199 {offsets = [0, 64], sizes = [16, 8], strides = [1, 1]} : vector<16x96xf32> to vector<16x8xf32>
    %219 = vector.shape_cast %218 : vector<16x8xf32> to vector<1x16x8xf32>
    %220 = vector.extract_strided_slice %199 {offsets = [0, 72], sizes = [16, 8], strides = [1, 1]} : vector<16x96xf32> to vector<16x8xf32>
    %221 = vector.shape_cast %220 : vector<16x8xf32> to vector<1x16x8xf32>
    %222 = vector.extract_strided_slice %199 {offsets = [0, 80], sizes = [16, 8], strides = [1, 1]} : vector<16x96xf32> to vector<16x8xf32>
    %223 = vector.shape_cast %222 : vector<16x8xf32> to vector<1x16x8xf32>
    %224 = vector.extract_strided_slice %199 {offsets = [0, 88], sizes = [16, 8], strides = [1, 1]} : vector<16x96xf32> to vector<16x8xf32>
    %225 = vector.shape_cast %224 : vector<16x8xf32> to vector<1x16x8xf32>
    %226 = tpu.concatenate %219, %221, %223, %225 in 0 : vector<1x16x8xf32>, vector<1x16x8xf32>, vector<1x16x8xf32>, vector<1x16x8xf32> -> vector<4x16x8xf32>
    %227 = arith.truncf %208 : vector<4x16x8xf32> to vector<4x16x8xbf16>
    %228 = arith.truncf %217 : vector<4x16x8xf32> to vector<4x16x8xbf16>
    "tpu.trace_start"() <{level = 10 : i32, message = "hnd,hmd->hnm"}> : () -> ()
    %cst_96 = arith.constant dense<0.000000e+00> : vector<4x16x16xf32>
    %229 = tpu.matmul %227, %228, %cst_96 {dimension_numbers = #tpu.dot_dimension_numbers<[2], [2], [1], [1], [0, 0, 0, 1, 1, 1], [0], [0]>} : vector<4x16x8xbf16>, vector<4x16x8xbf16>, vector<4x16x16xf32> -> vector<4x16x16xf32>
    "tpu.trace_stop"() : () -> ()
    %cst_97 = arith.constant 0.353553385 : f32
    %230 = vector.broadcast %cst_97 : f32 to vector<4x16x16xf32>
    %231 = arith.mulf %229, %230 : vector<4x16x16xf32>
    %232 = arith.addf %231, %5 : vector<4x16x16xf32>
    %233 = vector.broadcast %4 : vector<1x1x16xf32> to vector<4x16x16xf32>
    %234 = arith.subf %232, %233 : vector<4x16x16xf32>
    %cst_98 = arith.constant dense<0xFF800000> : vector<4x16xf32>
    %235 = vector.multi_reduction <maximumf>, %234, %cst_98 [2] : vector<4x16x16xf32> to vector<4x16xf32>
    %236 = vector.shape_cast %235 : vector<4x16xf32> to vector<4x16x1xf32>
    %237 = vector.broadcast %236 : vector<4x16x1xf32> to vector<4x16x16xf32>
    %238 = arith.subf %234, %237 : vector<4x16x16xf32>
    %239 = math.exp %238 : vector<4x16x16xf32>
    %cst_99 = arith.constant dense<0.000000e+00> : vector<4x16xf32>
    %240 = vector.multi_reduction <add>, %239, %cst_99 [2] : vector<4x16x16xf32> to vector<4x16xf32>
    %241 = vector.shape_cast %240 : vector<4x16xf32> to vector<4x16x1xf32>
    %242 = tpu.reciprocal %241 {approx = true} : vector<4x16x1xf32> -> vector<4x16x1xf32>
    %243 = vector.broadcast %242 : vector<4x16x1xf32> to vector<4x16x16xf32>
    %244 = arith.mulf %239, %243 : vector<4x16x16xf32>
    %245 = arith.truncf %244 : vector<4x16x16xf32> to vector<4x16x16xbf16>
    %246 = arith.truncf %226 : vector<4x16x8xf32> to vector<4x16x8xbf16>
    "tpu.trace_start"() <{level = 10 : i32, message = "hnm,hmv->hnv"}> : () -> ()
    %cst_100 = arith.constant dense<0.000000e+00> : vector<4x16x8xf32>
    %247 = tpu.matmul %245, %246, %cst_100 {dimension_numbers = #tpu.dot_dimension_numbers<[2], [1], [1], [2], [0, 0, 0, 1, 1, 2], [0], [0]>} : vector<4x16x16xbf16>, vector<4x16x8xbf16>, vector<4x16x8xf32> -> vector<4x16x8xf32>
    "tpu.trace_stop"() : () -> ()
    %248 = arith.truncf %247 : vector<4x16x8xf32> to vector<4x16x8xbf16>
    %c1_101 = arith.constant 1 : index
    %c0_102 = arith.constant 0 : index
    %c0_103 = arith.constant 0 : index
    %c0_104 = arith.constant 0 : index
    %249 = vector.load %arg6[%c1_101, %c0_102, %c0_103, %c0_104] : memref<3x4x8x32xbf16, #tpu.memory_space<vmem>>, vector<1x4x8x32xbf16>
    %250 = vector.shape_cast %249 : vector<1x4x8x32xbf16> to vector<4x8x32xbf16>
    "tpu.trace_start"() <{level = 10 : i32, message = "hnv,hvm->hnm"}> : () -> ()
    %cst_105 = arith.constant dense<0.000000e+00> : vector<4x16x32xf32>
    %251 = tpu.matmul %248, %250, %cst_105 {dimension_numbers = #tpu.dot_dimension_numbers<[2], [1], [1], [2], [0, 0, 0, 1, 1, 2], [0], [0]>} : vector<4x16x8xbf16>, vector<4x8x32xbf16>, vector<4x16x32xf32> -> vector<4x16x32xf32>
    "tpu.trace_stop"() : () -> ()
    %cst_106 = arith.constant dense<0.000000e+00> : vector<16x32xf32>
    %252 = vector.multi_reduction <add>, %251, %cst_106 [0] : vector<4x16x32xf32> to vector<16x32xf32>
    %c1_107 = arith.constant 1 : index
    %c0_108 = arith.constant 0 : index
    %c0_109 = arith.constant 0 : index
    %253 = vector.load %arg7[%c1_107, %c0_108, %c0_109] : memref<3x1x32xf32, #tpu.memory_space<vmem>>, vector<1x1x32xf32>
    %254 = vector.shape_cast %253 : vector<1x1x32xf32> to vector<1x32xf32>
    %255 = vector.broadcast %254 : vector<1x32xf32> to vector<16x32xf32>
    %256 = arith.addf %252, %255 : vector<16x32xf32>
    %257 = arith.addf %191, %256 : vector<16x32xf32>
    %c1_110 = arith.constant 1 : index
    %c0_111 = arith.constant 0 : index
    %c0_112 = arith.constant 0 : index
    %258 = vector.load %arg8[%c1_110, %c0_111, %c0_112] : memref<3x1x32xf32, #tpu.memory_space<vmem>>, vector<1x1x32xf32>
    %259 = vector.shape_cast %258 : vector<1x1x32xf32> to vector<1x32xf32>
    %c1_113 = arith.constant 1 : index
    %c0_114 = arith.constant 0 : index
    %c0_115 = arith.constant 0 : index
    %260 = vector.load %arg9[%c1_113, %c0_114, %c0_115] : memref<3x1x32xf32, #tpu.memory_space<vmem>>, vector<1x1x32xf32>
    %261 = vector.shape_cast %260 : vector<1x1x32xf32> to vector<1x32xf32>
    %cst_116 = arith.constant dense<0.000000e+00> : vector<16xf32>
    %262 = vector.multi_reduction <add>, %257, %cst_116 [1] : vector<16x32xf32> to vector<16xf32>
    %263 = vector.shape_cast %262 : vector<16xf32> to vector<16x1xf32>
    %cst_117 = arith.constant 3.200000e+01 : f32
    %264 = vector.broadcast %cst_117 : f32 to vector<16x1xf32>
    %265 = arith.divf %263, %264 : vector<16x1xf32>
    %266 = vector.broadcast %265 : vector<16x1xf32> to vector<16x32xf32>
    %267 = arith.subf %257, %266 : vector<16x32xf32>
    %268 = arith.mulf %267, %267 : vector<16x32xf32>
    %cst_118 = arith.constant dense<0.000000e+00> : vector<16xf32>
    %269 = vector.multi_reduction <add>, %268, %cst_118 [1] : vector<16x32xf32> to vector<16xf32>
    %270 = vector.shape_cast %269 : vector<16xf32> to vector<16x1xf32>
    %cst_119 = arith.constant 3.200000e+01 : f32
    %271 = vector.broadcast %cst_119 : f32 to vector<16x1xf32>
    %272 = arith.divf %270, %271 : vector<16x1xf32>
    %cst_120 = arith.constant 9.99999974E-6 : f32
    %273 = vector.broadcast %cst_120 : f32 to vector<16x1xf32>
    %274 = arith.addf %272, %273 : vector<16x1xf32>
    %275 = math.rsqrt %274 : vector<16x1xf32>
    %276 = vector.broadcast %275 : vector<16x1xf32> to vector<16x32xf32>
    %277 = arith.mulf %267, %276 : vector<16x32xf32>
    %278 = vector.broadcast %259 : vector<1x32xf32> to vector<16x32xf32>
    %279 = arith.mulf %277, %278 : vector<16x32xf32>
    %280 = vector.broadcast %261 : vector<1x32xf32> to vector<16x32xf32>
    %281 = arith.addf %279, %280 : vector<16x32xf32>
    %282 = vector.shape_cast %281 : vector<16x32xf32> to vector<1x16x32xf32>
    %c1_121 = arith.constant 1 : index
    %c0_122 = arith.constant 0 : index
    %c0_123 = arith.constant 0 : index
    %283 = vector.load %arg11[%c1_121, %c0_122, %c0_123] : memref<3x9x32xf32, #tpu.memory_space<vmem>>, vector<1x9x32xf32>
    %284 = vector.shape_cast %283 : vector<1x9x32xf32> to vector<9x32xf32>
    %285 = vector.shape_cast %284 : vector<9x32xf32> to vector<9x1x32xf32>
    %286 = vector.broadcast %282 : vector<1x16x32xf32> to vector<9x16x32xf32>
    %287 = vector.broadcast %285 : vector<9x1x32xf32> to vector<9x16x32xf32>
    %288 = arith.mulf %286, %287 : vector<9x16x32xf32>
    %289 = vector.shape_cast %288 : vector<9x16x32xf32> to vector<144x32xf32>
    %290 = arith.truncf %289 : vector<144x32xf32> to vector<144x32xbf16>
    %cst_124 = arith.constant dense<0.000000e+00> : vector<16x32xf32>
    %291 = tpu.matmul %6, %290, %cst_124 {dimension_numbers = #tpu.dot_dimension_numbers<[1], [0], [0], [1], [0, 0, 1, 1], [], []>} : vector<16x144xbf16>, vector<144x32xbf16>, vector<16x32xf32> -> vector<16x32xf32>
    %c1_125 = arith.constant 1 : index
    %c0_126 = arith.constant 0 : index
    %c0_127 = arith.constant 0 : index
    %292 = vector.load %arg12[%c1_125, %c0_126, %c0_127] : memref<3x1x32xf32, #tpu.memory_space<vmem>>, vector<1x1x32xf32>
    %293 = vector.shape_cast %292 : vector<1x1x32xf32> to vector<1x32xf32>
    %294 = vector.broadcast %293 : vector<1x32xf32> to vector<16x32xf32>
    %295 = arith.addf %291, %294 : vector<16x32xf32>
    %cst_128 = arith.constant 5.000000e-01 : f32
    %296 = vector.broadcast %cst_128 : f32 to vector<16x32xf32>
    %297 = arith.mulf %296, %295 : vector<16x32xf32>
    %cst_129 = arith.constant 4.471500e-02 : f32
    %298 = vector.broadcast %cst_129 : f32 to vector<16x32xf32>
    %299 = arith.mulf %298, %295 : vector<16x32xf32>
    %300 = arith.mulf %299, %295 : vector<16x32xf32>
    %301 = arith.mulf %300, %295 : vector<16x32xf32>
    %302 = arith.addf %295, %301 : vector<16x32xf32>
    %cst_130 = arith.constant 0.797884583 : f32
    %303 = vector.broadcast %cst_130 : f32 to vector<16x32xf32>
    %304 = arith.mulf %303, %302 : vector<16x32xf32>
    %305 = math.tanh %304 : vector<16x32xf32>
    %cst_131 = arith.constant 1.000000e+00 : f32
    %306 = vector.broadcast %cst_131 : f32 to vector<16x32xf32>
    %307 = arith.addf %306, %305 : vector<16x32xf32>
    %308 = arith.mulf %297, %307 : vector<16x32xf32>
    %309 = arith.addf %281, %308 : vector<16x32xf32>
    %c1_132 = arith.constant 1 : index
    %c0_133 = arith.constant 0 : index
    %c0_134 = arith.constant 0 : index
    %310 = vector.load %arg13[%c1_132, %c0_133, %c0_134] : memref<3x1x32xf32, #tpu.memory_space<vmem>>, vector<1x1x32xf32>
    %311 = vector.shape_cast %310 : vector<1x1x32xf32> to vector<1x32xf32>
    %c1_135 = arith.constant 1 : index
    %c0_136 = arith.constant 0 : index
    %c0_137 = arith.constant 0 : index
    %312 = vector.load %arg14[%c1_135, %c0_136, %c0_137] : memref<3x1x32xf32, #tpu.memory_space<vmem>>, vector<1x1x32xf32>
    %313 = vector.shape_cast %312 : vector<1x1x32xf32> to vector<1x32xf32>
    %cst_138 = arith.constant dense<0.000000e+00> : vector<16xf32>
    %314 = vector.multi_reduction <add>, %309, %cst_138 [1] : vector<16x32xf32> to vector<16xf32>
    %315 = vector.shape_cast %314 : vector<16xf32> to vector<16x1xf32>
    %cst_139 = arith.constant 3.200000e+01 : f32
    %316 = vector.broadcast %cst_139 : f32 to vector<16x1xf32>
    %317 = arith.divf %315, %316 : vector<16x1xf32>
    %318 = vector.broadcast %317 : vector<16x1xf32> to vector<16x32xf32>
    %319 = arith.subf %309, %318 : vector<16x32xf32>
    %320 = arith.mulf %319, %319 : vector<16x32xf32>
    %cst_140 = arith.constant dense<0.000000e+00> : vector<16xf32>
    %321 = vector.multi_reduction <add>, %320, %cst_140 [1] : vector<16x32xf32> to vector<16xf32>
    %322 = vector.shape_cast %321 : vector<16xf32> to vector<16x1xf32>
    %cst_141 = arith.constant 3.200000e+01 : f32
    %323 = vector.broadcast %cst_141 : f32 to vector<16x1xf32>
    %324 = arith.divf %322, %323 : vector<16x1xf32>
    %cst_142 = arith.constant 9.99999974E-6 : f32
    %325 = vector.broadcast %cst_142 : f32 to vector<16x1xf32>
    %326 = arith.addf %324, %325 : vector<16x1xf32>
    %327 = math.rsqrt %326 : vector<16x1xf32>
    %328 = vector.broadcast %327 : vector<16x1xf32> to vector<16x32xf32>
    %329 = arith.mulf %319, %328 : vector<16x32xf32>
    %330 = vector.broadcast %311 : vector<1x32xf32> to vector<16x32xf32>
    %331 = arith.mulf %329, %330 : vector<16x32xf32>
    %332 = vector.broadcast %313 : vector<1x32xf32> to vector<16x32xf32>
    %333 = arith.addf %331, %332 : vector<16x32xf32>
    %334 = arith.truncf %333 : vector<16x32xf32> to vector<16x32xbf16>
    %c1_143 = arith.constant 1 : index
    %c0_144 = arith.constant 0 : index
    %c0_145 = arith.constant 0 : index
    %335 = vector.load %arg15[%c1_143, %c0_144, %c0_145] : memref<3x32x64xbf16, #tpu.memory_space<vmem>>, vector<1x32x64xbf16>
    %336 = vector.shape_cast %335 : vector<1x32x64xbf16> to vector<32x64xbf16>
    %cst_146 = arith.constant dense<0.000000e+00> : vector<16x64xf32>
    %337 = tpu.matmul %334, %336, %cst_146 {dimension_numbers = #tpu.dot_dimension_numbers<[1], [0], [0], [1], [0, 0, 1, 1], [], []>} : vector<16x32xbf16>, vector<32x64xbf16>, vector<16x64xf32> -> vector<16x64xf32>
    %c1_147 = arith.constant 1 : index
    %c0_148 = arith.constant 0 : index
    %c0_149 = arith.constant 0 : index
    %338 = vector.load %arg16[%c1_147, %c0_148, %c0_149] : memref<3x1x64xf32, #tpu.memory_space<vmem>>, vector<1x1x64xf32>
    %339 = vector.shape_cast %338 : vector<1x1x64xf32> to vector<1x64xf32>
    %340 = vector.broadcast %339 : vector<1x64xf32> to vector<16x64xf32>
    %341 = arith.addf %337, %340 : vector<16x64xf32>
    %cst_150 = arith.constant 0.000000e+00 : f32
    %342 = vector.broadcast %cst_150 : f32 to vector<16x64xf32>
    %343 = arith.maximumf %341, %342 : vector<16x64xf32>
    %344 = arith.truncf %343 : vector<16x64xf32> to vector<16x64xbf16>
    %c1_151 = arith.constant 1 : index
    %c0_152 = arith.constant 0 : index
    %c0_153 = arith.constant 0 : index
    %345 = vector.load %arg17[%c1_151, %c0_152, %c0_153] : memref<3x64x32xbf16, #tpu.memory_space<vmem>>, vector<1x64x32xbf16>
    %346 = vector.shape_cast %345 : vector<1x64x32xbf16> to vector<64x32xbf16>
    %cst_154 = arith.constant dense<0.000000e+00> : vector<16x32xf32>
    %347 = tpu.matmul %344, %346, %cst_154 {dimension_numbers = #tpu.dot_dimension_numbers<[1], [0], [0], [1], [0, 0, 1, 1], [], []>} : vector<16x64xbf16>, vector<64x32xbf16>, vector<16x32xf32> -> vector<16x32xf32>
    %c1_155 = arith.constant 1 : index
    %c0_156 = arith.constant 0 : index
    %c0_157 = arith.constant 0 : index
    %348 = vector.load %arg18[%c1_155, %c0_156, %c0_157] : memref<3x1x32xf32, #tpu.memory_space<vmem>>, vector<1x1x32xf32>
    %349 = vector.shape_cast %348 : vector<1x1x32xf32> to vector<1x32xf32>
    %350 = vector.broadcast %349 : vector<1x32xf32> to vector<16x32xf32>
    %351 = arith.addf %347, %350 : vector<16x32xf32>
    %352 = arith.addf %333, %351 : vector<16x32xf32>
    %c1_158 = arith.constant 1 : index
    %c0_159 = arith.constant 0 : index
    %c0_160 = arith.constant 0 : index
    %353 = vector.load %arg19[%c1_158, %c0_159, %c0_160] : memref<3x1x32xf32, #tpu.memory_space<vmem>>, vector<1x1x32xf32>
    %354 = vector.shape_cast %353 : vector<1x1x32xf32> to vector<1x32xf32>
    %c1_161 = arith.constant 1 : index
    %c0_162 = arith.constant 0 : index
    %c0_163 = arith.constant 0 : index
    %355 = vector.load %arg20[%c1_161, %c0_162, %c0_163] : memref<3x1x32xf32, #tpu.memory_space<vmem>>, vector<1x1x32xf32>
    %356 = vector.shape_cast %355 : vector<1x1x32xf32> to vector<1x32xf32>
    %cst_164 = arith.constant dense<0.000000e+00> : vector<16xf32>
    %357 = vector.multi_reduction <add>, %352, %cst_164 [1] : vector<16x32xf32> to vector<16xf32>
    %358 = vector.shape_cast %357 : vector<16xf32> to vector<16x1xf32>
    %cst_165 = arith.constant 3.200000e+01 : f32
    %359 = vector.broadcast %cst_165 : f32 to vector<16x1xf32>
    %360 = arith.divf %358, %359 : vector<16x1xf32>
    %361 = vector.broadcast %360 : vector<16x1xf32> to vector<16x32xf32>
    %362 = arith.subf %352, %361 : vector<16x32xf32>
    %363 = arith.mulf %362, %362 : vector<16x32xf32>
    %cst_166 = arith.constant dense<0.000000e+00> : vector<16xf32>
    %364 = vector.multi_reduction <add>, %363, %cst_166 [1] : vector<16x32xf32> to vector<16xf32>
    %365 = vector.shape_cast %364 : vector<16xf32> to vector<16x1xf32>
    %cst_167 = arith.constant 3.200000e+01 : f32
    %366 = vector.broadcast %cst_167 : f32 to vector<16x1xf32>
    %367 = arith.divf %365, %366 : vector<16x1xf32>
    %cst_168 = arith.constant 9.99999974E-6 : f32
    %368 = vector.broadcast %cst_168 : f32 to vector<16x1xf32>
    %369 = arith.addf %367, %368 : vector<16x1xf32>
    %370 = math.rsqrt %369 : vector<16x1xf32>
    %371 = vector.broadcast %370 : vector<16x1xf32> to vector<16x32xf32>
    %372 = arith.mulf %362, %371 : vector<16x32xf32>
    %373 = vector.broadcast %354 : vector<1x32xf32> to vector<16x32xf32>
    %374 = arith.mulf %372, %373 : vector<16x32xf32>
    %375 = vector.broadcast %356 : vector<1x32xf32> to vector<16x32xf32>
    %376 = arith.addf %374, %375 : vector<16x32xf32>
    %377 = arith.truncf %376 : vector<16x32xf32> to vector<16x32xbf16>
    %c2 = arith.constant 2 : index
    %c0_169 = arith.constant 0 : index
    %c0_170 = arith.constant 0 : index
    %378 = vector.load %arg4[%c2, %c0_169, %c0_170] : memref<3x32x96xbf16, #tpu.memory_space<vmem>>, vector<1x32x96xbf16>
    %379 = vector.shape_cast %378 : vector<1x32x96xbf16> to vector<32x96xbf16>
    %cst_171 = arith.constant dense<0.000000e+00> : vector<16x96xf32>
    %380 = tpu.matmul %377, %379, %cst_171 {dimension_numbers = #tpu.dot_dimension_numbers<[1], [0], [0], [1], [0, 0, 1, 1], [], []>} : vector<16x32xbf16>, vector<32x96xbf16>, vector<16x96xf32> -> vector<16x96xf32>
    %c2_172 = arith.constant 2 : index
    %c0_173 = arith.constant 0 : index
    %c0_174 = arith.constant 0 : index
    %381 = vector.load %arg5[%c2_172, %c0_173, %c0_174] : memref<3x1x96xf32, #tpu.memory_space<vmem>>, vector<1x1x96xf32>
    %382 = vector.shape_cast %381 : vector<1x1x96xf32> to vector<1x96xf32>
    %383 = vector.broadcast %382 : vector<1x96xf32> to vector<16x96xf32>
    %384 = arith.addf %380, %383 : vector<16x96xf32>
    %385 = vector.extract_strided_slice %384 {offsets = [0, 0], sizes = [16, 8], strides = [1, 1]} : vector<16x96xf32> to vector<16x8xf32>
    %386 = vector.shape_cast %385 : vector<16x8xf32> to vector<1x16x8xf32>
    %387 = vector.extract_strided_slice %384 {offsets = [0, 8], sizes = [16, 8], strides = [1, 1]} : vector<16x96xf32> to vector<16x8xf32>
    %388 = vector.shape_cast %387 : vector<16x8xf32> to vector<1x16x8xf32>
    %389 = vector.extract_strided_slice %384 {offsets = [0, 16], sizes = [16, 8], strides = [1, 1]} : vector<16x96xf32> to vector<16x8xf32>
    %390 = vector.shape_cast %389 : vector<16x8xf32> to vector<1x16x8xf32>
    %391 = vector.extract_strided_slice %384 {offsets = [0, 24], sizes = [16, 8], strides = [1, 1]} : vector<16x96xf32> to vector<16x8xf32>
    %392 = vector.shape_cast %391 : vector<16x8xf32> to vector<1x16x8xf32>
    %393 = tpu.concatenate %386, %388, %390, %392 in 0 : vector<1x16x8xf32>, vector<1x16x8xf32>, vector<1x16x8xf32>, vector<1x16x8xf32> -> vector<4x16x8xf32>
    %394 = vector.extract_strided_slice %384 {offsets = [0, 32], sizes = [16, 8], strides = [1, 1]} : vector<16x96xf32> to vector<16x8xf32>
    %395 = vector.shape_cast %394 : vector<16x8xf32> to vector<1x16x8xf32>
    %396 = vector.extract_strided_slice %384 {offsets = [0, 40], sizes = [16, 8], strides = [1, 1]} : vector<16x96xf32> to vector<16x8xf32>
    %397 = vector.shape_cast %396 : vector<16x8xf32> to vector<1x16x8xf32>
    %398 = vector.extract_strided_slice %384 {offsets = [0, 48], sizes = [16, 8], strides = [1, 1]} : vector<16x96xf32> to vector<16x8xf32>
    %399 = vector.shape_cast %398 : vector<16x8xf32> to vector<1x16x8xf32>
    %400 = vector.extract_strided_slice %384 {offsets = [0, 56], sizes = [16, 8], strides = [1, 1]} : vector<16x96xf32> to vector<16x8xf32>
    %401 = vector.shape_cast %400 : vector<16x8xf32> to vector<1x16x8xf32>
    %402 = tpu.concatenate %395, %397, %399, %401 in 0 : vector<1x16x8xf32>, vector<1x16x8xf32>, vector<1x16x8xf32>, vector<1x16x8xf32> -> vector<4x16x8xf32>
    %403 = vector.extract_strided_slice %384 {offsets = [0, 64], sizes = [16, 8], strides = [1, 1]} : vector<16x96xf32> to vector<16x8xf32>
    %404 = vector.shape_cast %403 : vector<16x8xf32> to vector<1x16x8xf32>
    %405 = vector.extract_strided_slice %384 {offsets = [0, 72], sizes = [16, 8], strides = [1, 1]} : vector<16x96xf32> to vector<16x8xf32>
    %406 = vector.shape_cast %405 : vector<16x8xf32> to vector<1x16x8xf32>
    %407 = vector.extract_strided_slice %384 {offsets = [0, 80], sizes = [16, 8], strides = [1, 1]} : vector<16x96xf32> to vector<16x8xf32>
    %408 = vector.shape_cast %407 : vector<16x8xf32> to vector<1x16x8xf32>
    %409 = vector.extract_strided_slice %384 {offsets = [0, 88], sizes = [16, 8], strides = [1, 1]} : vector<16x96xf32> to vector<16x8xf32>
    %410 = vector.shape_cast %409 : vector<16x8xf32> to vector<1x16x8xf32>
    %411 = tpu.concatenate %404, %406, %408, %410 in 0 : vector<1x16x8xf32>, vector<1x16x8xf32>, vector<1x16x8xf32>, vector<1x16x8xf32> -> vector<4x16x8xf32>
    %412 = arith.truncf %393 : vector<4x16x8xf32> to vector<4x16x8xbf16>
    %413 = arith.truncf %402 : vector<4x16x8xf32> to vector<4x16x8xbf16>
    "tpu.trace_start"() <{level = 10 : i32, message = "hnd,hmd->hnm"}> : () -> ()
    %cst_175 = arith.constant dense<0.000000e+00> : vector<4x16x16xf32>
    %414 = tpu.matmul %412, %413, %cst_175 {dimension_numbers = #tpu.dot_dimension_numbers<[2], [2], [1], [1], [0, 0, 0, 1, 1, 1], [0], [0]>} : vector<4x16x8xbf16>, vector<4x16x8xbf16>, vector<4x16x16xf32> -> vector<4x16x16xf32>
    "tpu.trace_stop"() : () -> ()
    %cst_176 = arith.constant 0.353553385 : f32
    %415 = vector.broadcast %cst_176 : f32 to vector<4x16x16xf32>
    %416 = arith.mulf %414, %415 : vector<4x16x16xf32>
    %417 = arith.addf %416, %5 : vector<4x16x16xf32>
    %418 = vector.broadcast %4 : vector<1x1x16xf32> to vector<4x16x16xf32>
    %419 = arith.subf %417, %418 : vector<4x16x16xf32>
    %cst_177 = arith.constant dense<0xFF800000> : vector<4x16xf32>
    %420 = vector.multi_reduction <maximumf>, %419, %cst_177 [2] : vector<4x16x16xf32> to vector<4x16xf32>
    %421 = vector.shape_cast %420 : vector<4x16xf32> to vector<4x16x1xf32>
    %422 = vector.broadcast %421 : vector<4x16x1xf32> to vector<4x16x16xf32>
    %423 = arith.subf %419, %422 : vector<4x16x16xf32>
    %424 = math.exp %423 : vector<4x16x16xf32>
    %cst_178 = arith.constant dense<0.000000e+00> : vector<4x16xf32>
    %425 = vector.multi_reduction <add>, %424, %cst_178 [2] : vector<4x16x16xf32> to vector<4x16xf32>
    %426 = vector.shape_cast %425 : vector<4x16xf32> to vector<4x16x1xf32>
    %427 = tpu.reciprocal %426 {approx = true} : vector<4x16x1xf32> -> vector<4x16x1xf32>
    %428 = vector.broadcast %427 : vector<4x16x1xf32> to vector<4x16x16xf32>
    %429 = arith.mulf %424, %428 : vector<4x16x16xf32>
    %430 = arith.truncf %429 : vector<4x16x16xf32> to vector<4x16x16xbf16>
    %431 = arith.truncf %411 : vector<4x16x8xf32> to vector<4x16x8xbf16>
    "tpu.trace_start"() <{level = 10 : i32, message = "hnm,hmv->hnv"}> : () -> ()
    %cst_179 = arith.constant dense<0.000000e+00> : vector<4x16x8xf32>
    %432 = tpu.matmul %430, %431, %cst_179 {dimension_numbers = #tpu.dot_dimension_numbers<[2], [1], [1], [2], [0, 0, 0, 1, 1, 2], [0], [0]>} : vector<4x16x16xbf16>, vector<4x16x8xbf16>, vector<4x16x8xf32> -> vector<4x16x8xf32>
    "tpu.trace_stop"() : () -> ()
    %433 = arith.truncf %432 : vector<4x16x8xf32> to vector<4x16x8xbf16>
    %c2_180 = arith.constant 2 : index
    %c0_181 = arith.constant 0 : index
    %c0_182 = arith.constant 0 : index
    %c0_183 = arith.constant 0 : index
    %434 = vector.load %arg6[%c2_180, %c0_181, %c0_182, %c0_183] : memref<3x4x8x32xbf16, #tpu.memory_space<vmem>>, vector<1x4x8x32xbf16>
    %435 = vector.shape_cast %434 : vector<1x4x8x32xbf16> to vector<4x8x32xbf16>
    "tpu.trace_start"() <{level = 10 : i32, message = "hnv,hvm->hnm"}> : () -> ()
    %cst_184 = arith.constant dense<0.000000e+00> : vector<4x16x32xf32>
    %436 = tpu.matmul %433, %435, %cst_184 {dimension_numbers = #tpu.dot_dimension_numbers<[2], [1], [1], [2], [0, 0, 0, 1, 1, 2], [0], [0]>} : vector<4x16x8xbf16>, vector<4x8x32xbf16>, vector<4x16x32xf32> -> vector<4x16x32xf32>
    "tpu.trace_stop"() : () -> ()
    %cst_185 = arith.constant dense<0.000000e+00> : vector<16x32xf32>
    %437 = vector.multi_reduction <add>, %436, %cst_185 [0] : vector<4x16x32xf32> to vector<16x32xf32>
    %c2_186 = arith.constant 2 : index
    %c0_187 = arith.constant 0 : index
    %c0_188 = arith.constant 0 : index
    %438 = vector.load %arg7[%c2_186, %c0_187, %c0_188] : memref<3x1x32xf32, #tpu.memory_space<vmem>>, vector<1x1x32xf32>
    %439 = vector.shape_cast %438 : vector<1x1x32xf32> to vector<1x32xf32>
    %440 = vector.broadcast %439 : vector<1x32xf32> to vector<16x32xf32>
    %441 = arith.addf %437, %440 : vector<16x32xf32>
    %442 = arith.addf %376, %441 : vector<16x32xf32>
    %c2_189 = arith.constant 2 : index
    %c0_190 = arith.constant 0 : index
    %c0_191 = arith.constant 0 : index
    %443 = vector.load %arg8[%c2_189, %c0_190, %c0_191] : memref<3x1x32xf32, #tpu.memory_space<vmem>>, vector<1x1x32xf32>
    %444 = vector.shape_cast %443 : vector<1x1x32xf32> to vector<1x32xf32>
    %c2_192 = arith.constant 2 : index
    %c0_193 = arith.constant 0 : index
    %c0_194 = arith.constant 0 : index
    %445 = vector.load %arg9[%c2_192, %c0_193, %c0_194] : memref<3x1x32xf32, #tpu.memory_space<vmem>>, vector<1x1x32xf32>
    %446 = vector.shape_cast %445 : vector<1x1x32xf32> to vector<1x32xf32>
    %cst_195 = arith.constant dense<0.000000e+00> : vector<16xf32>
    %447 = vector.multi_reduction <add>, %442, %cst_195 [1] : vector<16x32xf32> to vector<16xf32>
    %448 = vector.shape_cast %447 : vector<16xf32> to vector<16x1xf32>
    %cst_196 = arith.constant 3.200000e+01 : f32
    %449 = vector.broadcast %cst_196 : f32 to vector<16x1xf32>
    %450 = arith.divf %448, %449 : vector<16x1xf32>
    %451 = vector.broadcast %450 : vector<16x1xf32> to vector<16x32xf32>
    %452 = arith.subf %442, %451 : vector<16x32xf32>
    %453 = arith.mulf %452, %452 : vector<16x32xf32>
    %cst_197 = arith.constant dense<0.000000e+00> : vector<16xf32>
    %454 = vector.multi_reduction <add>, %453, %cst_197 [1] : vector<16x32xf32> to vector<16xf32>
    %455 = vector.shape_cast %454 : vector<16xf32> to vector<16x1xf32>
    %cst_198 = arith.constant 3.200000e+01 : f32
    %456 = vector.broadcast %cst_198 : f32 to vector<16x1xf32>
    %457 = arith.divf %455, %456 : vector<16x1xf32>
    %cst_199 = arith.constant 9.99999974E-6 : f32
    %458 = vector.broadcast %cst_199 : f32 to vector<16x1xf32>
    %459 = arith.addf %457, %458 : vector<16x1xf32>
    %460 = math.rsqrt %459 : vector<16x1xf32>
    %461 = vector.broadcast %460 : vector<16x1xf32> to vector<16x32xf32>
    %462 = arith.mulf %452, %461 : vector<16x32xf32>
    %463 = vector.broadcast %444 : vector<1x32xf32> to vector<16x32xf32>
    %464 = arith.mulf %462, %463 : vector<16x32xf32>
    %465 = vector.broadcast %446 : vector<1x32xf32> to vector<16x32xf32>
    %466 = arith.addf %464, %465 : vector<16x32xf32>
    %467 = vector.shape_cast %466 : vector<16x32xf32> to vector<1x16x32xf32>
    %c2_200 = arith.constant 2 : index
    %c0_201 = arith.constant 0 : index
    %c0_202 = arith.constant 0 : index
    %468 = vector.load %arg11[%c2_200, %c0_201, %c0_202] : memref<3x9x32xf32, #tpu.memory_space<vmem>>, vector<1x9x32xf32>
    %469 = vector.shape_cast %468 : vector<1x9x32xf32> to vector<9x32xf32>
    %470 = vector.shape_cast %469 : vector<9x32xf32> to vector<9x1x32xf32>
    %471 = vector.broadcast %467 : vector<1x16x32xf32> to vector<9x16x32xf32>
    %472 = vector.broadcast %470 : vector<9x1x32xf32> to vector<9x16x32xf32>
    %473 = arith.mulf %471, %472 : vector<9x16x32xf32>
    %474 = vector.shape_cast %473 : vector<9x16x32xf32> to vector<144x32xf32>
    %475 = arith.truncf %474 : vector<144x32xf32> to vector<144x32xbf16>
    %cst_203 = arith.constant dense<0.000000e+00> : vector<16x32xf32>
    %476 = tpu.matmul %6, %475, %cst_203 {dimension_numbers = #tpu.dot_dimension_numbers<[1], [0], [0], [1], [0, 0, 1, 1], [], []>} : vector<16x144xbf16>, vector<144x32xbf16>, vector<16x32xf32> -> vector<16x32xf32>
    %c2_204 = arith.constant 2 : index
    %c0_205 = arith.constant 0 : index
    %c0_206 = arith.constant 0 : index
    %477 = vector.load %arg12[%c2_204, %c0_205, %c0_206] : memref<3x1x32xf32, #tpu.memory_space<vmem>>, vector<1x1x32xf32>
    %478 = vector.shape_cast %477 : vector<1x1x32xf32> to vector<1x32xf32>
    %479 = vector.broadcast %478 : vector<1x32xf32> to vector<16x32xf32>
    %480 = arith.addf %476, %479 : vector<16x32xf32>
    %cst_207 = arith.constant 5.000000e-01 : f32
    %481 = vector.broadcast %cst_207 : f32 to vector<16x32xf32>
    %482 = arith.mulf %481, %480 : vector<16x32xf32>
    %cst_208 = arith.constant 4.471500e-02 : f32
    %483 = vector.broadcast %cst_208 : f32 to vector<16x32xf32>
    %484 = arith.mulf %483, %480 : vector<16x32xf32>
    %485 = arith.mulf %484, %480 : vector<16x32xf32>
    %486 = arith.mulf %485, %480 : vector<16x32xf32>
    %487 = arith.addf %480, %486 : vector<16x32xf32>
    %cst_209 = arith.constant 0.797884583 : f32
    %488 = vector.broadcast %cst_209 : f32 to vector<16x32xf32>
    %489 = arith.mulf %488, %487 : vector<16x32xf32>
    %490 = math.tanh %489 : vector<16x32xf32>
    %cst_210 = arith.constant 1.000000e+00 : f32
    %491 = vector.broadcast %cst_210 : f32 to vector<16x32xf32>
    %492 = arith.addf %491, %490 : vector<16x32xf32>
    %493 = arith.mulf %482, %492 : vector<16x32xf32>
    %494 = arith.addf %466, %493 : vector<16x32xf32>
    %c2_211 = arith.constant 2 : index
    %c0_212 = arith.constant 0 : index
    %c0_213 = arith.constant 0 : index
    %495 = vector.load %arg13[%c2_211, %c0_212, %c0_213] : memref<3x1x32xf32, #tpu.memory_space<vmem>>, vector<1x1x32xf32>
    %496 = vector.shape_cast %495 : vector<1x1x32xf32> to vector<1x32xf32>
    %c2_214 = arith.constant 2 : index
    %c0_215 = arith.constant 0 : index
    %c0_216 = arith.constant 0 : index
    %497 = vector.load %arg14[%c2_214, %c0_215, %c0_216] : memref<3x1x32xf32, #tpu.memory_space<vmem>>, vector<1x1x32xf32>
    %498 = vector.shape_cast %497 : vector<1x1x32xf32> to vector<1x32xf32>
    %cst_217 = arith.constant dense<0.000000e+00> : vector<16xf32>
    %499 = vector.multi_reduction <add>, %494, %cst_217 [1] : vector<16x32xf32> to vector<16xf32>
    %500 = vector.shape_cast %499 : vector<16xf32> to vector<16x1xf32>
    %cst_218 = arith.constant 3.200000e+01 : f32
    %501 = vector.broadcast %cst_218 : f32 to vector<16x1xf32>
    %502 = arith.divf %500, %501 : vector<16x1xf32>
    %503 = vector.broadcast %502 : vector<16x1xf32> to vector<16x32xf32>
    %504 = arith.subf %494, %503 : vector<16x32xf32>
    %505 = arith.mulf %504, %504 : vector<16x32xf32>
    %cst_219 = arith.constant dense<0.000000e+00> : vector<16xf32>
    %506 = vector.multi_reduction <add>, %505, %cst_219 [1] : vector<16x32xf32> to vector<16xf32>
    %507 = vector.shape_cast %506 : vector<16xf32> to vector<16x1xf32>
    %cst_220 = arith.constant 3.200000e+01 : f32
    %508 = vector.broadcast %cst_220 : f32 to vector<16x1xf32>
    %509 = arith.divf %507, %508 : vector<16x1xf32>
    %cst_221 = arith.constant 9.99999974E-6 : f32
    %510 = vector.broadcast %cst_221 : f32 to vector<16x1xf32>
    %511 = arith.addf %509, %510 : vector<16x1xf32>
    %512 = math.rsqrt %511 : vector<16x1xf32>
    %513 = vector.broadcast %512 : vector<16x1xf32> to vector<16x32xf32>
    %514 = arith.mulf %504, %513 : vector<16x32xf32>
    %515 = vector.broadcast %496 : vector<1x32xf32> to vector<16x32xf32>
    %516 = arith.mulf %514, %515 : vector<16x32xf32>
    %517 = vector.broadcast %498 : vector<1x32xf32> to vector<16x32xf32>
    %518 = arith.addf %516, %517 : vector<16x32xf32>
    %519 = arith.truncf %518 : vector<16x32xf32> to vector<16x32xbf16>
    %c2_222 = arith.constant 2 : index
    %c0_223 = arith.constant 0 : index
    %c0_224 = arith.constant 0 : index
    %520 = vector.load %arg15[%c2_222, %c0_223, %c0_224] : memref<3x32x64xbf16, #tpu.memory_space<vmem>>, vector<1x32x64xbf16>
    %521 = vector.shape_cast %520 : vector<1x32x64xbf16> to vector<32x64xbf16>
    %cst_225 = arith.constant dense<0.000000e+00> : vector<16x64xf32>
    %522 = tpu.matmul %519, %521, %cst_225 {dimension_numbers = #tpu.dot_dimension_numbers<[1], [0], [0], [1], [0, 0, 1, 1], [], []>} : vector<16x32xbf16>, vector<32x64xbf16>, vector<16x64xf32> -> vector<16x64xf32>
    %c2_226 = arith.constant 2 : index
    %c0_227 = arith.constant 0 : index
    %c0_228 = arith.constant 0 : index
    %523 = vector.load %arg16[%c2_226, %c0_227, %c0_228] : memref<3x1x64xf32, #tpu.memory_space<vmem>>, vector<1x1x64xf32>
    %524 = vector.shape_cast %523 : vector<1x1x64xf32> to vector<1x64xf32>
    %525 = vector.broadcast %524 : vector<1x64xf32> to vector<16x64xf32>
    %526 = arith.addf %522, %525 : vector<16x64xf32>
    %cst_229 = arith.constant 0.000000e+00 : f32
    %527 = vector.broadcast %cst_229 : f32 to vector<16x64xf32>
    %528 = arith.maximumf %526, %527 : vector<16x64xf32>
    %529 = arith.truncf %528 : vector<16x64xf32> to vector<16x64xbf16>
    %c2_230 = arith.constant 2 : index
    %c0_231 = arith.constant 0 : index
    %c0_232 = arith.constant 0 : index
    %530 = vector.load %arg17[%c2_230, %c0_231, %c0_232] : memref<3x64x32xbf16, #tpu.memory_space<vmem>>, vector<1x64x32xbf16>
    %531 = vector.shape_cast %530 : vector<1x64x32xbf16> to vector<64x32xbf16>
    %cst_233 = arith.constant dense<0.000000e+00> : vector<16x32xf32>
    %532 = tpu.matmul %529, %531, %cst_233 {dimension_numbers = #tpu.dot_dimension_numbers<[1], [0], [0], [1], [0, 0, 1, 1], [], []>} : vector<16x64xbf16>, vector<64x32xbf16>, vector<16x32xf32> -> vector<16x32xf32>
    %c2_234 = arith.constant 2 : index
    %c0_235 = arith.constant 0 : index
    %c0_236 = arith.constant 0 : index
    %533 = vector.load %arg18[%c2_234, %c0_235, %c0_236] : memref<3x1x32xf32, #tpu.memory_space<vmem>>, vector<1x1x32xf32>
    %534 = vector.shape_cast %533 : vector<1x1x32xf32> to vector<1x32xf32>
    %535 = vector.broadcast %534 : vector<1x32xf32> to vector<16x32xf32>
    %536 = arith.addf %532, %535 : vector<16x32xf32>
    %537 = arith.addf %518, %536 : vector<16x32xf32>
    %c2_237 = arith.constant 2 : index
    %c0_238 = arith.constant 0 : index
    %c0_239 = arith.constant 0 : index
    %538 = vector.load %arg19[%c2_237, %c0_238, %c0_239] : memref<3x1x32xf32, #tpu.memory_space<vmem>>, vector<1x1x32xf32>
    %539 = vector.shape_cast %538 : vector<1x1x32xf32> to vector<1x32xf32>
    %c2_240 = arith.constant 2 : index
    %c0_241 = arith.constant 0 : index
    %c0_242 = arith.constant 0 : index
    %540 = vector.load %arg20[%c2_240, %c0_241, %c0_242] : memref<3x1x32xf32, #tpu.memory_space<vmem>>, vector<1x1x32xf32>
    %541 = vector.shape_cast %540 : vector<1x1x32xf32> to vector<1x32xf32>
    %cst_243 = arith.constant dense<0.000000e+00> : vector<16xf32>
    %542 = vector.multi_reduction <add>, %537, %cst_243 [1] : vector<16x32xf32> to vector<16xf32>
    %543 = vector.shape_cast %542 : vector<16xf32> to vector<16x1xf32>
    %cst_244 = arith.constant 3.200000e+01 : f32
    %544 = vector.broadcast %cst_244 : f32 to vector<16x1xf32>
    %545 = arith.divf %543, %544 : vector<16x1xf32>
    %546 = vector.broadcast %545 : vector<16x1xf32> to vector<16x32xf32>
    %547 = arith.subf %537, %546 : vector<16x32xf32>
    %548 = arith.mulf %547, %547 : vector<16x32xf32>
    %cst_245 = arith.constant dense<0.000000e+00> : vector<16xf32>
    %549 = vector.multi_reduction <add>, %548, %cst_245 [1] : vector<16x32xf32> to vector<16xf32>
    %550 = vector.shape_cast %549 : vector<16xf32> to vector<16x1xf32>
    %cst_246 = arith.constant 3.200000e+01 : f32
    %551 = vector.broadcast %cst_246 : f32 to vector<16x1xf32>
    %552 = arith.divf %550, %551 : vector<16x1xf32>
    %cst_247 = arith.constant 9.99999974E-6 : f32
    %553 = vector.broadcast %cst_247 : f32 to vector<16x1xf32>
    %554 = arith.addf %552, %553 : vector<16x1xf32>
    %555 = math.rsqrt %554 : vector<16x1xf32>
    %556 = vector.broadcast %555 : vector<16x1xf32> to vector<16x32xf32>
    %557 = arith.mulf %547, %556 : vector<16x32xf32>
    %558 = vector.broadcast %539 : vector<1x32xf32> to vector<16x32xf32>
    %559 = arith.mulf %557, %558 : vector<16x32xf32>
    %560 = vector.broadcast %541 : vector<1x32xf32> to vector<16x32xf32>
    %561 = arith.addf %559, %560 : vector<16x32xf32>
    %c0_248 = arith.constant 0 : index
    %c0_249 = arith.constant 0 : index
    %562 = vector.load %arg21[%c0_248, %c0_249] : memref<16x32xf32, #tpu.memory_space<vmem>>, vector<16x32xf32>
    %563 = arith.mulf %191, %562 : vector<16x32xf32>
    %c0_250 = arith.constant 0 : index
    %c0_251 = arith.constant 0 : index
    %c0_252 = arith.constant 0 : index
    %564 = vector.load %arg22[%c0_250, %c0_251, %c0_252] : memref<4x16x32xf32, #tpu.memory_space<vmem>>, vector<1x16x32xf32>
    %565 = vector.shape_cast %564 : vector<1x16x32xf32> to vector<16x32xf32>
    %c4_i32 = arith.constant 4 : i32
    %566 = tpu.dynamic_rotate %191 by %c4_i32 dim 0 : vector<16x32xf32>, i32 -> vector<16x32xf32>
    %567 = arith.mulf %565, %566 : vector<16x32xf32>
    %568 = arith.addf %563, %567 : vector<16x32xf32>
    %c1_253 = arith.constant 1 : index
    %c0_254 = arith.constant 0 : index
    %c0_255 = arith.constant 0 : index
    %569 = vector.load %arg22[%c1_253, %c0_254, %c0_255] : memref<4x16x32xf32, #tpu.memory_space<vmem>>, vector<1x16x32xf32>
    %570 = vector.shape_cast %569 : vector<1x16x32xf32> to vector<16x32xf32>
    %c12_i32 = arith.constant 12 : i32
    %571 = tpu.dynamic_rotate %191 by %c12_i32 dim 0 : vector<16x32xf32>, i32 -> vector<16x32xf32>
    %572 = arith.mulf %570, %571 : vector<16x32xf32>
    %573 = arith.addf %568, %572 : vector<16x32xf32>
    %c2_256 = arith.constant 2 : index
    %c0_257 = arith.constant 0 : index
    %c0_258 = arith.constant 0 : index
    %574 = vector.load %arg22[%c2_256, %c0_257, %c0_258] : memref<4x16x32xf32, #tpu.memory_space<vmem>>, vector<1x16x32xf32>
    %575 = vector.shape_cast %574 : vector<1x16x32xf32> to vector<16x32xf32>
    %c1_i32 = arith.constant 1 : i32
    %576 = tpu.dynamic_rotate %191 by %c1_i32 dim 0 : vector<16x32xf32>, i32 -> vector<16x32xf32>
    %577 = arith.mulf %575, %576 : vector<16x32xf32>
    %578 = arith.addf %573, %577 : vector<16x32xf32>
    %c3 = arith.constant 3 : index
    %c0_259 = arith.constant 0 : index
    %c0_260 = arith.constant 0 : index
    %579 = vector.load %arg22[%c3, %c0_259, %c0_260] : memref<4x16x32xf32, #tpu.memory_space<vmem>>, vector<1x16x32xf32>
    %580 = vector.shape_cast %579 : vector<1x16x32xf32> to vector<16x32xf32>
    %c15_i32 = arith.constant 15 : i32
    %581 = tpu.dynamic_rotate %191 by %c15_i32 dim 0 : vector<16x32xf32>, i32 -> vector<16x32xf32>
    %582 = arith.mulf %580, %581 : vector<16x32xf32>
    %583 = arith.addf %578, %582 : vector<16x32xf32>
    %c0_261 = arith.constant 0 : index
    %c0_262 = arith.constant 0 : index
    %584 = vector.load %arg23[%c0_261, %c0_262] : memref<16x32xf32, #tpu.memory_space<vmem>>, vector<16x32xf32>
    %585 = arith.mulf %376, %584 : vector<16x32xf32>
    %c0_263 = arith.constant 0 : index
    %c0_264 = arith.constant 0 : index
    %c0_265 = arith.constant 0 : index
    %586 = vector.load %arg24[%c0_263, %c0_264, %c0_265] : memref<4x16x32xf32, #tpu.memory_space<vmem>>, vector<1x16x32xf32>
    %587 = vector.shape_cast %586 : vector<1x16x32xf32> to vector<16x32xf32>
    %c1_i32_266 = arith.constant 1 : i32
    %588 = tpu.dynamic_rotate %376 by %c1_i32_266 dim 0 : vector<16x32xf32>, i32 -> vector<16x32xf32>
    %589 = arith.mulf %587, %588 : vector<16x32xf32>
    %590 = arith.addf %585, %589 : vector<16x32xf32>
    %c1_267 = arith.constant 1 : index
    %c0_268 = arith.constant 0 : index
    %c0_269 = arith.constant 0 : index
    %591 = vector.load %arg24[%c1_267, %c0_268, %c0_269] : memref<4x16x32xf32, #tpu.memory_space<vmem>>, vector<1x16x32xf32>
    %592 = vector.shape_cast %591 : vector<1x16x32xf32> to vector<16x32xf32>
    %c15_i32_270 = arith.constant 15 : i32
    %593 = tpu.dynamic_rotate %376 by %c15_i32_270 dim 0 : vector<16x32xf32>, i32 -> vector<16x32xf32>
    %594 = arith.mulf %592, %593 : vector<16x32xf32>
    %595 = arith.addf %590, %594 : vector<16x32xf32>
    %c2_271 = arith.constant 2 : index
    %c0_272 = arith.constant 0 : index
    %c0_273 = arith.constant 0 : index
    %596 = vector.load %arg24[%c2_271, %c0_272, %c0_273] : memref<4x16x32xf32, #tpu.memory_space<vmem>>, vector<1x16x32xf32>
    %597 = vector.shape_cast %596 : vector<1x16x32xf32> to vector<16x32xf32>
    %c4_i32_274 = arith.constant 4 : i32
    %598 = tpu.dynamic_rotate %376 by %c4_i32_274 dim 0 : vector<16x32xf32>, i32 -> vector<16x32xf32>
    %599 = arith.mulf %597, %598 : vector<16x32xf32>
    %600 = arith.addf %595, %599 : vector<16x32xf32>
    %c3_275 = arith.constant 3 : index
    %c0_276 = arith.constant 0 : index
    %c0_277 = arith.constant 0 : index
    %601 = vector.load %arg24[%c3_275, %c0_276, %c0_277] : memref<4x16x32xf32, #tpu.memory_space<vmem>>, vector<1x16x32xf32>
    %602 = vector.shape_cast %601 : vector<1x16x32xf32> to vector<16x32xf32>
    %c12_i32_278 = arith.constant 12 : i32
    %603 = tpu.dynamic_rotate %376 by %c12_i32_278 dim 0 : vector<16x32xf32>, i32 -> vector<16x32xf32>
    %604 = arith.mulf %602, %603 : vector<16x32xf32>
    %605 = arith.addf %600, %604 : vector<16x32xf32>
    %606 = tpu.concatenate %583, %605, %561 in 1 : vector<16x32xf32>, vector<16x32xf32>, vector<16x32xf32> -> vector<16x96xf32>
    %607 = arith.truncf %606 : vector<16x96xf32> to vector<16x96xbf16>
    %c0_279 = arith.constant 0 : index
    %c0_280 = arith.constant 0 : index
    %608 = vector.load %arg25[%c0_279, %c0_280] : memref<96x96xbf16, #tpu.memory_space<vmem>>, vector<96x96xbf16>
    %cst_281 = arith.constant dense<0.000000e+00> : vector<16x96xf32>
    %609 = tpu.matmul %607, %608, %cst_281 {dimension_numbers = #tpu.dot_dimension_numbers<[1], [0], [0], [1], [0, 0, 1, 1], [], []>} : vector<16x96xbf16>, vector<96x96xbf16>, vector<16x96xf32> -> vector<16x96xf32>
    %c0_282 = arith.constant 0 : index
    %c0_283 = arith.constant 0 : index
    %610 = vector.load %arg26[%c0_282, %c0_283] : memref<1x96xf32, #tpu.memory_space<vmem>>, vector<1x96xf32>
    %611 = vector.broadcast %610 : vector<1x96xf32> to vector<16x96xf32>
    %612 = arith.addf %609, %611 : vector<16x96xf32>
    %cst_284 = arith.constant 0.000000e+00 : f32
    %613 = vector.broadcast %cst_284 : f32 to vector<16x96xf32>
    %614 = arith.maximumf %612, %613 : vector<16x96xf32>
    %615 = arith.truncf %614 : vector<16x96xf32> to vector<16x96xbf16>
    %c0_285 = arith.constant 0 : index
    %c0_286 = arith.constant 0 : index
    %616 = vector.load %arg27[%c0_285, %c0_286] : memref<96x32xbf16, #tpu.memory_space<vmem>>, vector<96x32xbf16>
    %cst_287 = arith.constant dense<0.000000e+00> : vector<16x32xf32>
    %617 = tpu.matmul %615, %616, %cst_287 {dimension_numbers = #tpu.dot_dimension_numbers<[1], [0], [0], [1], [0, 0, 1, 1], [], []>} : vector<16x96xbf16>, vector<96x32xbf16>, vector<16x32xf32> -> vector<16x32xf32>
    %c0_288 = arith.constant 0 : index
    %c0_289 = arith.constant 0 : index
    %618 = vector.load %arg28[%c0_288, %c0_289] : memref<1x32xf32, #tpu.memory_space<vmem>>, vector<1x32xf32>
    %619 = vector.broadcast %618 : vector<1x32xf32> to vector<16x32xf32>
    %620 = arith.addf %617, %619 : vector<16x32xf32>
    %cst_290 = arith.constant 2.000000e-01 : f32
    %621 = vector.broadcast %cst_290 : f32 to vector<16x32xf32>
    %622 = arith.mulf %621, %620 : vector<16x32xf32>
    %623 = arith.addf %561, %622 : vector<16x32xf32>
    %c0_291 = arith.constant 0 : index
    %c0_292 = arith.constant 0 : index
    %c0_293 = arith.constant 0 : index
    %624 = vector.load %arg29[%c0_291, %c0_292, %c0_293] : memref<1x16x32xf32, #tpu.memory_space<vmem>>, vector<1x16x32xf32>
    %625 = vector.shape_cast %624 : vector<1x16x32xf32> to vector<16x32xf32>
    %626 = vector.shape_cast %623 : vector<16x32xf32> to vector<1x16x32xf32>
    tpu.vector_store %arg29[%c0_291, %c0_292, %c0_293], %626 {strides = array<i32>} : memref<1x16x32xf32, #tpu.memory_space<vmem>>, vector<1x16x32xf32>,
    return
  }
  func.func @transform_0(%arg0: i32) -> (i32, i32, i32) {
    %c0_i32 = arith.constant 0 : i32
    %c0_i32_0 = arith.constant 0 : i32
    %c0_i32_1 = arith.constant 0 : i32
    return %arg0, %c0_i32, %c0_i32_0 : i32, i32, i32
  }
  func.func @transform_1(%arg0: i32) -> (i32, i32, i32) {
    %c0_i32 = arith.constant 0 : i32
    %c0_i32_0 = arith.constant 0 : i32
    %c0_i32_1 = arith.constant 0 : i32
    return %arg0, %c0_i32, %c0_i32_0 : i32, i32, i32
  }
  func.func @transform_2(%arg0: i32) -> (i32, i32, i32) {
    %c0_i32 = arith.constant 0 : i32
    %c0_i32_0 = arith.constant 0 : i32
    %c0_i32_1 = arith.constant 0 : i32
    %c0_i32_2 = arith.constant 0 : i32
    return %c0_i32, %c0_i32_0, %c0_i32_1 : i32, i32, i32
  }
  func.func @transform_3(%arg0: i32) -> (i32, i32, i32) {
    %c0_i32 = arith.constant 0 : i32
    %c0_i32_0 = arith.constant 0 : i32
    %c0_i32_1 = arith.constant 0 : i32
    %c0_i32_2 = arith.constant 0 : i32
    return %c0_i32, %c0_i32_0, %c0_i32_1 : i32, i32, i32
  }
  func.func @transform_4(%arg0: i32) -> (i32, i32, i32) {
    %c0_i32 = arith.constant 0 : i32
    %c0_i32_0 = arith.constant 0 : i32
    %c0_i32_1 = arith.constant 0 : i32
    %c0_i32_2 = arith.constant 0 : i32
    return %c0_i32, %c0_i32_0, %c0_i32_1 : i32, i32, i32
  }
  func.func @transform_5(%arg0: i32) -> (i32, i32, i32, i32) {
    %c0_i32 = arith.constant 0 : i32
    %c0_i32_0 = arith.constant 0 : i32
    %c0_i32_1 = arith.constant 0 : i32
    %c0_i32_2 = arith.constant 0 : i32
    %c0_i32_3 = arith.constant 0 : i32
    return %c0_i32, %c0_i32_0, %c0_i32_1, %c0_i32_2 : i32, i32, i32, i32
  }
  func.func @transform_6(%arg0: i32) -> (i32, i32, i32) {
    %c0_i32 = arith.constant 0 : i32
    %c0_i32_0 = arith.constant 0 : i32
    %c0_i32_1 = arith.constant 0 : i32
    %c0_i32_2 = arith.constant 0 : i32
    return %c0_i32, %c0_i32_0, %c0_i32_1 : i32, i32, i32
  }
  func.func @transform_7(%arg0: i32) -> (i32, i32, i32) {
    %c0_i32 = arith.constant 0 : i32
    %c0_i32_0 = arith.constant 0 : i32
    %c0_i32_1 = arith.constant 0 : i32
    %c0_i32_2 = arith.constant 0 : i32
    return %c0_i32, %c0_i32_0, %c0_i32_1 : i32, i32, i32
  }
  func.func @transform_8(%arg0: i32) -> (i32, i32, i32) {
    %c0_i32 = arith.constant 0 : i32
    %c0_i32_0 = arith.constant 0 : i32
    %c0_i32_1 = arith.constant 0 : i32
    %c0_i32_2 = arith.constant 0 : i32
    return %c0_i32, %c0_i32_0, %c0_i32_1 : i32, i32, i32
  }
  func.func @transform_9(%arg0: i32) -> (i32, i32) {
    %c0_i32 = arith.constant 0 : i32
    %c0_i32_0 = arith.constant 0 : i32
    %c0_i32_1 = arith.constant 0 : i32
    return %c0_i32, %c0_i32_0 : i32, i32
  }
  func.func @transform_10(%arg0: i32) -> (i32, i32, i32) {
    %c0_i32 = arith.constant 0 : i32
    %c0_i32_0 = arith.constant 0 : i32
    %c0_i32_1 = arith.constant 0 : i32
    %c0_i32_2 = arith.constant 0 : i32
    return %c0_i32, %c0_i32_0, %c0_i32_1 : i32, i32, i32
  }
  func.func @transform_11(%arg0: i32) -> (i32, i32, i32) {
    %c0_i32 = arith.constant 0 : i32
    %c0_i32_0 = arith.constant 0 : i32
    %c0_i32_1 = arith.constant 0 : i32
    %c0_i32_2 = arith.constant 0 : i32
    return %c0_i32, %c0_i32_0, %c0_i32_1 : i32, i32, i32
  }
  func.func @transform_12(%arg0: i32) -> (i32, i32, i32) {
    %c0_i32 = arith.constant 0 : i32
    %c0_i32_0 = arith.constant 0 : i32
    %c0_i32_1 = arith.constant 0 : i32
    %c0_i32_2 = arith.constant 0 : i32
    return %c0_i32, %c0_i32_0, %c0_i32_1 : i32, i32, i32
  }
  func.func @transform_13(%arg0: i32) -> (i32, i32, i32) {
    %c0_i32 = arith.constant 0 : i32
    %c0_i32_0 = arith.constant 0 : i32
    %c0_i32_1 = arith.constant 0 : i32
    %c0_i32_2 = arith.constant 0 : i32
    return %c0_i32, %c0_i32_0, %c0_i32_1 : i32, i32, i32
  }
  func.func @transform_14(%arg0: i32) -> (i32, i32, i32) {
    %c0_i32 = arith.constant 0 : i32
    %c0_i32_0 = arith.constant 0 : i32
    %c0_i32_1 = arith.constant 0 : i32
    %c0_i32_2 = arith.constant 0 : i32
    return %c0_i32, %c0_i32_0, %c0_i32_1 : i32, i32, i32
  }
  func.func @transform_15(%arg0: i32) -> (i32, i32, i32) {
    %c0_i32 = arith.constant 0 : i32
    %c0_i32_0 = arith.constant 0 : i32
    %c0_i32_1 = arith.constant 0 : i32
    %c0_i32_2 = arith.constant 0 : i32
    return %c0_i32, %c0_i32_0, %c0_i32_1 : i32, i32, i32
  }
  func.func @transform_16(%arg0: i32) -> (i32, i32, i32) {
    %c0_i32 = arith.constant 0 : i32
    %c0_i32_0 = arith.constant 0 : i32
    %c0_i32_1 = arith.constant 0 : i32
    %c0_i32_2 = arith.constant 0 : i32
    return %c0_i32, %c0_i32_0, %c0_i32_1 : i32, i32, i32
  }
  func.func @transform_17(%arg0: i32) -> (i32, i32, i32) {
    %c0_i32 = arith.constant 0 : i32
    %c0_i32_0 = arith.constant 0 : i32
    %c0_i32_1 = arith.constant 0 : i32
    %c0_i32_2 = arith.constant 0 : i32
    return %c0_i32, %c0_i32_0, %c0_i32_1 : i32, i32, i32
  }
  func.func @transform_18(%arg0: i32) -> (i32, i32, i32) {
    %c0_i32 = arith.constant 0 : i32
    %c0_i32_0 = arith.constant 0 : i32
    %c0_i32_1 = arith.constant 0 : i32
    %c0_i32_2 = arith.constant 0 : i32
    return %c0_i32, %c0_i32_0, %c0_i32_1 : i32, i32, i32
  }
  func.func @transform_19(%arg0: i32) -> (i32, i32, i32) {
    %c0_i32 = arith.constant 0 : i32
    %c0_i32_0 = arith.constant 0 : i32
    %c0_i32_1 = arith.constant 0 : i32
    %c0_i32_2 = arith.constant 0 : i32
    return %c0_i32, %c0_i32_0, %c0_i32_1 : i32, i32, i32
  }
  func.func @transform_20(%arg0: i32) -> (i32, i32) {
    %c0_i32 = arith.constant 0 : i32
    %c0_i32_0 = arith.constant 0 : i32
    %c0_i32_1 = arith.constant 0 : i32
    return %c0_i32, %c0_i32_0 : i32, i32
  }
  func.func @transform_21(%arg0: i32) -> (i32, i32, i32) {
    %c0_i32 = arith.constant 0 : i32
    %c0_i32_0 = arith.constant 0 : i32
    %c0_i32_1 = arith.constant 0 : i32
    %c0_i32_2 = arith.constant 0 : i32
    return %c0_i32, %c0_i32_0, %c0_i32_1 : i32, i32, i32
  }
  func.func @transform_22(%arg0: i32) -> (i32, i32) {
    %c0_i32 = arith.constant 0 : i32
    %c0_i32_0 = arith.constant 0 : i32
    %c0_i32_1 = arith.constant 0 : i32
    return %c0_i32, %c0_i32_0 : i32, i32
  }
  func.func @transform_23(%arg0: i32) -> (i32, i32, i32) {
    %c0_i32 = arith.constant 0 : i32
    %c0_i32_0 = arith.constant 0 : i32
    %c0_i32_1 = arith.constant 0 : i32
    %c0_i32_2 = arith.constant 0 : i32
    return %c0_i32, %c0_i32_0, %c0_i32_1 : i32, i32, i32
  }
  func.func @transform_24(%arg0: i32) -> (i32, i32) {
    %c0_i32 = arith.constant 0 : i32
    %c0_i32_0 = arith.constant 0 : i32
    %c0_i32_1 = arith.constant 0 : i32
    return %c0_i32, %c0_i32_0 : i32, i32
  }
  func.func @transform_25(%arg0: i32) -> (i32, i32) {
    %c0_i32 = arith.constant 0 : i32
    %c0_i32_0 = arith.constant 0 : i32
    %c0_i32_1 = arith.constant 0 : i32
    return %c0_i32, %c0_i32_0 : i32, i32
  }
  func.func @transform_26(%arg0: i32) -> (i32, i32) {
    %c0_i32 = arith.constant 0 : i32
    %c0_i32_0 = arith.constant 0 : i32
    %c0_i32_1 = arith.constant 0 : i32
    return %c0_i32, %c0_i32_0 : i32, i32
  }
  func.func @transform_27(%arg0: i32) -> (i32, i32) {
    %c0_i32 = arith.constant 0 : i32
    %c0_i32_0 = arith.constant 0 : i32
    %c0_i32_1 = arith.constant 0 : i32
    return %c0_i32, %c0_i32_0 : i32, i32
  }
  func.func @transform_28(%arg0: i32) -> (i32, i32, i32) {
    %c0_i32 = arith.constant 0 : i32
    %c0_i32_0 = arith.constant 0 : i32
    %c0_i32_1 = arith.constant 0 : i32
    return %arg0, %c0_i32, %c0_i32_0 : i32, i32, i32
  }
}

</mosaic_0001>

<bundles_post_ra>
// kernel: multi_level_encoder.2
= control target key start
LH: loop header
LB: loop body
LE: loop exit
PB: predicated region body
PF: predicated region fallthrough
CT: control target
= control target key end

     0   :  { %v116_v3 = vmov 0   ;;  %vm47_vm0 = vcmask 523264   ;;  %s194_s1 = inlined_call_operand.vmem [shape: f32[64,256], index: 1, kind: input, shape index: {}]   ;;  %s195_s2 = inlined_call_operand.vmem [shape: f32[4,1], index: 2, kind: input, shape index: {}]   ;;  %s196_s0 = inlined_call_operand.vmem [shape: f32[4,64], index: 0, kind: input, shape index: {}]   ;;  %s197_s3 = inlined_call_operand.vmem [shape: f32[4,256], index: 3, kind: output, shape index: {}]  }
   0x1   :  { %v30_v0 = vld [vmem:[%s194_s1 + $0x68] sm:$0xff]  ;;  %v32_v1 = vld [vmem:[%s194_s1 + $0x78] sm:$0xff]  ;;  %v29_v2 = vld [vmem:[%s194_s1 + $0x60] sm:$0xff]  ;;  %83 = vmatprep.mubr.bf16.mxu0 %v116_v3  ;;  %111 = vset.pattern.permute.xlu0 %v116_v3 }
   0x2   :  { %v40_v4 = vpack.c.bf16 %v32_v1, %v30_v0  ;;  %v31_v5 = vld [vmem:[%s194_s1 + $0x70] sm:$0xff]  ;;  %v26_v6 = vld [vmem:[%s194_s1 + $0x48] sm:$0xff]  ;;  %v28_v7 = vld [vmem:[%s194_s1 + $0x58] sm:$0xff] }
   0x3   :  { %v39_v8 = vpack.c.bf16 %v31_v5, %v29_v2  ;;  %v38_v9 = vpack.c.bf16 %v28_v7, %v26_v6  ;;  %v25_v10 = vld [vmem:[%s194_s1 + $0x40] sm:$0xff]  ;;  %v27_v11 = vld [vmem:[%s194_s1 + $0x50] sm:$0xff]  ;;  %v22_v12 = vld [vmem:[%s194_s1 + $0x28] sm:$0xff] }
   0x4   :  { %59 = vmatprep.subr.bf16.mxu0 %v40_v4  ;;  %v24_v13 = vld [vmem:[%s194_s1 + $0x38] sm:$0xff]  ;;  %v37_v14 = vpack.c.bf16 %v27_v11, %v25_v10  ;;  %v21_v16 = vld [vmem:[%s194_s1 + $0x20] sm:$0xff]  ;;  %v23_v17 = vld [vmem:[%s194_s1 + $0x30] sm:$0xff] }
   0x5   :  { %60 = vmatpush1.bf16.msra.mxu0 %v39_v8  ;;  %v36_v15 = vpack.c.bf16 %v24_v13, %v22_v12  ;;  %v41_v18 = vld [vmem:[%s195_s2] sm:$0xf]  ;;  %v18_v19 = vld [vmem:[%s194_s1 + $0x8] sm:$0xff]  ;;  %v20_v20 = vld [vmem:[%s194_s1 + $0x18] sm:$0xff]  ;;  %v35_v21 = vpack.c.bf16 %v23_v17, %v21_v16 }
   0x6   :  { %61 = vmatprep.subr.bf16.mxu0 %v38_v9  ;;  %44 = vperm.xlu0 %111, %v41_v18   ;;  %v34_v22 = vpack.c.bf16 %v20_v20, %v18_v19  ;;  %v17_v23 = vld [vmem:[%s194_s1] sm:$0xff]  ;;  %v19_v24 = vld [vmem:[%s194_s1 + $0x10] sm:$0xff] }
   0x7   :  { %v33_v25 = vpack.c.bf16 %v19_v24, %v17_v23  ;;  %v15_v26 = vld [vmem:[%s196_s0] sm:$0xf] }
   0x8   :  { %v16_v27 = vpack.c.bf16 %v15_v26, %v15_v26 }
   0x9   :  { %62 = vmatpush1.bf16.msra.mxu0 %v37_v14 }
   0xa   :  { %63 = vmatprep.subr.bf16.mxu0 %v36_v15 }
   0xd   :  { %64 = vmatpush1.bf16.msra.mxu0 %v35_v21 }
   0xe   :  { %65 = vmatprep.subr.bf16.mxu0 %v34_v22 }
  0x11   :  { %66 = vmatpush1.bf16.msra.mxu0 %v33_v25 }
  0x14   :  { %109 = vmatmul.mubr.msk.bf16.vlgmr.msra.gmra.mxu0 %vm47_vm0, %v16_v27 }
  0x81   :  { %v45_v28 = vpop.permute.xlu0 %44 }
  0xd4   :  { %v85_v29 = vpop.f32.mrf.mxu0 }
  0xd5   :  { %v86_v30 = vadd.f32 %v85_v29, %v45_v28 }
  0xd6   :  { %v87_v31 = vpop.f32.mrf.mxu0 }
  0xd7   :  { %v92_v32 = vmax.f32 %v86_v30, 0.0  ;;  %v88_v33 = vadd.f32 %v87_v31, %v45_v28 }
  0xd8   :  { %v89_v34 = vpop.f32.mrf.mxu0 }
  0xd9   :  { %v94_v35 = vmax.f32 %v92_v32, 1e-06  ;;  %v93_v36 = vmax.f32 %v88_v33, 0.0 }
  0xda   :  { %v90_v37 = vpop.f32.mrf.mxu0 }
  0xdb   :  { %112 = vlog2.f32 %v94_v35  ;;  %v95_v38 = vmax.f32 %v93_v36, 1e-06 }
  0xdd   :  { %114 = vlog2.f32 %v95_v38 }
  0xe8   :  { %v113_v39 = vpop.eup %112 }
  0xe9   :  { %v97_v41 = vmul.f32 0.6931472, %v113_v39 }
  0xea   :  { %v115_v40 = vpop.eup %114 }
  0xeb   :  { %v99_v42 = vmul.f32 0.6931472, %v115_v40 }
  0xed   :  { %v102_v43 = vcombine.low %v97_v41, %v99_v42 }
  0xef   :  { %104 = vst [vmem:[%s197_s3] sm:$0xff] %v102_v43 }

// kernel: multi_level_encoder.3
= control target key start
LH: loop header
LB: loop body
LE: loop exit
PB: predicated region body
PF: predicated region fallthrough
CT: control target
= control target key end

     0   :  { %s7716_s0 = inlined_call_operand.vmem [shape: f32[2,16,32], index: 0, kind: input, shape index: {}]   ;;  %s7717_s1 = inlined_call_operand.vmem [shape: f32[2,1,16], index: 1, kind: input, shape index: {}]   ;;  %s7718_s2 = inlined_call_operand.vmem [shape: f32[4,16,16], index: 2, kind: input, shape index: {}]   ;;  %s7719_s3 = inlined_call_operand.vmem [shape: bf16[3,32,96], index: 3, kind: input, shape index: {}]   ;;  %s7720_s4 = inlined_call_operand.vmem [shape: f32[3,1,96], index: 4, kind: input, shape index: {}]   ;;  %s7721_s5 = inlined_call_operand.vmem [shape: bf16[3,4,8,32], index: 5, kind: input, shape index: {}]   ;;  %s7722_s6 = inlined_call_operand.vmem [shape: f32[3,1,32], index: 6, kind: input, shape index: {}]   ;;  %s7723_s7 = inlined_call_operand.vmem [shape: f32[3,1,32], index: 7, kind: input, shape index: {}]   ;;  %s7724_s8 = inlined_call_operand.vmem [shape: f32[3,1,32], index: 8, kind: input, shape index: {}]   ;;  %s7725_s9 = inlined_call_operand.vmem [shape: bf16[16,144], index: 9, kind: input, shape index: {}]   ;;  %s7726_s10 = inlined_call_operand.vmem [shape: f32[3,9,32], index: 10, kind: input, shape index: {}]   ;;  %s7727_s11 = inlined_call_operand.vmem [shape: f32[3,1,32], index: 11, kind: input, shape index: {}]   ;;  %s7728_s12 = inlined_call_operand.vmem [shape: f32[3,1,32], index: 12, kind: input, shape index: {}]   ;;  %s7729_s13 = inlined_call_operand.vmem [shape: f32[3,1,32], index: 13, kind: input, shape index: {}]   ;;  %s7730_s14 = inlined_call_operand.vmem [shape: bf16[3,32,64], index: 14, kind: input, shape index: {}]   ;;  %s7731_s15 = inlined_call_operand.vmem [shape: f32[3,1,64], index: 15, kind: input, shape index: {}]   ;;  %s7732_s16 = inlined_call_operand.vmem [shape: bf16[3,64,32], index: 16, kind: input, shape index: {}]   ;;  %s7733_s17 = inlined_call_operand.vmem [shape: f32[3,1,32], index: 17, kind: input, shape index: {}]   ;;  %s7734_s18 = inlined_call_operand.vmem [shape: f32[3,1,32], index: 18, kind: input, shape index: {}]   ;;  %s7735_s19 = inlined_call_operand.vmem [shape: f32[3,1,32], index: 19, kind: input, shape index: {}]   ;;  %s7736_s20 = inlined_call_operand.vmem [shape: f32[16,32], index: 20, kind: input, shape index: {}]   ;;  %s7737_s21 = inlined_call_operand.vmem [shape: f32[4,16,32], index: 21, kind: input, shape index: {}]   ;;  %s7738_s22 = inlined_call_operand.vmem [shape: f32[16,32], index: 22, kind: input, shape index: {}]   ;;  %s7739_s23 = inlined_call_operand.vmem [shape: f32[4,16,32], index: 23, kind: input, shape index: {}]   ;;  %s7740_s24 = inlined_call_operand.vmem [shape: bf16[96,96], index: 24, kind: input, shape index: {}]   ;;  %s7741_s25 = inlined_call_operand.vmem [shape: f32[1,96], index: 25, kind: input, shape index: {}]   ;;  %s7742_s26 = inlined_call_operand.vmem [shape: bf16[96,32], index: 26, kind: input, shape index: {}]   ;;  %s7743_s27 = inlined_call_operand.vmem [shape: f32[1,32], index: 27, kind: input, shape index: {}]   ;;  %s7744_s28 = inlined_call_operand.hbm [shape: f32[2,16,32], index: 28, kind: output, shape index: {}]  }
   0x1   :  { %7790 = sst [smem:[#allocation14_spill]] %s7716_s0 }
   0x2   :  { %7791 = sst [smem:[#allocation15_spill]] %s7717_s1 }
   0x3   :  { %7792 = sst [smem:[#allocation16_spill]] %s7718_s2 }
   0x4   :  { %7793 = sst [smem:[#allocation17_spill]] %s7719_s3 }
   0x5   :  { %7794 = sst [smem:[#allocation18_spill]] %s7720_s4 }
   0x6   :  { %7795 = sst [smem:[#allocation19_spill]] %s7721_s5 }
   0x7   :  { %7796 = sst [smem:[#allocation20_spill]] %s7722_s6 }
   0x8   :  { %7797 = sst [smem:[#allocation21_spill]] %s7723_s7 }
   0x9   :  { %7798 = sst [smem:[#allocation22_spill]] %s7724_s8 }
   0xa   :  { %7799 = sst [smem:[#allocation23_spill]] %s7725_s9 }
   0xb   :  { %7800 = sst [smem:[#allocation24_spill]] %s7726_s10 }
   0xc   :  { %7801 = sst [smem:[#allocation25_spill]] %s7727_s11 }
   0xd   :  { %7802 = sst [smem:[#allocation26_spill]] %s7728_s12 }
   0xe   :  { %7803 = sst [smem:[#allocation27_spill]] %s7736_s20 }
   0xf   :  { %7804 = sst [smem:[#allocation28_spill]] %s7737_s21 }
  0x10   :  { %7805 = sst [smem:[#allocation29_spill]] %s7738_s22 }
  0x11   :  { %7806 = sst [smem:[#allocation30_spill]] %s7740_s24 }
  0x12   :  { %7807 = sst [smem:[#allocation31_spill]] %s7741_s25 }
  0x13   :  { %7808 = sst [smem:[#allocation32_spill]] %s7742_s26 }
  0x14   :  { %7809 = sst [smem:[#allocation33_spill]] %s7743_s27 }
  0x15   :  { %7810 = sst [smem:[#allocation34_spill]] %s7744_s28 }
  0x16   :  { %33 = vsyncpa [#allocation3], 0 }
  0x17   :  { %35 = vsyncpa [#allocation3 + $0x1], 0  ;;  %s6470_s8 = smov 0   ;;  %s6472_s5 = smov 0  }
  0x18   :  { %s6474_s9 = smov 0   ;;  %s6476_s30 = smov 0  }
  0x19 LB: > { %7811 = sst [smem:[#allocation5_spill]] %s6298_s8  ;;  %s6491_s3 = sadd.s32 4294967295, %s6310_s30   ;;  %s6310_s30 = sphi %s6476_s30, %s7862_s30   ;;  %s6306_s9 = sphi %s6474_s9, %s7865_s9   ;;  %s6302_s5 = sphi %s6472_s5, %s7864_s5   ;;  %s6298_s8 = sphi %s6470_s8, %s7863_s8  }
  0x1a   : > { %7812 = sst [smem:[#allocation6_spill]] %s6302_s5  ;;  %s5270_s6 = sadd.s32 4294967294, %s6310_s30  }
  0x1b   : > { %7813 = sst [smem:[#allocation7_spill]] %s6306_s9  ;;  %s6495_s10 = sadd.s32 1, %s6310_s30  }
  0x1c   : > { %7814 = sst [smem:[#allocation8_spill]] %s6310_s30  ;;  %s646_s0 = sadd.s32 1, %s6306_s9 }
  0x1d   : > { %7815 = sst [smem:[#allocation9_spill]] %s6491_s3  ;;  %s643_s11 = ssub.s32 %s6310_s30, %s6495_s10 }
  0x1e   : > { %7816 = sst [smem:[#allocation10_spill]] %s6495_s10  ;;  %p656_p0 = scmp.ne.s32.totalorder %s6306_s9, %s6302_s5 }
  0x1f   : > { %p644_p1 = scmp.eq.s32.totalorder %s643_s11, 0  ;;  %p657_p2 = scmp.eq.s32.totalorder %s6491_s3, 1 }
  0x20   : > { %p662_p3 = scmp.ne.s32.totalorder %s6302_s5, %s6298_s8  ;;  %p663_p4 = scmp.eq.s32.totalorder %s5270_s6, 1 }
  0x21   : > { %s6506_s29 = scalar_select %p644_p1, %s6306_s9, %s646_s0  }
  0x22   : > { %p6508_p5 = por %p657_p2, %p656_p0  ;;  %p6512_p6 = por %p663_p4, %p662_p3 }
  0x23   : > { %7817 = sst [smem:[#allocation11_spill]] %s6506_s29  ;;  %p5273_p7 = scmp.ge.s32.totalorder %s6310_s30, 1 }
  0x24   : > { %s7818_s2 = scalar_select %p6508_p5, 1, 0 }
  0x25   : > { %s7820_s7 = scalar_select %p6512_p6, 1, 0 }
  0x26   : > { %7819 = sst [smem:[#allocation12_spill]] %s7818_s2  ;;  %p773_p8 = scmp.lt.s32.totalorder %s6310_s30, 3 }
  0x27   : > { %7821 = sst [smem:[#allocation13_spill]] %s7820_s7 }
  0x28   : > { %p774_p9 = pnand %p5273_p7, %p773_p8 }
  0x29   : > { %s7822_s4 = sld [smem:[#allocation17_spill]] (!%p774_p9)  ;;  %p850_p10 = scmp.lt.s32.totalorder (!%p774_p9), %s6491_s3, 1 }
  0x2a   : > { %777 = sbr.rel (%p774_p9) target bundleno = 9511 (0x2527), region = 132  ;;  %s7823_s9 = sld [smem:[#allocation14_spill]] (!%p774_p9) }
  0x2b   : > { %s7824_s29 = sld [smem:[#allocation18_spill]] (!%p774_p9)  ;;  %s7765_s1 = smov (!%p774_p9), 112  }
  0x2c   : > { %s7826_s7 = sld [smem:[#allocation16_spill]] (!%p774_p9)  ;;  %s7768_s10 = smov (!%p774_p9), 64  }
  0x2d   : > { %s7830_s8 = sld [smem:[#allocation24_spill]] (!%p774_p9)  ;;  %s7843_s0 = smov (!%p774_p9), 64  }
  0x2e   : > { %s7833_s30 = sld [smem:[#allocation22_spill]] (!%p774_p9)  ;;  %s6321_s21 = smov (!%p774_p9), 32  }
  0x2f   : > { %v6045_v0 = vld [vmem:[%s7822_s4 + $0x8] sm:$0xff]   ;;  %v6312_v1 = vmov 0.0   ;;  %v6046_v2 = vld [vmem:[%s7822_s4] sm:$0xff]   ;;  %vm6313_vm0 = vmmov 0   ;;  %s6533_s11 = scalar_select %p850_p10, %s6491_s3, 1  ;;  %vm897_vm1 = vcmask 261120   ;;  %v1184_v35 = vlaneseq }
  0x30   : > { %5607 = vmatprep.subr.bf16.mxu1 %v6312_v1  ;;  %5621 = vmatprep.subr.bf16.mxu0 %v6312_v1  ;;  %vm969_vm2 = vcmask 64512   ;;  %vm1197_vm3 = vcmask 130048   ;;  %vm1489_vm4 = vcmask 1043456   ;;  %vm2118_vm5 = vcmask 523264   ;;  %s7846_s5 = sld [smem:[#allocation30_spill]] }
  0x31   : > { %5608 = vmatpush3.bf16.msra.mxu1 %v6045_v0  ;;  %5611 = vmatprep.mubr.msk.bf16.mxu1 %vm6313_vm0, %v6312_v1  ;;  %s5486_s12 = sshll.u32 %s6533_s11, 4  ;;  %v5277_v7 = vld [vmem:[%s7824_s29] ss:$0 sm:$0xff]  ;;  %v6599_v36 = vshrl.u32 %v1184_v35, 7  ;;  %s7849_s26 = sld [smem:[#allocation28_spill]]  ;;  %vm5032_vm9 = vcmask 785408  }
  0x32   : > { %5609 = vmatprep.subr.bf16.mxu1 %v6312_v1  ;;  %5623 = vmatprep.mubr.msk.bf16.mxu0 %vm6313_vm0, %v6312_v1  ;;  %s854_s6 = scalar_lea.vmem %s7823_s9, %s5486_s12  ;;  %s7761_s9 = smov 104   ;;  %v863_v40 = vld [vmem:[%s7826_s7] sm:$0xff]  ;;  %v864_v46 = vld [vmem:[%s7826_s7 + $0x8] sm:$0xff]  ;;  %v865_v55 = vld [vmem:[%s7826_s7 + $0x10] sm:$0xff] }
  0x33   : > { %v6540_v3 = vld [vmem:[%s854_s6] sm:$0xff]  ;;  %v6542_v4 = vld [vmem:[%s854_s6 + $0x8] sm:$0xff]  ;;  %s7763_s12 = smov 120   ;;  %s7759_s6 = smov 96   ;;  %v6602_v39 = vsub.s32 0, %v6599_v36  ;;  %v866_v60 = vld [vmem:[%s7826_s7 + $0x18] sm:$0xff] }
  0x34   : > { %v873_v5 = vpack.c.bf16 %v6542_v4, %v6540_v3  ;;  %v867_v62 = vld [vmem:[%s7826_s7 + $0x20] sm:$0xff]  ;;  %s7831_s28 = smov %s7830_s8  ;;  %s7834_s2 = smov %s7833_s30  ;;  %vm4894_vm6 = vcmp.lt.s32.totalorder %v6599_v36, 1  ;;  %vm4906_vm7 = vcmp.lt.s32.totalorder %v6599_v36, 7  ;;  %vm4875_vm8 = vcmp.lt.s32.totalorder %v6599_v36, 4 }
  0x35   : > { %5610 = vmatpush3.bf16.msra.mxu1 %v6046_v2  ;;  %s7855_s25 = sld [smem:[#allocation33_spill]] }
  0x36   : > { %5615 = vmatprep.subr.bf16.mxu1 %v6312_v1  ;;  %s7847_s24 = smov %s7846_s5 }
  0x38   : > { %5612 = vmatmul.mubr.msk.bf16.vlgmr.msra.gmra.mxu1 %vm897_vm1, %v873_v5 }
  0x39   : > { %5617 = vmatprep.mubr.msk.bf16.mxu1 %vm6313_vm0, %v6312_v1 }
  0xf8   : > { %v935_v6 = vpop.f32.mrf.mxu1 }
  0xf9   : > { %v936_v10 = vadd.f32 %v5277_v7, %v935_v6 }
  0xfa   : > { %v5613_v8 = vpop.f32.mrf.mxu1 }
  0xfc   : > { %v938_v9 = vpop.f32.mrf.mxu1 }
  0xfd   : > { %v939_v11 = vadd.f32 %v5277_v7, %v938_v9 }
  0xfe   : > { %v5614_v12 = vpop.f32.mrf.mxu1 }
  0xff   : > { %v6000_v13 = vpack.i.bf16 %v939_v11, %v936_v10  ;;  %v6554_v14 = vpack.c.bf16 %v939_v11, %v936_v10  ;;  %v869_v11 = vld [vmem:[%s7826_s7 + $0x30] sm:$0xff] }
 0x101   : > { %6001 = vrot.lane.b32.xlu1 %v6000_v13, %s7761_s9  ;;  %5991 = vrot.lane.b32.xlu0 %v6000_v13, %s7763_s12  ;;  %s7827_s12 = sld [smem:[#allocation19_spill]] }
 0x105   : > { %5996 = vrot.lane.b32.xlu0 %v6000_v13, %s7765_s1  ;;  %967 = vrot.lane.b32.xlu1 %v6554_v14, %s7759_s6  ;;  %v868_v13 = vld [vmem:[%s7826_s7 + $0x28] sm:$0xff]  ;;  %s7841_s1 = smov 104  }
 0x173   : > { %v6002_v15 = vpop.permute.xlu1 %6001  ;;  %v5992_v16 = vpop.permute.xlu0 %5991 }
 0x174   : > { %v5994_v17 = vunpack.i.h.bf16 %v5992_v16  ;;  %v5993_v18 = vunpack.i.l.bf16 %v5992_v16  ;;  %v6004_v19 = vunpack.i.h.bf16 %v6002_v15  ;;  %v6003_v20 = vunpack.i.l.bf16 %v6002_v15 }
 0x176   : > { %v6559_v21 = vpack.c.bf16 %v5994_v17, %v5993_v18  ;;  %v6564_v27 = vpack.c.bf16 %v6004_v19, %v6003_v20 }
 0x177   : > { %v5997_v22 = vpop.permute.xlu0 %5996  ;;  %v968_v23 = vpop.permute.xlu1 %967 }
 0x178   : > { %v5999_v24 = vunpack.i.h.bf16 %v5997_v22  ;;  %v5998_v25 = vunpack.i.l.bf16 %v5997_v22  ;;  %v974_v26 = vsel %vm969_vm2, %v968_v23, 0  ;;  %1018 = vrot.lane.b32.xlu0 %v6559_v21, %s7759_s6 }
 0x179   : > { %5616 = vmatpush3.bf16.xpose.msra.mxu1 %v974_v26 }
 0x17a   : > { %v6566_v28 = vpack.c.bf16 %v5999_v24, %v5998_v25  ;;  %5627 = vmatprep.subr.bf16.mxu1 %v6312_v1 }
 0x17c   : > { %1118 = vrot.lane.b32.xlu0 %v6564_v27, %s7759_s6  ;;  %1068 = vrot.lane.b32.xlu1 %v6566_v28, %s7759_s6  ;;  %s7825_s6 = sld [smem:[#allocation15_spill]] }
 0x180   : > { %5618 = vmatmul.mubr.msk.bf16.vlgmr.msra.gmra.mxu1 %vm969_vm2, %v6554_v14 }
 0x181   : > { %5629 = vmatprep.mubr.msk.bf16.mxu1 %vm6313_vm0, %v6312_v1 }
 0x182   : > { %s857_s9 = scalar_lea.vmem %s7825_s6, %s6533_s11  ;;  %s7828_s11 = sld [smem:[#allocation20_spill]] }
 0x183   : > { %v861_v37 = vld [vmem:[%s857_s9] sm:$0x1]  ;;  %s7829_s6 = sld [smem:[#allocation23_spill]] }
 0x184   : > { %v862_v38 = vmul.f32 1e+09, %v861_v37  ;;  %s7835_s9 = sld [smem:[#allocation25_spill]] }
 0x186   : > { %v6608_v42 = vrot.slane %v862_v38, %v6602_v39 }
 0x18a   : > { %s7836_s27 = smov %s7835_s9 }
 0x1ea   : > { %v1019_v29 = vpop.permute.xlu0 %1018 }
 0x1eb   : > { %v1024_v30 = vsel %vm969_vm2, %v1019_v29, 0  ;;  %v870_v29 = vld [vmem:[%s7826_s7 + $0x38] sm:$0xff] }
 0x1ec   : > { %5622 = vmatpush3.bf16.xpose.msra.mxu0 %v1024_v30 }
 0x1ed   : > { %5633 = vmatprep.subr.bf16.mxu0 %v6312_v1 }
 0x1ee   : > { %v1069_v31 = vpop.permute.xlu1 %1068  ;;  %v1119_v33 = vpop.permute.xlu0 %1118 }
 0x1ef   : > { %v1074_v32 = vsel %vm969_vm2, %v1069_v31, 0  ;;  %v1124_v34 = vsel %vm969_vm2, %v1119_v33, 0 }
 0x1f0   : > { %5628 = vmatpush3.bf16.xpose.msra.mxu1 %v1074_v32 }
 0x1f1   : > { %5639 = vmatprep.subr.bf16.mxu1 %v6312_v1 }
 0x1f3   : > { %5624 = vmatmul.mubr.msk.bf16.vlgmr.msra.gmra.mxu0 %vm969_vm2, %v6559_v21 }
 0x1f4   : > { %5634 = vmatpush3.bf16.xpose.msra.mxu0 %v1124_v34  ;;  %5635 = vmatprep.mubr.msk.bf16.mxu0 %vm6313_vm0, %v6312_v1 }
 0x1f5   : > { %5645 = vmatprep.subr.bf16.mxu0 %v6312_v1 }
 0x1f7   : > { %5630 = vmatmul.mubr.msk.bf16.vlgmr.msra.gmra.mxu1 %vm969_vm2, %v6566_v28 }
 0x1f8   : > { %5641 = vmatprep.mubr.msk.bf16.mxu1 %vm6313_vm0, %v6312_v1 }
 0x1fb   : > { %5636 = vmatmul.mubr.msk.bf16.vlgmr.msra.gmra.mxu0 %vm969_vm2, %v6564_v27 }
 0x1fc   : > { %5647 = vmatprep.mubr.msk.bf16.mxu0 %vm6313_vm0, %v6312_v1 }
 0x240   : > { %v1010_v41 = vpop.f32.mrf.mxu1 }
 0x241   : > { %v1167_v43 = vmul.f32 0.35355338, %v1010_v41 }
 0x242   : > { %v5619_v44 = vpop.f32.mrf.mxu1 }
 0x243   : > { %v1175_v45 = vadd.f32 %v1167_v43, %v863_v40 }
 0x244   : > { %v1013_v47 = vpop.f32.mrf.mxu1 }
 0x245   : > { %v1168_v48 = vmul.f32 0.35355338, %v1013_v47  ;;  %v1189_v49 = vsub.f32 %v1175_v45, %v6608_v42 }
 0x246   : > { %v5620_v50 = vpop.f32.mrf.mxu1 }
 0x247   : > { %v1176_v51 = vadd.f32 %v1168_v48, %v864_v46  ;;  %v1198_v52 = vsel %vm1197_vm3, %v1189_v49, -inf }
 0x248   : > { %1199 = vmax.xlane.f32.xlu1 %v1198_v52 }
 0x249   : > { %v1190_v53 = vsub.f32 %v1176_v51, %v6608_v42 }
 0x24b   : > { %v1201_v54 = vsel %vm1197_vm3, %v1190_v53, -inf }
 0x24c   : > { %1202 = vmax.xlane.f32.xlu0 %v1201_v54 }
 0x2b3   : > { %v1060_v56 = vpop.f32.mrf.mxu0 }
 0x2b4   : > { %v1169_v57 = vmul.f32 0.35355338, %v1060_v56 }
 0x2b5   : > { %v5625_v58 = vpop.f32.mrf.mxu0 }
 0x2b6   : > { %v1177_v59 = vadd.f32 %v1169_v57, %v865_v55 }
 0x2b7   : > { %v1063_v61 = vpop.f32.mrf.mxu0  ;;  %v1110_v63 = vpop.f32.mrf.mxu1 }
 0x2b8   : > { %v1170_v0 = vmul.f32 0.35355338, %v1063_v61  ;;  %v1171_v2 = vmul.f32 0.35355338, %v1110_v63  ;;  %v1191_v5 = vsub.f32 %v1177_v59, %v6608_v42 }
 0x2b9   : > { %v5626_v6 = vpop.f32.mrf.mxu0  ;;  %v5631_v7 = vpop.f32.mrf.mxu1 }
 0x2ba   : > { %v1178_v8 = vadd.f32 %v1170_v0, %v866_v60  ;;  %v1179_v9 = vadd.f32 %v1171_v2, %v867_v62  ;;  %v1204_v10 = vsel %vm1197_vm3, %v1191_v5, -inf }
 0x2bb   : > { %v1160_v12 = vpop.f32.mrf.mxu0  ;;  %1205 = vmax.xlane.f32.xlu0 %v1204_v10  ;;  %v1113_v15 = vpop.f32.mrf.mxu1 }
 0x2bc   : > { %v1173_v16 = vmul.f32 0.35355338, %v1160_v12  ;;  %v1172_v17 = vmul.f32 0.35355338, %v1113_v15  ;;  %v1192_v18 = vsub.f32 %v1178_v8, %v6608_v42  ;;  %v1193_v19 = vsub.f32 %v1179_v9, %v6608_v42 }
 0x2bd   : > { %v5632_v20 = vpop.f32.mrf.mxu1  ;;  %v5637_v22 = vpop.f32.mrf.mxu0 }
 0x2be   : > { %v1181_v23 = vadd.f32 %v1173_v16, %v869_v11  ;;  %v1180_v24 = vadd.f32 %v1172_v17, %v868_v13  ;;  %v1207_v25 = vsel %vm1197_vm3, %v1192_v18, -inf  ;;  %v1210_v26 = vsel %vm1197_vm3, %v1193_v19, -inf }
 0x2bf   : > { %v1163_v30 = vpop.f32.mrf.mxu0  ;;  %1208 = vmax.xlane.f32.xlu1 %v1207_v25  ;;  %1211 = vmax.xlane.f32.xlu0 %v1210_v26 }
 0x2c0   : > { %v1174_v31 = vmul.f32 0.35355338, %v1163_v30  ;;  %v1195_v32 = vsub.f32 %v1181_v23, %v6608_v42  ;;  %v1194_v33 = vsub.f32 %v1180_v24, %v6608_v42 }
 0x2c1   : > { %v5638_v34 = vpop.f32.mrf.mxu0 }
 0x2c2   : > { %v1182_v35 = vadd.f32 %v1174_v31, %v870_v29  ;;  %v1216_v37 = vsel %vm1197_vm3, %v1195_v32, -inf  ;;  %v1213_v38 = vsel %vm1197_vm3, %v1194_v33, -inf }
 0x2c3   : > { %1217 = vmax.xlane.f32.xlu0 %v1216_v37  ;;  %1214 = vmax.xlane.f32.xlu1 %v1213_v38 }
 0x2c4   : > { %v1196_v40 = vsub.f32 %v1182_v35, %v6608_v42 }
 0x2c6   : > { %v1219_v41 = vsel %vm1197_vm3, %v1196_v40, -inf }
 0x2c7   : > { %1220 = vmax.xlane.f32.xlu1 %v1219_v41 }
 0x2d1   : > { %v1200_v43 = vpop.xlane.xlu1 %1199 }
 0x2d2   : > { %v1222_v44 = vsub.f32 %v1189_v49, %v1200_v43 }
 0x2d4   : > { %v1230_v46 = vmul.f32 1.442695, %v1222_v44 }
 0x2d5   : > { %v1203_v45 = vpop.xlane.xlu0 %1202 }
 0x2d6   : > { %v1223_v47 = vsub.f32 %v1190_v53, %v1203_v45  ;;  %6087 = vpow2.f32 %v1230_v46 }
 0x2d8   : > { %1337 = vrot.lane.b32.xlu1 %v6559_v21, %s7768_s10  ;;  %v1232_v48 = vmul.f32 1.442695, %v1223_v47 }
 0x2d9   : > { %1290 = vrot.lane.b32.xlu0 %v6554_v14, %s7768_s10 }
 0x2da   : > { %6089 = vpow2.f32 %v1232_v48 }
 0x2e3   : > { %v6088_v50 = vpop.eup %6087 }
 0x2e4   : > { %v1246_v51 = vsel %vm1197_vm3, %v6088_v50, 0.0 }
 0x2e7   : > { %v6090_v52 = vpop.eup %6089 }
 0x2e8   : > { %v1249_v54 = vsel %vm1197_vm3, %v6090_v52, 0.0 }
 0x2f8   : > { %1247 = vadd.xlane.f32.xlu0 %v1246_v51 }
 0x2fc   : > { %1250 = vadd.xlane.f32.xlu1 %v1249_v54 }
 0x344   : > { %v1206_v21 = vpop.xlane.xlu0 %1205 }
 0x345   : > { %v1224_v55 = vsub.f32 %v1191_v5, %v1206_v21 }
 0x347   : > { %v1234_v56 = vmul.f32 1.442695, %v1224_v55 }
 0x348   : > { %v1209_v14 = vpop.xlane.xlu1 %1208  ;;  %v1212_v57 = vpop.xlane.xlu0 %1211 }
 0x349   : > { %6091 = vpow2.f32 %v1234_v56  ;;  %v1225_v49 = vsub.f32 %v1192_v18, %v1209_v14  ;;  %v1226_v58 = vsub.f32 %v1193_v19, %v1212_v57 }
 0x34b   : > { %v1236_v53 = vmul.f32 1.442695, %v1225_v49  ;;  %v1238_v59 = vmul.f32 1.442695, %v1226_v58  ;;  %v1483_v58 = vld [vmem:[%s7827_s12 + $0x4] sm:$0xf] }
 0x34c   : > { %v1218_v60 = vpop.xlane.xlu0 %1217  ;;  %v1215_v61 = vpop.xlane.xlu1 %1214 }
 0x34d   : > { %6093 = vpow2.f32 %v1236_v53  ;;  %v1228_v62 = vsub.f32 %v1195_v32, %v1218_v60  ;;  %v1227_v63 = vsub.f32 %v1194_v33, %v1215_v61  ;;  %v1538_v53 = vsel %vm1489_vm4, %v1483_v58, 0  ;;  %v1484_v61 = vld [vmem:[%s7827_s12 + $0x8] sm:$0xf] }
 0x34e   : > { %6095 = vpow2.f32 %v1238_v59 }
 0x34f   : > { %v1242_v0 = vmul.f32 1.442695, %v1228_v62  ;;  %v1240_v2 = vmul.f32 1.442695, %v1227_v63 }
 0x350   : > { %v1291_v6 = vpop.permute.xlu0 %1290  ;;  %v1221_v7 = vpop.xlane.xlu1 %1220 }
 0x351   : > { %6097 = vpow2.f32 %v1242_v0  ;;  %v1229_v5 = vsub.f32 %v1196_v40, %v1221_v7  ;;  %5640 = vmatpush3.bf16.msra.mxu1 %v1291_v6  ;;  %v1585_v0 = vsel %vm1489_vm4, %v1484_v61, 0 }
 0x352   : > { %6099 = vpow2.f32 %v1240_v2  ;;  %5651 = vmatprep.subr.bf16.mxu1 %v6312_v1 }
 0x353   : > { %v1244_v8 = vmul.f32 1.442695, %v1229_v5  ;;  %v1485_v5 = vld [vmem:[%s7827_s12 + $0xc] sm:$0xf] }
 0x354   : > { %v1338_v9 = vpop.permute.xlu1 %1337 }
 0x355   : > { %6101 = vpow2.f32 %v1244_v8  ;;  %5646 = vmatpush3.bf16.msra.mxu0 %v1338_v9 }
 0x356   : > { %v6092_v10 = vpop.eup %6091  ;;  %5657 = vmatprep.subr.bf16.mxu0 %v6312_v1 }
 0x357   : > { %v1252_v11 = vsel %vm1197_vm3, %v6092_v10, 0.0 }
 0x358   : > { %1253 = vadd.xlane.f32.xlu0 %v1252_v11 }
 0x35a   : > { %v6094_v12 = vpop.eup %6093 }
 0x35b   : > { %v6096_v13 = vpop.eup %6095  ;;  %v1255_v15 = vsel %vm1197_vm3, %v6094_v12, 0.0 }
 0x35c   : > { %v1258_v16 = vsel %vm1197_vm3, %v6096_v13, 0.0  ;;  %1256 = vadd.xlane.f32.xlu1 %v1255_v15 }
 0x35d   : > { %1259 = vadd.xlane.f32.xlu0 %v1258_v16 }
 0x35e   : > { %v6098_v17 = vpop.eup %6097 }
 0x35f   : > { %v6100_v18 = vpop.eup %6099  ;;  %v1264_v19 = vsel %vm1197_vm3, %v6098_v17, 0.0 }
 0x360   : > { %v1261_v20 = vsel %vm1197_vm3, %v6100_v18, 0.0 }
 0x361   : > { %1265 = vadd.xlane.f32.xlu0 %v1264_v19  ;;  %1262 = vadd.xlane.f32.xlu1 %v1261_v20 }
 0x362   : > { %v6102_v22 = vpop.eup %6101 }
 0x363   : > { %v1267_v23 = vsel %vm1197_vm3, %v6102_v22, 0.0 }
 0x365   : > { %1268 = vadd.xlane.f32.xlu1 %v1267_v23 }
 0x376   : > { %1384 = vrot.lane.b32.xlu1 %v6566_v28, %s7768_s10 }
 0x377   : > { %1431 = vrot.lane.b32.xlu0 %v6564_v27, %s7768_s10  ;;  %s7832_s10 = sld [smem:[#allocation21_spill]] }
 0x381   : > { %v1248_v24 = vpop.xlane.xlu0 %1247 }
 0x382   : > { %6103 = vrcp.f32 %v1248_v24 }
 0x385   : > { %v1251_v25 = vpop.xlane.xlu1 %1250 }
 0x386   : > { %6105 = vrcp.f32 %v1251_v25 }
 0x38f   : > { %v6104_v26 = vpop.eup %6103 }
 0x390   : > { %v1278_v30 = vmul.f32 %v6104_v26, %v6088_v50  ;;  %v1482_v50 = vld [vmem:[%s7827_s12] sm:$0xf] }
 0x391   : > { %v1491_v56 = vsel %vm1489_vm4, %v1482_v50, 0 }
 0x393   : > { %v6106_v29 = vpop.eup %6105 }
 0x394   : > { %v1279_v31 = vmul.f32 %v6106_v29, %v6090_v52 }
 0x396   : > { %v1286_v32 = vpack.c.bf16 %v1279_v31, %v1278_v30 }
 0x398   : > { %5642 = vmatmul.mubr.msk.bf16.vlgmr.msra.gmra.mxu1 %vm1197_vm3, %v1286_v32 }
 0x399   : > { %5653 = vmatprep.mubr.msk.bf16.mxu1 %vm6313_vm0, %v6312_v1 }
 0x3e1   : > { %v1254_v33 = vpop.xlane.xlu0 %1253 }
 0x3e2   : > { %6107 = vrcp.f32 %v1254_v33 }
 0x3e5   : > { %v1257_v28 = vpop.xlane.xlu1 %1256 }
 0x3e6   : > { %v1260_v34 = vpop.xlane.xlu0 %1259  ;;  %6109 = vrcp.f32 %v1257_v28 }
 0x3e7   : > { %6111 = vrcp.f32 %v1260_v34 }
 0x3ea   : > { %v1266_v27 = vpop.xlane.xlu0 %1265  ;;  %v1263_v35 = vpop.xlane.xlu1 %1262 }
 0x3eb   : > { %6113 = vrcp.f32 %v1263_v35 }
 0x3ec   : > { %6115 = vrcp.f32 %v1266_v27 }
 0x3ee   : > { %v1269_v37 = vpop.xlane.xlu1 %1268  ;;  %v1432_v47 = vpop.permute.xlu0 %1431 }
 0x3ef   : > { %6117 = vrcp.f32 %v1269_v37  ;;  %v6108_v38 = vpop.eup %6107 }
 0x3f0   : > { %v1280_v43 = vmul.f32 %v6108_v38, %v6092_v10  ;;  %v1632_v10 = vsel %vm1489_vm4, %v1485_v5, 0 }
 0x3f2   : > { %v1385_v40 = vpop.permute.xlu1 %1384 }
 0x3f3   : > { %v6110_v41 = vpop.eup %6109  ;;  %5652 = vmatpush3.bf16.msra.mxu1 %v1385_v40 }
 0x3f4   : > { %v1281_v44 = vmul.f32 %v6110_v41, %v6094_v12  ;;  %5663 = vmatprep.subr.bf16.mxu1 %v6312_v1  ;;  %v6112_v46 = vpop.eup %6111 }
 0x3f5   : > { %v1282_v52 = vmul.f32 %v6112_v46, %v6096_v13 }
 0x3f6   : > { %v1287_v45 = vpack.c.bf16 %v1281_v44, %v1280_v43 }
 0x3f8   : > { %5648 = vmatmul.mubr.msk.bf16.vlgmr.msra.gmra.mxu0 %vm1197_vm3, %v1287_v45  ;;  %v6114_v48 = vpop.eup %6113 }
 0x3f9   : > { %5658 = vmatpush3.bf16.msra.mxu0 %v1432_v47  ;;  %5659 = vmatprep.mubr.msk.bf16.mxu0 %vm6313_vm0, %v6312_v1  ;;  %v6116_v51 = vpop.eup %6115  ;;  %v1283_v54 = vmul.f32 %v6114_v48, %v6100_v18  ;;  %v5293_v47 = vld [vmem:[%s7828_s11] ss:$0 sm:$0xff] }
 0x3fa   : > { %5669 = vmatprep.subr.bf16.mxu0 %v6312_v1  ;;  %v1284_v14 = vmul.f32 %v6116_v51, %v6098_v17 }
 0x3fb   : > { %v1288_v55 = vpack.c.bf16 %v1283_v54, %v1282_v52 }
 0x3fc   : > { %v6118_v21 = vpop.eup %6117 }
 0x3fd   : > { %v1285_v57 = vmul.f32 %v6118_v21, %v6102_v22  ;;  %5654 = vmatmul.mubr.msk.bf16.vlgmr.msra.gmra.mxu1 %vm1197_vm3, %v1288_v55 }
 0x3fe   : > { %5664 = vmatpush3.bf16.msra.mxu1 %v1491_v56  ;;  %5665 = vmatprep.mubr.msk.bf16.mxu1 %vm6313_vm0, %v6312_v1 }
 0x3ff   : > { %v1289_v49 = vpack.c.bf16 %v1285_v57, %v1284_v14  ;;  %5675 = vmatprep.subr.bf16.mxu1 %v6312_v1 }
 0x401   : > { %5660 = vmatmul.mubr.msk.bf16.vlgmr.msra.gmra.mxu0 %vm1197_vm3, %v1289_v49 }
 0x402   : > { %5671 = vmatprep.mubr.msk.bf16.mxu0 %vm6313_vm0, %v6312_v1  ;;  %5670 = vmatpush3.bf16.msra.mxu0 %v1538_v53 }
 0x403   : > { %5681 = vmatprep.subr.bf16.mxu0 %v6312_v1 }
 0x458   : > { %v1330_v59 = vpop.f32.mrf.mxu1 }
 0x45a   : > { %v5643_v60 = vpop.f32.mrf.mxu1 }
 0x45c   : > { %v1333_v62 = vpop.f32.mrf.mxu1 }
 0x45d   : > { %v1478_v63 = vpack.c.bf16 %v1333_v62, %v1330_v59 }
 0x45e   : > { %v5644_v2 = vpop.f32.mrf.mxu1 }
 0x45f   : > { %5666 = vmatmul.mubr.msk.bf16.vlgmr.msra.gmra.mxu1 %vm969_vm2, %v1478_v63 }
 0x460   : > { %5676 = vmatpush3.bf16.msra.mxu1 %v1585_v0  ;;  %5677 = vmatprep.mubr.msk.bf16.mxu1 %vm6313_vm0, %v6312_v1 }
 0x4b8   : > { %v1377_v6 = vpop.f32.mrf.mxu0 }
 0x4ba   : > { %v5649_v7 = vpop.f32.mrf.mxu0 }
 0x4bc   : > { %v1380_v8 = vpop.f32.mrf.mxu0 }
 0x4bd   : > { %v1479_v9 = vpack.c.bf16 %v1380_v8, %v1377_v6  ;;  %v1424_v11 = vpop.f32.mrf.mxu1 }
 0x4be   : > { %v5650_v12 = vpop.f32.mrf.mxu0 }
 0x4bf   : > { %5672 = vmatmul.mubr.msk.bf16.vlgmr.msra.gmra.mxu0 %vm969_vm2, %v1479_v9  ;;  %v5655_v13 = vpop.f32.mrf.mxu1 }
 0x4c0   : > { %5682 = vmatpush3.bf16.msra.mxu0 %v1632_v10  ;;  %5683 = vmatprep.mubr.msk.bf16.mxu0 %vm6313_vm0, %v6312_v1  ;;  %v6319_v10 = vmov 0  }
 0x4c1   : > { %v1471_v15 = vpop.f32.mrf.mxu0  ;;  %5687 = vmatprep.subr.bf16.mxu0 %v6312_v1  ;;  %v1427_v16 = vpop.f32.mrf.mxu1  ;;  %1903 = vmatprep.subr.bf16.mxu1 %v6319_v10 }
 0x4c2   : > { %v1480_v17 = vpack.c.bf16 %v1427_v16, %v1424_v11  ;;  %v6320_v11 = vmov 1966171168  }
 0x4c3   : > { %v5661_v18 = vpop.f32.mrf.mxu0  ;;  %v5656_v19 = vpop.f32.mrf.mxu1  ;;  %v1751_v12 = vunpack.c.l.s4 %v6320_v11  ;;  %v5296_v11 = vld.sshfl [vmem:[%s7831_s28 + $0x8] sm:$0x1 pattern:$0x75316420] }
 0x4c4   : > { %5678 = vmatmul.mubr.msk.bf16.vlgmr.msra.gmra.mxu1 %vm969_vm2, %v1480_v17  ;;  %v1745_v17 = vld [vmem:[%s7830_s8] sm:$0xff]  ;;  %s7837_s8 = sld [smem:[#allocation26_spill]] }
 0x4c5   : > { %v1474_v20 = vpop.f32.mrf.mxu0  ;;  %v1752_v16 = vunpack.c.0.s8 %v1751_v12 }
 0x4c6   : > { %v1481_v22 = vpack.c.bf16 %v1474_v20, %v1471_v15 }
 0x4c7   : > { %v5662_v23 = vpop.f32.mrf.mxu0 }
 0x4c8   : > { %5684 = vmatmul.mubr.msk.bf16.vlgmr.msra.gmra.mxu0 %vm969_vm2, %v1481_v22  ;;  %v1749_v22 = vcombine.high %v1745_v17, %v1745_v17  ;;  %v6737_v23 = vsub.s32 %v1752_v16, %v6599_v36 }
 0x4c9   : > { %5691 = vmatprep.mubr.msk.bf16.mxu0 %vm6313_vm0, %v6312_v1 }
 0x4ca   : > { %s7838_s3 = smov %s7837_s8 }
 0x51f   : > { %v1527_v24 = vpop.f32.mrf.mxu1 }
 0x520   : > { %v1675_v28 = vsel %vm897_vm1, %v1527_v24, 0.0 }
 0x521   : > { %v5667_v25 = vpop.f32.mrf.mxu1 }
 0x522   : > { %v1763_v25 = vrot.slane %v1749_v22, %v6737_v23 }
 0x523   : > { %v1530_v26 = vpop.f32.mrf.mxu1 }
 0x524   : > { %v1682_v44 = vsel %vm897_vm1, %v1530_v26, 0.0  ;;  %v1765_v26 = vcombine.high %v1763_v25, %v1763_v25 }
 0x525   : > { %v5668_v29 = vpop.f32.mrf.mxu1 }
 0x526   : > { %v1793_v29 = vrot.slane %v1765_v26, %v6737_v23 }
 0x57f   : > { %v1574_v30 = vpop.f32.mrf.mxu0 }
 0x580   : > { %v1676_v32 = vsel %vm897_vm1, %v1574_v30, 0.0 }
 0x581   : > { %v5673_v31 = vpop.f32.mrf.mxu0  ;;  %v1677_v35 = vadd.f32 %v1676_v32, %v1675_v28  ;;  %v1797_v28 = vcombine.high %v1793_v29, %v1793_v29 }
 0x582   : > { %v5294_v31 = vld [vmem:[%s7832_s10] ss:$0 sm:$0xff] }
 0x583   : > { %v1577_v33 = vpop.f32.mrf.mxu0 }
 0x584   : > { %v1621_v34 = vpop.f32.mrf.mxu1  ;;  %v1683_v38 = vsel %vm897_vm1, %v1577_v33, 0.0 }
 0x585   : > { %v5674_v27 = vpop.f32.mrf.mxu0  ;;  %v1678_v37 = vsel %vm897_vm1, %v1621_v34, 0.0  ;;  %v1684_v48 = vadd.f32 %v1683_v38, %v1682_v44  ;;  %v1779_v34 = vrot.slane %v1763_v25, %v6737_v23  ;;  %v1756_v38 = vrot.slane %v1745_v17, %v6737_v23 }
 0x586   : > { %v5679_v40 = vpop.f32.mrf.mxu1  ;;  %v1679_v41 = vadd.f32 %v1678_v37, %v1677_v35  ;;  %v5295_v35 = vld [vmem:[%s7833_s30] ss:$0 sm:$0xff]  ;;  %v1811_v17 = vrot.slane %v5296_v11, %v6737_v23  ;;  %s7839_s30 = smov 112  }
 0x587   : > { %v1795_v44 = vcombine.high %v1779_v34, %v1779_v34 }
 0x588   : > { %v1668_v43 = vpop.f32.mrf.mxu0  ;;  %v1624_v45 = vpop.f32.mrf.mxu1  ;;  %v1847_v22 = vrot.slane %v1811_v17, %v6602_v39 }
 0x589   : > { %v1680_v46 = vsel %vm897_vm1, %v1668_v43, 0.0  ;;  %v1685_v50 = vsel %vm897_vm1, %v1624_v45, 0.0  ;;  %v1843_v43 = vrot.slane %v1797_v28, %v6602_v39 }
 0x58a   : > { %v1681_v51 = vadd.f32 %v1680_v46, %v1679_v41  ;;  %v5685_v52 = vpop.f32.mrf.mxu0  ;;  %v5680_v54 = vpop.f32.mrf.mxu1  ;;  %v1686_v21 = vadd.f32 %v1685_v50, %v1684_v48  ;;  %v1839_v48 = vrot.slane %v1795_v44, %v6602_v39  ;;  %v1764_v50 = vcombine.high %v1756_v38, %v1756_v38 }
 0x58c   : > { %v1696_v55 = vadd.f32 %v5293_v47, %v1681_v51  ;;  %v1671_v56 = vpop.f32.mrf.mxu0 }
 0x58d   : > { %v1687_v14 = vsel %vm897_vm1, %v1671_v56, 0.0 }
 0x58e   : > { %v1688_v57 = vadd.f32 %v1687_v14, %v1686_v21  ;;  %v5686_v49 = vpop.f32.mrf.mxu0  ;;  %v1698_v58 = vadd.f32 %v1696_v55, %v6540_v3  ;;  %v1835_v21 = vrot.slane %v1793_v29, %v6602_v39  ;;  %v1786_v55 = vrot.slane %v1764_v50, %v6737_v23 }
 0x58f   : > { %v1831_v49 = vrot.slane %v1779_v34, %v6602_v39 }
 0x590   : > { %v1697_v53 = vadd.f32 %v5293_v47, %v1688_v57  ;;  %v1702_v59 = vsel %vm897_vm1, %v1698_v58, 0.0 }
 0x591   : > { %1703 = vadd.xlane.f32.xlu1 %v1702_v59 }
 0x592   : > { %v1699_v60 = vadd.f32 %v1697_v53, %v6542_v4  ;;  %v6729_v4 = vld [vmem:[%s7829_s6 + $0x4] ss:$8 sps:$4 sm:$0xff]   ;;  %v1772_v53 = vrot.slane %v1756_v38, %v6737_v23 }
 0x593   : > { %5300 = vmatprep.mubr.msk.bf16.mxu1 %vm1197_vm3, %v6729_v4 }
 0x594   : > { %v1705_v61 = vsel %vm897_vm1, %v1699_v60, 0.0  ;;  %v1815_v16 = vrot.slane %v1772_v53, %v6602_v39 }
 0x595   : > { %1706 = vadd.xlane.f32.xlu0 %v1705_v61 }
 0x61a   : > { %v1704_v62 = vpop.xlane.xlu1 %1703 }
 0x61b   : > { %v1709_v63 = vmul.f32 0.03125, %v1704_v62 }
 0x61d   : > { %v1711_v0 = vsub.f32 %v1698_v58, %v1709_v63  ;;  %v1796_v58 = vcombine.high %v1786_v55, %v1786_v55  ;;  %v1794_v63 = vcombine.high %v1772_v53, %v1772_v53 }
 0x61e   : > { %v1707_v2 = vpop.xlane.xlu0 %1706 }
 0x61f   : > { %v1710_v6 = vmul.f32 0.03125, %v1707_v2  ;;  %v1713_v7 = vmul.f32 %v1711_v0, %v1711_v0  ;;  %v1827_v62 = vrot.slane %v1796_v58, %v6602_v39 }
 0x621   : > { %v1712_v5 = vsub.f32 %v1699_v60, %v1710_v6  ;;  %v1715_v8 = vsel %vm897_vm1, %v1713_v7, 0.0  ;;  %v1823_v7 = vrot.slane %v1794_v63, %v6602_v39 }
 0x622   : > { %1716 = vadd.xlane.f32.xlu0 %v1715_v8 }
 0x623   : > { %v1714_v3 = vmul.f32 %v1712_v5, %v1712_v5 }
 0x625   : > { %v1718_v9 = vsel %vm897_vm1, %v1714_v3, 0.0 }
 0x626   : > { %1719 = vadd.xlane.f32.xlu1 %v1718_v9  ;;  %v1819_v9 = vrot.slane %v1786_v55, %v6602_v39 }
 0x6ab   : > { %v1717_v13 = vpop.xlane.xlu0 %1716 }
 0x6ac   : > { %v1721_v15 = vmul.f32 0.03125, %v1717_v13 }
 0x6ae   : > { %v1723_v18 = vadd.f32 1e-05, %v1721_v15 }
 0x6af   : > { %v1720_v19 = vpop.xlane.xlu1 %1719 }
 0x6b0   : > { %6119 = vrsqrt.f32 %v1723_v18  ;;  %v1722_v20 = vmul.f32 0.03125, %v1720_v19 }
 0x6b2   : > { %v1724_v24 = vadd.f32 1e-05, %v1722_v20 }
 0x6b4   : > { %6121 = vrsqrt.f32 %v1724_v24 }
 0x6bd   : > { %v6120_v30 = vpop.eup %6119 }
 0x6be   : > { %v1727_v32 = vmul.f32 %v6120_v30, %v1711_v0  ;;  %v6050_v30 = vld [vmem:[%s7829_s6] ss:$8 sps:$4 sm:$0xff]  }
 0x6c0   : > { %v1735_v33 = vmul.f32 %v5294_v31, %v1727_v32 }
 0x6c1   : > { %v6122_v27 = vpop.eup %6121 }
 0x6c2   : > { %v1728_v37 = vmul.f32 %v6122_v27, %v1712_v5  ;;  %v6749_v40 = vadd.f32 %v5295_v35, %v1735_v33 }
 0x6c4   : > { %v1736_v41 = vmul.f32 %v5294_v31, %v1728_v37  ;;  %v1871_v46 = vmul.f32 %v1843_v43, %v6749_v40  ;;  %v1869_v54 = vmul.f32 %v1839_v48, %v6749_v40  ;;  %v1867_v57 = vmul.f32 %v1835_v21, %v6749_v40  ;;  %v5297_v31 = vld [vmem:[%s7835_s9] ss:$0 sm:$0xff]  ;;  %s7840_s9 = smov 120  }
 0x6c5   : > { %v1865_v61 = vmul.f32 %v1831_v49, %v6749_v40  ;;  %v1863_v6 = vmul.f32 %v1827_v62, %v6749_v40  ;;  %v1861_v3 = vmul.f32 %v1823_v7, %v6749_v40  ;;  %v1859_v15 = vmul.f32 %v1819_v9, %v6749_v40 }
 0x6c6   : > { %v6752_v45 = vadd.f32 %v5295_v35, %v1736_v41  ;;  %v1857_v20 = vmul.f32 %v1815_v16, %v6749_v40  ;;  %v1873_v26 = vmul.f32 %v1847_v22, %v6749_v40 }
 0x6c8   : > { %v1872_v47 = vmul.f32 %v1843_v43, %v6752_v45  ;;  %v1870_v52 = vmul.f32 %v1839_v48, %v6752_v45  ;;  %v1868_v14 = vmul.f32 %v1835_v21, %v6752_v45  ;;  %v1866_v60 = vmul.f32 %v1831_v49, %v6752_v45 }
 0x6c9   : > { %v1864_v2 = vmul.f32 %v1827_v62, %v6752_v45  ;;  %v1862_v8 = vmul.f32 %v1823_v7, %v6752_v45  ;;  %v1860_v13 = vmul.f32 %v1819_v9, %v6752_v45  ;;  %v1858_v19 = vmul.f32 %v1815_v16, %v6752_v45 }
 0x6ca   : > { %v1882_v51 = vpack.c.bf16 %v1872_v47, %v1871_v46  ;;  %v1881_v56 = vpack.c.bf16 %v1870_v52, %v1869_v54  ;;  %v1880_v59 = vpack.c.bf16 %v1868_v14, %v1867_v57  ;;  %v1879_v0 = vpack.c.bf16 %v1866_v60, %v1865_v61 }
 0x6cb   : > { %v1878_v5 = vpack.c.bf16 %v1864_v2, %v1863_v6  ;;  %v1877_v12 = vpack.c.bf16 %v1862_v8, %v1861_v3  ;;  %v1876_v18 = vpack.c.bf16 %v1860_v13, %v1859_v15  ;;  %v1875_v24 = vpack.c.bf16 %v1858_v19, %v1857_v20  ;;  %v6052_v3 = vld [vmem:[%s7730_s14] sm:$0xff]  }
 0x6cc   : > { %1904 = vmatpush1.bf16.msra.mxu1 %v1882_v51  ;;  %v1874_v25 = vmul.f32 %v1847_v22, %v6752_v45  ;;  %v5301_v19 = vld [vmem:[%s7837_s8] ss:$0 sm:$0xff]  ;;  %s7842_s8 = smov 96  }
 0x6cd   : > { %1905 = vmatprep.subr.bf16.mxu1 %v6319_v10 }
 0x6ce   : > { %v1883_v29 = vpack.c.bf16 %v1874_v25, %v1873_v26  ;;  %v5302_v25 = vld [vmem:[%s7729_s13] ss:$0 sm:$0xff] }
 0x6d0   : > { %1906 = vmatpush1.bf16.msra.mxu1 %v1881_v56 }
 0x6d1   : > { %1907 = vmatprep.subr.bf16.mxu1 %v6319_v10 }
 0x6d4   : > { %1908 = vmatpush1.bf16.msra.mxu1 %v1880_v59 }
 0x6d5   : > { %1909 = vmatprep.subr.bf16.mxu1 %v6319_v10 }
 0x6d8   : > { %1910 = vmatpush1.bf16.msra.mxu1 %v1879_v0 }
 0x6d9   : > { %1911 = vmatprep.subr.bf16.mxu1 %v6319_v10 }
 0x6dc   : > { %1912 = vmatpush1.bf16.msra.mxu1 %v1878_v5 }
 0x6dd   : > { %1913 = vmatprep.subr.bf16.mxu1 %v6319_v10 }
 0x6e0   : > { %1914 = vmatpush1.bf16.msra.mxu1 %v1877_v12 }
 0x6e1   : > { %1915 = vmatprep.subr.bf16.mxu1 %v6319_v10 }
 0x6e4   : > { %1916 = vmatpush1.bf16.msra.mxu1 %v1876_v18 }
 0x6e5   : > { %1917 = vmatprep.subr.bf16.mxu1 %v6319_v10 }
 0x6e8   : > { %1918 = vmatpush1.bf16.msra.mxu1 %v1875_v24 }
 0x6e9   : > { %1933 = vmatprep.subr.bf16.mxu1 %v6319_v10 }
 0x6ec   : > { %1934 = vmatpush2.bf16.msra.mxu1 %v1883_v29 }
 0x6ed   : > { %5715 = vmatprep.subr.bf16.mxu1 %v6312_v1 }
 0x6ef   : > { %1936 = vmatmul.mubr.bf16.vlgmr.msra.gmra.mxu1 %v6050_v30 }
 0x6f0   : > { %5717 = vmatprep.mubr.msk.bf16.mxu1 %vm6313_vm0, %v6312_v1 }
 0x7af   : > { %v1937_v32 = vpop.f32.mrf.mxu1 }
 0x7b0   : > { %v1938_v33 = vadd.f32 %v5297_v31, %v1937_v32 }
 0x7b1   : > { %v1939_v28 = vpop.f32.mrf.mxu1 }
 0x7b2   : > { %v1946_v34 = vmul.f32 0.044715, %v1938_v33  ;;  %v1944_v54 = vmul.f32 0.5, %v1938_v33  ;;  %v6055_v28 = vld [vmem:[%s7732_s16 + $0x8] sm:$0xff]  }
 0x7b3   : > { %v1940_v27 = vpop.f32.mrf.mxu1 }
 0x7b4   : > { %v1948_v35 = vmul.f32 %v1946_v34, %v1938_v33  ;;  %v1941_v37 = vadd.f32 %v5297_v31, %v1940_v27  ;;  %v6053_v31 = vld [vmem:[%s7732_s16 + $0x18] sm:$0xff]   ;;  %v6056_v34 = vld [vmem:[%s7732_s16] sm:$0xff]  }
 0x7b5   : > { %v1942_v38 = vpop.f32.mrf.mxu1  ;;  %v5303_v27 = vld [vmem:[%s7731_s15] ss:$0 sm:$0xff] }
 0x7b6   : > { %v1947_v41 = vmul.f32 0.044715, %v1941_v37  ;;  %v1950_v43 = vmul.f32 %v1948_v35, %v1938_v33  ;;  %v1945_v57 = vmul.f32 0.5, %v1941_v37 }
 0x7b8   : > { %v1949_v44 = vmul.f32 %v1947_v41, %v1941_v37  ;;  %v1952_v46 = vadd.f32 %v1950_v43, %v1938_v33  ;;  %v6054_v33 = vld [vmem:[%s7732_s16 + $0x10] sm:$0xff]  }
 0x7ba   : > { %v1954_v47 = vmul.f32 0.7978846, %v1952_v46  ;;  %v1951_v48 = vmul.f32 %v1949_v44, %v1941_v37 }
 0x7bc   : > { %6123 = vtanh.f32 %v1954_v47  ;;  %v1953_v50 = vadd.f32 %v1951_v48, %v1941_v37 }
 0x7be   : > { %v1955_v51 = vmul.f32 0.7978846, %v1953_v50  ;;  %v5307_v50 = vld [vmem:[%s7733_s17] ss:$0 sm:$0xff] }
 0x7c0   : > { %6125 = vtanh.f32 %v1955_v51 }
 0x7c9   : > { %v6124_v52 = vpop.eup %6123 }
 0x7ca   : > { %v1958_v21 = vadd.f32 1.0, %v6124_v52 }
 0x7cc   : > { %v1960_v55 = vmul.f32 %v1958_v21, %v1944_v54 }
 0x7cd   : > { %v6126_v56 = vpop.eup %6125 }
 0x7ce   : > { %v1962_v14 = vadd.f32 %v1960_v55, %v6749_v40  ;;  %v1959_v49 = vadd.f32 1.0, %v6126_v56 }
 0x7d0   : > { %v1966_v58 = vsel %vm897_vm1, %v1962_v14, 0.0  ;;  %v1961_v53 = vmul.f32 %v1959_v49, %v1945_v57 }
 0x7d1   : > { %1967 = vadd.xlane.f32.xlu0 %v1966_v58 }
 0x7d2   : > { %v1963_v59 = vadd.f32 %v1961_v53, %v6752_v45  ;;  %v6051_v45 = vld [vmem:[%s7730_s14 + $0x8] sm:$0xff]  }
 0x7d3   : > { %5688 = vmatpush3.bf16.msra.mxu0 %v6051_v45 }
 0x7d4   : > { %v1969_v60 = vsel %vm897_vm1, %v1963_v59, 0.0  ;;  %5689 = vmatprep.subr.bf16.mxu0 %v6312_v1 }
 0x7d5   : > { %1970 = vadd.xlane.f32.xlu1 %v1969_v60 }
 0x7d7   : > { %5690 = vmatpush3.bf16.msra.mxu0 %v6052_v3 }
 0x7d8   : > { %5695 = vmatprep.subr.bf16.mxu0 %v6312_v1 }
 0x85a   : > { %v1968_v61 = vpop.xlane.xlu0 %1967 }
 0x85b   : > { %v1972_v62 = vmul.f32 0.03125, %v1968_v61 }
 0x85d   : > { %v1974_v63 = vsub.f32 %v1962_v14, %v1972_v62 }
 0x85e   : > { %v1971_v0 = vpop.xlane.xlu1 %1970 }
 0x85f   : > { %v1973_v2 = vmul.f32 0.03125, %v1971_v0  ;;  %v1976_v6 = vmul.f32 %v1974_v63, %v1974_v63 }
 0x861   : > { %v1975_v7 = vsub.f32 %v1963_v59, %v1973_v2  ;;  %v1978_v40 = vsel %vm897_vm1, %v1976_v6, 0.0 }
 0x862   : > { %1979 = vadd.xlane.f32.xlu0 %v1978_v40  ;;  %v6057_v40 = vld [vmem:[%s7822_s4 + $0x18] sm:$0xff]  }
 0x863   : > { %v1977_v5 = vmul.f32 %v1975_v7, %v1975_v7 }
 0x865   : > { %v1981_v8 = vsel %vm897_vm1, %v1977_v5, 0.0  ;;  %v6058_v5 = vld [vmem:[%s7822_s4 + $0x10] sm:$0xff]  }
 0x866   : > { %1982 = vadd.xlane.f32.xlu1 %v1981_v8 }
 0x8eb   : > { %v1980_v9 = vpop.xlane.xlu0 %1979 }
 0x8ec   : > { %v1984_v11 = vmul.f32 0.03125, %v1980_v9 }
 0x8ee   : > { %v1986_v12 = vadd.f32 1e-05, %v1984_v11 }
 0x8ef   : > { %v1983_v13 = vpop.xlane.xlu1 %1982 }
 0x8f0   : > { %6127 = vrsqrt.f32 %v1986_v12  ;;  %v1985_v15 = vmul.f32 0.03125, %v1983_v13 }
 0x8f2   : > { %v1987_v16 = vadd.f32 1e-05, %v1985_v15 }
 0x8f4   : > { %6129 = vrsqrt.f32 %v1987_v16  ;;  %v5313_v16 = vld [vmem:[%s7734_s18] ss:$0 sm:$0xff] }
 0x8fd   : > { %v6128_v17 = vpop.eup %6127 }
 0x8fe   : > { %v1990_v18 = vmul.f32 %v6128_v17, %v1974_v63 }
 0x900   : > { %v1998_v24 = vmul.f32 %v5301_v19, %v1990_v18 }
 0x901   : > { %v6130_v20 = vpop.eup %6129 }
 0x902   : > { %v1991_v22 = vmul.f32 %v6130_v20, %v1975_v7  ;;  %v2006_v29 = vadd.f32 %v5302_v25, %v1998_v24  ;;  %v5314_v20 = vld [vmem:[%s7735_s19] ss:$0 sm:$0xff] }
 0x904   : > { %v1999_v26 = vmul.f32 %v5301_v19, %v1991_v22 }
 0x906   : > { %v2007_v30 = vadd.f32 %v5302_v25, %v1999_v26 }
 0x908   : > { %v2008_v32 = vpack.c.bf16 %v2007_v30, %v2006_v29 }
 0x90a   : > { %5692 = vmatmul.mubr.msk.bf16.vlgmr.msra.gmra.mxu0 %vm897_vm1, %v2008_v32 }
 0x90b   : > { %5696 = vmatpush3.bf16.msra.mxu0 %v6053_v31  ;;  %5703 = vmatprep.mubr.msk.bf16.mxu0 %vm6313_vm0, %v6312_v1 }
 0x90c   : > { %5697 = vmatprep.subr.bf16.mxu0 %v6312_v1 }
 0x90f   : > { %5698 = vmatpush3.bf16.msra.mxu0 %v6054_v33 }
 0x910   : > { %5699 = vmatprep.subr.bf16.mxu0 %v6312_v1 }
 0x913   : > { %5700 = vmatpush3.bf16.msra.mxu0 %v6055_v28 }
 0x914   : > { %5701 = vmatprep.subr.bf16.mxu0 %v6312_v1 }
 0x917   : > { %5702 = vmatpush3.bf16.msra.mxu0 %v6056_v34 }
 0x918   : > { %5707 = vmatprep.subr.bf16.mxu0 %v6312_v1 }
 0x9ca   : > { %v2069_v35 = vpop.f32.mrf.mxu0 }
 0x9cb   : > { %v2070_v38 = vadd.f32 %v5303_v27, %v2069_v35 }
 0x9cc   : > { %v5693_v37 = vpop.f32.mrf.mxu0 }
 0x9cd   : > { %v2076_v46 = vmax.f32 %v2070_v38, 0.0 }
 0x9ce   : > { %v2072_v41 = vpop.f32.mrf.mxu0 }
 0x9cf   : > { %v2073_v43 = vadd.f32 %v5303_v27, %v2072_v41 }
 0x9d0   : > { %v5694_v44 = vpop.f32.mrf.mxu0 }
 0x9d1   : > { %v2077_v47 = vmax.f32 %v2073_v43, 0.0 }
 0x9d3   : > { %v2078_v48 = vpack.c.bf16 %v2077_v47, %v2076_v46 }
 0x9d5   : > { %5704 = vmatmul.mubr.msk.bf16.vlgmr.msra.gmra.mxu0 %vm2118_vm5, %v2078_v48 }
 0x9d6   : > { %5711 = vmatprep.mubr.msk.bf16.mxu0 %vm6313_vm0, %v6312_v1  ;;  %5708 = vmatpush3.bf16.msra.mxu0 %v6057_v40  ;;  %v6232_v40 = vld [vmem:[%s7826_s7 + $0x8] sm:$0xff] }
 0x9d7   : > { %5709 = vmatprep.subr.bf16.mxu0 %v6312_v1 }
 0x9da   : > { %5710 = vmatpush3.bf16.msra.mxu0 %v6058_v5 }
 0x9db   : > { %5721 = vmatprep.subr.bf16.mxu0 %v6312_v1 }
 0xa95   : > { %v2156_v51 = vpop.f32.mrf.mxu0 }
 0xa96   : > { %v2157_v52 = vadd.f32 %v5307_v50, %v2156_v51 }
 0xa97   : > { %v5705_v54 = vpop.f32.mrf.mxu0 }
 0xa98   : > { %v2163_v21 = vadd.f32 %v2157_v52, %v2006_v29 }
 0xa99   : > { %v2159_v55 = vpop.f32.mrf.mxu0 }
 0xa9a   : > { %v2160_v56 = vadd.f32 %v5307_v50, %v2159_v55  ;;  %v2167_v14 = vsel %vm897_vm1, %v2163_v21, 0.0 }
 0xa9b   : > { %2168 = vadd.xlane.f32.xlu0 %v2167_v14  ;;  %v5706_v57 = vpop.f32.mrf.mxu0 }
 0xa9c   : > { %v2164_v49 = vadd.f32 %v2160_v56, %v2007_v30  ;;  %v5320_v30 = vld [vmem:[%s7824_s29 + $0x1] ss:$0 sm:$0xff] }
 0xa9e   : > { %v2170_v58 = vsel %vm897_vm1, %v2164_v49, 0.0 }
 0xa9f   : > { %2171 = vadd.xlane.f32.xlu1 %v2170_v58 }
 0xb24   : > { %v2169_v53 = vpop.xlane.xlu0 %2168 }
 0xb25   : > { %v2173_v59 = vmul.f32 0.03125, %v2169_v53 }
 0xb27   : > { %v2175_v60 = vsub.f32 %v2163_v21, %v2173_v59 }
 0xb28   : > { %v2172_v61 = vpop.xlane.xlu1 %2171 }
 0xb29   : > { %v2174_v62 = vmul.f32 0.03125, %v2172_v61  ;;  %v2177_v63 = vmul.f32 %v2175_v60, %v2175_v60 }
 0xb2b   : > { %v2176_v0 = vsub.f32 %v2164_v49, %v2174_v62  ;;  %v2179_v2 = vsel %vm897_vm1, %v2177_v63, 0.0  ;;  %v6231_v62 = vld [vmem:[%s7826_s7] sm:$0xff] }
 0xb2c   : > { %2180 = vadd.xlane.f32.xlu0 %v2179_v2 }
 0xb2d   : > { %v2178_v6 = vmul.f32 %v2176_v0, %v2176_v0 }
 0xb2f   : > { %v2182_v7 = vsel %vm897_vm1, %v2178_v6, 0.0 }
 0xb30   : > { %2183 = vadd.xlane.f32.xlu1 %v2182_v7 }
 0xbb5   : > { %v2181_v8 = vpop.xlane.xlu0 %2180 }
 0xbb6   : > { %v2185_v45 = vmul.f32 0.03125, %v2181_v8 }
 0xbb8   : > { %v2187_v3 = vadd.f32 1e-05, %v2185_v45 }
 0xbb9   : > { %v2184_v9 = vpop.xlane.xlu1 %2183 }
 0xbba   : > { %6131 = vrsqrt.f32 %v2187_v3  ;;  %v2186_v11 = vmul.f32 0.03125, %v2184_v9 }
 0xbbc   : > { %v2188_v12 = vadd.f32 1e-05, %v2186_v11 }
 0xbbe   : > { %6133 = vrsqrt.f32 %v2188_v12 }
 0xbc7   : > { %v6132_v13 = vpop.eup %6131 }
 0xbc8   : > { %v2191_v15 = vmul.f32 %v6132_v13, %v2175_v60 }
 0xbca   : > { %v2199_v18 = vmul.f32 %v5313_v16, %v2191_v15 }
 0xbcb   : > { %v6134_v17 = vpop.eup %6133 }
 0xbcc   : > { %v2192_v19 = vmul.f32 %v6134_v17, %v2176_v0  ;;  %v6869_v24 = vadd.f32 %v5314_v20, %v2199_v18  ;;  %v6233_v17 = vld [vmem:[%s7826_s7 + $0x10] sm:$0xff] }
 0xbce   : > { %v2200_v22 = vmul.f32 %v5313_v16, %v2192_v19  ;;  %v6234_v19 = vld [vmem:[%s7826_s7 + $0x20] sm:$0xff] }
 0xbd0   : > { %v6871_v25 = vadd.f32 %v5314_v20, %v2200_v22 }
 0xbd2   : > { %v2209_v26 = vpack.c.bf16 %v6871_v25, %v6869_v24 }
 0xbd4   : > { %5712 = vmatmul.mubr.msk.bf16.vlgmr.msra.gmra.mxu0 %vm897_vm1, %v2209_v26 }
 0xbd5   : > { %5723 = vmatprep.mubr.msk.bf16.mxu0 %vm6313_vm0, %v6312_v1 }
 0xc94   : > { %v2272_v29 = vpop.f32.mrf.mxu0 }
 0xc95   : > { %v2273_v33 = vadd.f32 %v5320_v30, %v2272_v29 }
 0xc96   : > { %v5713_v31 = vpop.f32.mrf.mxu0 }
 0xc98   : > { %v2275_v32 = vpop.f32.mrf.mxu0 }
 0xc99   : > { %v2276_v28 = vadd.f32 %v5320_v30, %v2275_v32 }
 0xc9a   : > { %v5714_v34 = vpop.f32.mrf.mxu0 }
 0xc9b   : > { %v6010_v27 = vpack.i.bf16 %v2276_v28, %v2273_v33  ;;  %v6883_v35 = vpack.c.bf16 %v2276_v28, %v2273_v33  ;;  %v6235_v34 = vld [vmem:[%s7826_s7 + $0x18] sm:$0xff] }
 0xc9d   : > { %6011 = vrot.lane.b32.xlu1 %v6010_v27, %s7839_s30  ;;  %6006 = vrot.lane.b32.xlu0 %v6010_v27, %s7840_s9 }
 0xca1   : > { %6016 = vrot.lane.b32.xlu1 %v6010_v27, %s7841_s1  ;;  %2304 = vrot.lane.b32.xlu0 %v6883_v35, %s7842_s8 }
 0xd0f   : > { %v6012_v37 = vpop.permute.xlu1 %6011  ;;  %v6007_v38 = vpop.permute.xlu0 %6006 }
 0xd10   : > { %v6014_v41 = vunpack.i.h.bf16 %v6012_v37  ;;  %v6013_v43 = vunpack.i.l.bf16 %v6012_v37  ;;  %v6009_v44 = vunpack.i.h.bf16 %v6007_v38  ;;  %v6008_v46 = vunpack.i.l.bf16 %v6007_v38  ;;  %v6236_v37 = vld [vmem:[%s7826_s7 + $0x28] sm:$0xff] }
 0xd12   : > { %v6888_v47 = vpack.c.bf16 %v6014_v41, %v6013_v43  ;;  %v6890_v48 = vpack.c.bf16 %v6009_v44, %v6008_v46 }
 0xd13   : > { %v6017_v50 = vpop.permute.xlu1 %6016  ;;  %v2305_v51 = vpop.permute.xlu0 %2304 }
 0xd14   : > { %v6019_v52 = vunpack.i.h.bf16 %v6017_v50  ;;  %v6018_v54 = vunpack.i.l.bf16 %v6017_v50  ;;  %v2310_v21 = vsel %vm969_vm2, %v2305_v51, 0  ;;  %2354 = vrot.lane.b32.xlu1 %v6890_v48, %s7842_s8  ;;  %2404 = vrot.lane.b32.xlu0 %v6888_v47, %s7842_s8 }
 0xd15   : > { %5716 = vmatpush3.bf16.xpose.msra.mxu1 %v2310_v21 }
 0xd16   : > { %v6897_v55 = vpack.c.bf16 %v6019_v52, %v6018_v54  ;;  %5727 = vmatprep.subr.bf16.mxu1 %v6312_v1  ;;  %v6237_v52 = vld [vmem:[%s7826_s7 + $0x30] sm:$0xff] }
 0xd18   : > { %2454 = vrot.lane.b32.xlu1 %v6897_v55, %s7842_s8 }
 0xd1c   : > { %5718 = vmatmul.mubr.msk.bf16.vlgmr.msra.gmra.mxu1 %vm969_vm2, %v6883_v35 }
 0xd1d   : > { %5729 = vmatprep.mubr.msk.bf16.mxu1 %vm6313_vm0, %v6312_v1 }
 0xd86   : > { %v2355_v56 = vpop.permute.xlu1 %2354  ;;  %v2405_v14 = vpop.permute.xlu0 %2404 }
 0xd87   : > { %v2360_v57 = vsel %vm969_vm2, %v2355_v56, 0  ;;  %v2410_v49 = vsel %vm969_vm2, %v2405_v14, 0 }
 0xd88   : > { %5722 = vmatpush3.bf16.xpose.msra.mxu0 %v2360_v57  ;;  %5728 = vmatpush3.bf16.xpose.msra.mxu1 %v2410_v49 }
 0xd89   : > { %5733 = vmatprep.subr.bf16.mxu0 %v6312_v1  ;;  %5739 = vmatprep.subr.bf16.mxu1 %v6312_v1 }
 0xd8a   : > { %v2455_v58 = vpop.permute.xlu1 %2454 }
 0xd8b   : > { %v2460_v53 = vsel %vm969_vm2, %v2455_v58, 0 }
 0xd8f   : > { %5724 = vmatmul.mubr.msk.bf16.vlgmr.msra.gmra.mxu0 %vm969_vm2, %v6890_v48  ;;  %5730 = vmatmul.mubr.msk.bf16.vlgmr.msra.gmra.mxu1 %vm969_vm2, %v6888_v47 }
 0xd90   : > { %5734 = vmatpush3.bf16.xpose.msra.mxu0 %v2460_v53  ;;  %5735 = vmatprep.mubr.msk.bf16.mxu0 %vm6313_vm0, %v6312_v1  ;;  %v6238_v53 = vld [vmem:[%s7826_s7 + $0x38] sm:$0xff] }
 0xd91   : > { %5741 = vmatprep.mubr.msk.bf16.mxu1 %vm6313_vm0, %v6312_v1  ;;  %5745 = vmatprep.subr.bf16.mxu0 %v6312_v1 }
 0xd97   : > { %5736 = vmatmul.mubr.msk.bf16.vlgmr.msra.gmra.mxu0 %vm969_vm2, %v6897_v55 }
 0xd98   : > { %5747 = vmatprep.mubr.msk.bf16.mxu0 %vm6313_vm0, %v6312_v1 }
 0xddc   : > { %v2346_v59 = vpop.f32.mrf.mxu1 }
 0xddd   : > { %v2503_v60 = vmul.f32 0.35355338, %v2346_v59 }
 0xdde   : > { %v5719_v61 = vpop.f32.mrf.mxu1 }
 0xddf   : > { %v2511_v63 = vadd.f32 %v6231_v62, %v2503_v60 }
 0xde0   : > { %v2349_v0 = vpop.f32.mrf.mxu1 }
 0xde1   : > { %v2504_v2 = vmul.f32 0.35355338, %v2349_v0  ;;  %v6928_v6 = vsub.f32 %v2511_v63, %v6608_v42 }
 0xde2   : > { %v5720_v7 = vpop.f32.mrf.mxu1 }
 0xde3   : > { %v2512_v5 = vadd.f32 %v6232_v40, %v2504_v2  ;;  %v2527_v8 = vsel %vm1197_vm3, %v6928_v6, -inf }
 0xde4   : > { %2528 = vmax.xlane.f32.xlu0 %v2527_v8 }
 0xde5   : > { %v2520_v45 = vsub.f32 %v2512_v5, %v6608_v42 }
 0xde7   : > { %v2530_v3 = vsel %vm1197_vm3, %v2520_v45, -inf }
 0xde8   : > { %2531 = vmax.xlane.f32.xlu1 %v2530_v3 }
 0xe4f   : > { %v2396_v9 = vpop.f32.mrf.mxu0  ;;  %v2446_v11 = vpop.f32.mrf.mxu1 }
 0xe50   : > { %v2505_v12 = vmul.f32 0.35355338, %v2396_v9  ;;  %v2507_v13 = vmul.f32 0.35355338, %v2446_v11 }
 0xe51   : > { %v5725_v15 = vpop.f32.mrf.mxu0  ;;  %v5731_v16 = vpop.f32.mrf.mxu1 }
 0xe52   : > { %v2513_v18 = vadd.f32 %v6233_v17, %v2505_v12  ;;  %v2515_v20 = vadd.f32 %v6234_v19, %v2507_v13 }
 0xe53   : > { %v2399_v22 = vpop.f32.mrf.mxu0  ;;  %v2449_v26 = vpop.f32.mrf.mxu1 }
 0xe54   : > { %v2506_v29 = vmul.f32 0.35355338, %v2399_v22  ;;  %v2508_v30 = vmul.f32 0.35355338, %v2449_v26  ;;  %v2523_v31 = vsub.f32 %v2515_v20, %v6608_v42  ;;  %v2521_v32 = vsub.f32 %v2513_v18, %v6608_v42 }
 0xe55   : > { %v5726_v33 = vpop.f32.mrf.mxu0  ;;  %v5732_v28 = vpop.f32.mrf.mxu1 }
 0xe56   : > { %v2514_v27 = vadd.f32 %v6235_v34, %v2506_v29  ;;  %v2516_v38 = vadd.f32 %v6236_v37, %v2508_v30  ;;  %v2539_v41 = vsel %vm1197_vm3, %v2523_v31, -inf  ;;  %v2533_v43 = vsel %vm1197_vm3, %v2521_v32, -inf }
 0xe57   : > { %2540 = vmax.xlane.f32.xlu1 %v2539_v41  ;;  %2534 = vmax.xlane.f32.xlu0 %v2533_v43  ;;  %v2496_v44 = vpop.f32.mrf.mxu0 }
 0xe58   : > { %v2509_v46 = vmul.f32 0.35355338, %v2496_v44  ;;  %v2522_v50 = vsub.f32 %v2514_v27, %v6608_v42  ;;  %v2524_v56 = vsub.f32 %v2516_v38, %v6608_v42 }
 0xe59   : > { %v5737_v51 = vpop.f32.mrf.mxu0 }
 0xe5a   : > { %v2517_v54 = vadd.f32 %v6237_v52, %v2509_v46  ;;  %v2536_v21 = vsel %vm1197_vm3, %v2522_v50, -inf  ;;  %v2542_v60 = vsel %vm1197_vm3, %v2524_v56, -inf }
 0xe5b   : > { %2537 = vmax.xlane.f32.xlu0 %v2536_v21  ;;  %v2499_v14 = vpop.f32.mrf.mxu0 }
 0xe5c   : > { %v2510_v57 = vmul.f32 0.35355338, %v2499_v14  ;;  %v2525_v49 = vsub.f32 %v2517_v54, %v6608_v42 }
 0xe5d   : > { %v5738_v58 = vpop.f32.mrf.mxu0 }
 0xe5e   : > { %v2518_v59 = vadd.f32 %v6238_v53, %v2510_v57  ;;  %v2545_v61 = vsel %vm1197_vm3, %v2525_v49, -inf }
 0xe5f   : > { %2543 = vmax.xlane.f32.xlu0 %v2542_v60  ;;  %2546 = vmax.xlane.f32.xlu1 %v2545_v61 }
 0xe60   : > { %v2526_v62 = vsub.f32 %v2518_v59, %v6608_v42 }
 0xe62   : > { %v2548_v63 = vsel %vm1197_vm3, %v2526_v62, -inf }
 0xe63   : > { %2549 = vmax.xlane.f32.xlu0 %v2548_v63 }
 0xe6d   : > { %v2529_v40 = vpop.xlane.xlu0 %2528 }
 0xe6e   : > { %v2551_v5 = vsub.f32 %v6928_v6, %v2529_v40 }
 0xe70   : > { %2619 = vrot.lane.b32.xlu1 %v6883_v35, %s7843_s0  ;;  %v2559_v8 = vmul.f32 1.442695, %v2551_v5 }
 0xe71   : > { %v2532_v0 = vpop.xlane.xlu1 %2531 }
 0xe72   : > { %v2552_v2 = vsub.f32 %v2520_v45, %v2532_v0 }
 0xe74   : > { %v2561_v7 = vmul.f32 1.442695, %v2552_v2 }
 0xe76   : > { %6135 = vpow2.f32 %v2561_v7 }
 0xe77   : > { %6137 = vpow2.f32 %v2559_v8 }
 0xe83   : > { %v6136_v3 = vpop.eup %6135 }
 0xe84   : > { %v2578_v9 = vsel %vm1197_vm3, %v6136_v3, 0.0  ;;  %v6138_v11 = vpop.eup %6137 }
 0xe85   : > { %2579 = vadd.xlane.f32.xlu0 %v2578_v9  ;;  %v2575_v12 = vsel %vm1197_vm3, %v6138_v11, 0.0 }
 0xe94   : > { %2576 = vadd.xlane.f32.xlu1 %v2575_v12 }
 0xee0   : > { %v2541_v13 = vpop.xlane.xlu1 %2540  ;;  %v2535_v15 = vpop.xlane.xlu0 %2534 }
 0xee1   : > { %v2555_v35 = vsub.f32 %v2523_v31, %v2541_v13  ;;  %v2553_v16 = vsub.f32 %v2521_v32, %v2535_v15 }
 0xee3   : > { %v2563_v45 = vmul.f32 1.442695, %v2553_v16  ;;  %v2567_v17 = vmul.f32 1.442695, %v2555_v35 }
 0xee4   : > { %v2538_v18 = vpop.xlane.xlu0 %2537 }
 0xee5   : > { %v2554_v19 = vsub.f32 %v2522_v50, %v2538_v18  ;;  %6139 = vpow2.f32 %v2563_v45 }
 0xee6   : > { %6141 = vpow2.f32 %v2567_v17 }
 0xee7   : > { %v2565_v6 = vmul.f32 1.442695, %v2554_v19 }
 0xee8   : > { %v2544_v20 = vpop.xlane.xlu0 %2543  ;;  %v2547_v22 = vpop.xlane.xlu1 %2546 }
 0xee9   : > { %6143 = vpow2.f32 %v2565_v6  ;;  %v2556_v26 = vsub.f32 %v2524_v56, %v2544_v20  ;;  %v2557_v29 = vsub.f32 %v2525_v49, %v2547_v22  ;;  %v5333_v20 = vld [vmem:[%s7827_s12 + $0x14] sm:$0xf] }
 0xeea   : > { %v2867_v22 = vsel %vm1489_vm4, %v5333_v20, 0 }
 0xeeb   : > { %v2569_v30 = vmul.f32 1.442695, %v2556_v26  ;;  %v2571_v33 = vmul.f32 1.442695, %v2557_v29 }
 0xeec   : > { %v2620_v28 = vpop.permute.xlu1 %2619  ;;  %v2550_v34 = vpop.xlane.xlu0 %2549 }
 0xeed   : > { %6145 = vpow2.f32 %v2569_v30  ;;  %v2558_v27 = vsub.f32 %v2526_v62, %v2550_v34  ;;  %5740 = vmatpush3.bf16.msra.mxu1 %v2620_v28  ;;  %v5334_v30 = vld [vmem:[%s7827_s12 + $0x18] sm:$0xf] }
 0xeee   : > { %6147 = vpow2.f32 %v2571_v33  ;;  %5751 = vmatprep.subr.bf16.mxu1 %v6312_v1  ;;  %v2914_v34 = vsel %vm1489_vm4, %v5334_v30, 0 }
 0xeef   : > { %v2573_v31 = vmul.f32 1.442695, %v2558_v27 }
 0xef1   : > { %6149 = vpow2.f32 %v2573_v31 }
 0xef2   : > { %v6140_v32 = vpop.eup %6139 }
 0xef3   : > { %v2581_v37 = vsel %vm1197_vm3, %v6140_v32, 0.0  ;;  %v6142_v38 = vpop.eup %6141 }
 0xef4   : > { %2582 = vadd.xlane.f32.xlu1 %v2581_v37  ;;  %v2587_v44 = vsel %vm1197_vm3, %v6142_v38, 0.0  ;;  %v5335_v37 = vld [vmem:[%s7827_s12 + $0x1c] sm:$0xf] }
 0xef6   : > { %v6144_v41 = vpop.eup %6143 }
 0xef7   : > { %v2584_v43 = vsel %vm1197_vm3, %v6144_v41, 0.0 }
 0xef8   : > { %2585 = vadd.xlane.f32.xlu0 %v2584_v43  ;;  %2588 = vadd.xlane.f32.xlu1 %v2587_v44  ;;  %v2961_v44 = vsel %vm1489_vm4, %v5335_v37, 0 }
 0xefa   : > { %v6146_v46 = vpop.eup %6145 }
 0xefb   : > { %v6148_v50 = vpop.eup %6147  ;;  %v2590_v51 = vsel %vm1197_vm3, %v6146_v46, 0.0 }
 0xefc   : > { %v2593_v52 = vsel %vm1197_vm3, %v6148_v50, 0.0  ;;  %2591 = vadd.xlane.f32.xlu0 %v2590_v51 }
 0xefd   : > { %2594 = vadd.xlane.f32.xlu1 %v2593_v52 }
 0xefe   : > { %v6150_v54 = vpop.eup %6149 }
 0xeff   : > { %v2596_v21 = vsel %vm1197_vm3, %v6150_v54, 0.0 }
 0xf00   : > { %2597 = vadd.xlane.f32.xlu0 %v2596_v21 }
 0xf0e   : > { %2713 = vrot.lane.b32.xlu1 %v6888_v47, %s7843_s0  ;;  %v2580_v56 = vpop.xlane.xlu0 %2579 }
 0xf0f   : > { %6151 = vrcp.f32 %v2580_v56 }
 0xf12   : > { %2760 = vrot.lane.b32.xlu1 %v6897_v55, %s7843_s0 }
 0xf16   : > { %2666 = vrot.lane.b32.xlu0 %v6890_v48, %s7843_s0 }
 0xf1c   : > { %v6152_v57 = vpop.eup %6151 }
 0xf1d   : > { %v2577_v14 = vpop.xlane.xlu1 %2576  ;;  %v2608_v53 = vmul.f32 %v6152_v57, %v6136_v3 }
 0xf1e   : > { %6153 = vrcp.f32 %v2577_v14 }
 0xf2b   : > { %v6154_v49 = vpop.eup %6153 }
 0xf2c   : > { %v2607_v58 = vmul.f32 %v6154_v49, %v6138_v11  ;;  %v5332_v11 = vld [vmem:[%s7827_s12 + $0x10] sm:$0xf] }
 0xf2d   : > { %v2820_v45 = vsel %vm1489_vm4, %v5332_v11, 0 }
 0xf2e   : > { %v2615_v59 = vpack.c.bf16 %v2608_v53, %v2607_v58 }
 0xf30   : > { %5742 = vmatmul.mubr.msk.bf16.vlgmr.msra.gmra.mxu1 %vm1197_vm3, %v2615_v59 }
 0xf31   : > { %5753 = vmatprep.mubr.msk.bf16.mxu1 %vm6313_vm0, %v6312_v1 }
 0xf7d   : > { %v2583_v47 = vpop.xlane.xlu1 %2582 }
 0xf7e   : > { %6155 = vrcp.f32 %v2583_v47 }
 0xf81   : > { %v2586_v55 = vpop.xlane.xlu0 %2585  ;;  %v2589_v60 = vpop.xlane.xlu1 %2588 }
 0xf82   : > { %6157 = vrcp.f32 %v2586_v55 }
 0xf83   : > { %6159 = vrcp.f32 %v2589_v60 }
 0xf85   : > { %v2592_v48 = vpop.xlane.xlu0 %2591 }
 0xf86   : > { %v2595_v61 = vpop.xlane.xlu1 %2594  ;;  %6161 = vrcp.f32 %v2592_v48 }
 0xf87   : > { %6163 = vrcp.f32 %v2595_v61 }
 0xf89   : > { %v2598_v62 = vpop.xlane.xlu0 %2597 }
 0xf8a   : > { %v2714_v63 = vpop.permute.xlu1 %2713  ;;  %6165 = vrcp.f32 %v2598_v62 }
 0xf8b   : > { %5752 = vmatpush3.bf16.msra.mxu1 %v2714_v63  ;;  %v6156_v0 = vpop.eup %6155 }
 0xf8c   : > { %5763 = vmatprep.subr.bf16.mxu1 %v6312_v1  ;;  %v2609_v40 = vmul.f32 %v6156_v0, %v6140_v32 }
 0xf8d   : > { %v2667_v2 = vpop.permute.xlu0 %2666 }
 0xf8e   : > { %5746 = vmatpush3.bf16.msra.mxu0 %v2667_v2  ;;  %v2761_v12 = vpop.permute.xlu1 %2760 }
 0xf8f   : > { %v6158_v7 = vpop.eup %6157  ;;  %5757 = vmatprep.subr.bf16.mxu0 %v6312_v1 }
 0xf90   : > { %v2610_v5 = vmul.f32 %v6158_v7, %v6144_v41  ;;  %v6160_v8 = vpop.eup %6159 }
 0xf91   : > { %v2611_v13 = vmul.f32 %v6160_v8, %v6142_v38 }
 0xf92   : > { %v2616_v3 = vpack.c.bf16 %v2610_v5, %v2609_v40 }
 0xf93   : > { %v6162_v9 = vpop.eup %6161 }
 0xf94   : > { %5748 = vmatmul.mubr.msk.bf16.vlgmr.msra.gmra.mxu0 %vm1197_vm3, %v2616_v3  ;;  %v2612_v15 = vmul.f32 %v6162_v9, %v6146_v46  ;;  %v6164_v35 = vpop.eup %6163 }
 0xf95   : > { %5758 = vmatpush3.bf16.msra.mxu0 %v2761_v12  ;;  %5759 = vmatprep.mubr.msk.bf16.mxu0 %vm6313_vm0, %v6312_v1  ;;  %v2613_v18 = vmul.f32 %v6164_v35, %v6148_v50 }
 0xf96   : > { %v2617_v16 = vpack.c.bf16 %v2612_v15, %v2611_v13  ;;  %5769 = vmatprep.subr.bf16.mxu0 %v6312_v1  ;;  %v5341_v13 = vld [vmem:[%s7828_s11 + $0x1] ss:$0 sm:$0xff] }
 0xf97   : > { %v6166_v17 = vpop.eup %6165 }
 0xf98   : > { %5754 = vmatmul.mubr.msk.bf16.vlgmr.msra.gmra.mxu1 %vm1197_vm3, %v2617_v16  ;;  %v2614_v19 = vmul.f32 %v6166_v17, %v6150_v54 }
 0xf99   : > { %5764 = vmatpush3.bf16.msra.mxu1 %v2820_v45  ;;  %5765 = vmatprep.mubr.msk.bf16.mxu1 %vm6313_vm0, %v6312_v1 }
 0xf9a   : > { %v2618_v6 = vpack.c.bf16 %v2614_v19, %v2613_v18  ;;  %5775 = vmatprep.subr.bf16.mxu1 %v6312_v1 }
 0xf9c   : > { %5760 = vmatmul.mubr.msk.bf16.vlgmr.msra.gmra.mxu0 %vm1197_vm3, %v2618_v6 }
 0xf9d   : > { %5771 = vmatprep.mubr.msk.bf16.mxu0 %vm6313_vm0, %v6312_v1  ;;  %5770 = vmatpush3.bf16.msra.mxu0 %v2867_v22 }
 0xf9e   : > { %5781 = vmatprep.subr.bf16.mxu0 %v6312_v1 }
 0xff0   : > { %v2659_v26 = vpop.f32.mrf.mxu1 }
 0xff2   : > { %v5743_v29 = vpop.f32.mrf.mxu1 }
 0xff4   : > { %v2662_v33 = vpop.f32.mrf.mxu1 }
 0xff5   : > { %v2807_v28 = vpack.c.bf16 %v2662_v33, %v2659_v26 }
 0xff6   : > { %v5744_v27 = vpop.f32.mrf.mxu1 }
 0xff7   : > { %5766 = vmatmul.mubr.msk.bf16.vlgmr.msra.gmra.mxu1 %vm969_vm2, %v2807_v28 }
 0xff8   : > { %5776 = vmatpush3.bf16.msra.mxu1 %v2914_v34  ;;  %5777 = vmatprep.mubr.msk.bf16.mxu1 %vm6313_vm0, %v6312_v1 }
 0xff9   : > { %3224 = vmatprep.subr.bf16.mxu1 %v6319_v10 }
0x1054   : > { %v2706_v31 = vpop.f32.mrf.mxu0 }
0x1056   : > { %v5749_v32 = vpop.f32.mrf.mxu0 }
0x1058   : > { %v2709_v38 = vpop.f32.mrf.mxu0  ;;  %v2753_v41 = vpop.f32.mrf.mxu1 }
0x1059   : > { %v2808_v43 = vpack.c.bf16 %v2709_v38, %v2706_v31 }
0x105a   : > { %v5750_v46 = vpop.f32.mrf.mxu0  ;;  %v5755_v50 = vpop.f32.mrf.mxu1 }
0x105b   : > { %5772 = vmatmul.mubr.msk.bf16.vlgmr.msra.gmra.mxu0 %vm969_vm2, %v2808_v43 }
0x105c   : > { %v2756_v51 = vpop.f32.mrf.mxu1  ;;  %v2800_v52 = vpop.f32.mrf.mxu0  ;;  %5782 = vmatpush3.bf16.msra.mxu0 %v2961_v44  ;;  %5783 = vmatprep.mubr.msk.bf16.mxu0 %vm6313_vm0, %v6312_v1 }
0x105d   : > { %v2809_v54 = vpack.c.bf16 %v2756_v51, %v2753_v41  ;;  %5787 = vmatprep.subr.bf16.mxu0 %v6312_v1 }
0x105e   : > { %v5756_v21 = vpop.f32.mrf.mxu1  ;;  %v5761_v56 = vpop.f32.mrf.mxu0 }
0x105f   : > { %5778 = vmatmul.mubr.msk.bf16.vlgmr.msra.gmra.mxu1 %vm969_vm2, %v2809_v54 }
0x1060   : > { %v2803_v14 = vpop.f32.mrf.mxu0  ;;  %5351 = vmatprep.mubr.msk.bf16.mxu1 %vm1197_vm3, %v6729_v4 }
0x1061   : > { %v2810_v57 = vpack.c.bf16 %v2803_v14, %v2800_v52  ;;  %v5346_v52 = vld [vmem:[%s7831_s28 + $0x10] sm:$0xff] }
0x1062   : > { %v5762_v49 = vpop.f32.mrf.mxu0  ;;  %v3081_v14 = vcombine.high %v5346_v52, %v5346_v52 }
0x1063   : > { %5784 = vmatmul.mubr.msk.bf16.vlgmr.msra.gmra.mxu0 %vm969_vm2, %v2810_v57 }
0x1064   : > { %5791 = vmatprep.mubr.msk.bf16.mxu0 %vm6313_vm0, %v6312_v1  ;;  %v3095_v49 = vrot.slane %v3081_v14, %v6737_v23 }
0x10b7   : > { %v2856_v58 = vpop.f32.mrf.mxu1 }
0x10b8   : > { %v3004_v63 = vsel %vm897_vm1, %v2856_v58, 0.0  ;;  %v3097_v58 = vcombine.high %v3095_v49, %v3095_v49 }
0x10b9   : > { %v5767_v53 = vpop.f32.mrf.mxu1 }
0x10ba   : > { %v3125_v53 = vrot.slane %v3097_v58, %v6737_v23 }
0x10bb   : > { %v2859_v59 = vpop.f32.mrf.mxu1 }
0x10bc   : > { %v3011_v9 = vsel %vm897_vm1, %v2859_v59, 0.0 }
0x10bd   : > { %v5768_v47 = vpop.f32.mrf.mxu1 }
0x10be   : > { %v5344_v47 = vld [vmem:[%s7832_s10 + $0x1] ss:$0 sm:$0xff] }
0x111b   : > { %v2903_v55 = vpop.f32.mrf.mxu0 }
0x111c   : > { %v3005_v48 = vsel %vm897_vm1, %v2903_v55, 0.0 }
0x111d   : > { %v5773_v60 = vpop.f32.mrf.mxu0  ;;  %v3006_v0 = vadd.f32 %v3005_v48, %v3004_v63  ;;  %v3129_v48 = vcombine.high %v3125_v53, %v3125_v53  ;;  %v5345_v63 = vld [vmem:[%s7834_s2 + $0x1] ss:$0 sm:$0xff] }
0x111f   : > { %v2906_v61 = vpop.f32.mrf.mxu0  ;;  %v2950_v62 = vpop.f32.mrf.mxu1 }
0x1120   : > { %v3007_v4 = vsel %vm897_vm1, %v2950_v62, 0.0  ;;  %v3012_v40 = vsel %vm897_vm1, %v2906_v61, 0.0  ;;  %v3111_v61 = vrot.slane %v3095_v49, %v6737_v23 }
0x1121   : > { %v5774_v2 = vpop.f32.mrf.mxu0  ;;  %v5779_v7 = vpop.f32.mrf.mxu1  ;;  %v3008_v5 = vadd.f32 %v3007_v4, %v3006_v0  ;;  %v3013_v15 = vadd.f32 %v3012_v40, %v3011_v9  ;;  %v3088_v0 = vrot.slane %v5346_v52, %v6737_v23  ;;  %v3175_v40 = vrot.slane %v3129_v48, %v6602_v39 }
0x1123   : > { %v2953_v8 = vpop.f32.mrf.mxu1  ;;  %v2997_v3 = vpop.f32.mrf.mxu0 }
0x1124   : > { %v3014_v11 = vsel %vm897_vm1, %v2953_v8, 0.0  ;;  %v3009_v12 = vsel %vm897_vm1, %v2997_v3, 0.0 }
0x1125   : > { %v3010_v35 = vadd.f32 %v3009_v12, %v3008_v5  ;;  %v5780_v16 = vpop.f32.mrf.mxu1  ;;  %v5785_v45 = vpop.f32.mrf.mxu0  ;;  %v3015_v17 = vadd.f32 %v3014_v11, %v3013_v15  ;;  %v3127_v5 = vcombine.high %v3111_v61, %v3111_v61  ;;  %v3096_v12 = vcombine.high %v3088_v0, %v3088_v0 }
0x1126   : > { %v3167_v16 = vrot.slane %v3125_v53, %v6602_v39 }
0x1127   : > { %v3026_v18 = vadd.f32 %v5341_v13, %v3010_v35  ;;  %v3000_v19 = vpop.f32.mrf.mxu0  ;;  %v3171_v11 = vrot.slane %v3127_v5, %v6602_v39  ;;  %v3118_v45 = vrot.slane %v3096_v12, %v6737_v23 }
0x1128   : > { %v3016_v6 = vsel %vm897_vm1, %v3000_v19, 0.0 }
0x1129   : > { %v3017_v20 = vadd.f32 %v3016_v6, %v3015_v17  ;;  %v5786_v22 = vpop.f32.mrf.mxu0  ;;  %v3028_v26 = vadd.f32 %v3026_v18, %v6869_v24  ;;  %v3163_v6 = vrot.slane %v3111_v61, %v6602_v39 }
0x112a   : > { %v3104_v22 = vrot.slane %v3088_v0, %v6737_v23 }
0x112b   : > { %v3027_v29 = vadd.f32 %v5341_v13, %v3017_v20  ;;  %v3034_v30 = vsel %vm897_vm1, %v3028_v26, 0.0  ;;  %v3128_v20 = vcombine.high %v3118_v45, %v3118_v45 }
0x112c   : > { %3035 = vadd.xlane.f32.xlu0 %v3034_v30  ;;  %v3147_v52 = vrot.slane %v3104_v22, %v6602_v39 }
0x112d   : > { %v3029_v33 = vadd.f32 %v3027_v29, %v6871_v25 }
0x112f   : > { %v3037_v28 = vsel %vm897_vm1, %v3029_v33, 0.0 }
0x1130   : > { %3038 = vadd.xlane.f32.xlu1 %v3037_v28  ;;  %v3126_v28 = vcombine.high %v3104_v22, %v3104_v22 }
0x11b5   : > { %v3036_v34 = vpop.xlane.xlu0 %3035 }
0x11b6   : > { %v3040_v27 = vmul.f32 0.03125, %v3036_v34 }
0x11b8   : > { %v3042_v31 = vsub.f32 %v3028_v26, %v3040_v27 }
0x11b9   : > { %v3039_v32 = vpop.xlane.xlu1 %3038 }
0x11ba   : > { %v3041_v37 = vmul.f32 0.03125, %v3039_v32  ;;  %v3044_v38 = vmul.f32 %v3042_v31, %v3042_v31  ;;  %v3155_v32 = vrot.slane %v3126_v28, %v6602_v39 }
0x11bc   : > { %v3043_v41 = vsub.f32 %v3029_v33, %v3041_v37  ;;  %v3046_v43 = vsel %vm897_vm1, %v3044_v38, 0.0  ;;  %v3159_v33 = vrot.slane %v3128_v20, %v6602_v39 }
0x11bd   : > { %3047 = vadd.xlane.f32.xlu0 %v3046_v43  ;;  %v3151_v43 = vrot.slane %v3118_v45, %v6602_v39 }
0x11be   : > { %v3045_v44 = vmul.f32 %v3043_v41, %v3043_v41 }
0x11c0   : > { %v3049_v46 = vsel %vm897_vm1, %v3045_v44, 0.0  ;;  %v5348_v44 = vld.sshfl [vmem:[%s7831_s28 + $0x18] sm:$0x1 pattern:$0x75316420] }
0x11c1   : > { %3050 = vadd.xlane.f32.xlu0 %v3049_v46 }
0x1246   : > { %v3048_v50 = vpop.xlane.xlu0 %3047 }
0x1247   : > { %v3052_v51 = vmul.f32 0.03125, %v3048_v50 }
0x1249   : > { %v3054_v54 = vadd.f32 1e-05, %v3052_v51 }
0x124a   : > { %v3051_v21 = vpop.xlane.xlu0 %3050 }
0x124b   : > { %6167 = vrsqrt.f32 %v3054_v54  ;;  %v3053_v56 = vmul.f32 0.03125, %v3051_v21  ;;  %v3143_v54 = vrot.slane %v5348_v44, %v6737_v23 }
0x124d   : > { %v3055_v57 = vadd.f32 1e-05, %v3053_v56 }
0x124f   : > { %6169 = vrsqrt.f32 %v3055_v57  ;;  %v3179_v57 = vrot.slane %v3143_v54, %v6602_v39 }
0x1258   : > { %v6168_v59 = vpop.eup %6167 }
0x1259   : > { %v3058_v55 = vmul.f32 %v6168_v59, %v3042_v31 }
0x125b   : > { %v3066_v60 = vmul.f32 %v5344_v47, %v3058_v55  ;;  %v5350_v55 = vld [vmem:[%s7836_s27 + $0x1] ss:$0 sm:$0xff] }
0x125c   : > { %v6170_v62 = vpop.eup %6169 }
0x125d   : > { %v3059_v4 = vmul.f32 %v6170_v62, %v3043_v41  ;;  %v7062_v2 = vadd.f32 %v5345_v63, %v3066_v60 }
0x125f   : > { %v3067_v7 = vmul.f32 %v5344_v47, %v3059_v4  ;;  %v3203_v3 = vmul.f32 %v3175_v40, %v7062_v2  ;;  %v3201_v35 = vmul.f32 %v3171_v11, %v7062_v2  ;;  %v3199_v19 = vmul.f32 %v3167_v16, %v7062_v2  ;;  %v6239_v47 = vld [vmem:[%s7829_s6] ss:$8 sps:$4 sm:$0xff]  }
0x1260   : > { %v3197_v30 = vmul.f32 %v3163_v6, %v7062_v2  ;;  %v3195_v31 = vmul.f32 %v3159_v33, %v7062_v2  ;;  %v3193_v41 = vmul.f32 %v3155_v32, %v7062_v2  ;;  %v3191_v51 = vmul.f32 %v3151_v43, %v7062_v2 }
0x1261   : > { %v7065_v8 = vadd.f32 %v5345_v63, %v3067_v7  ;;  %v3189_v14 = vmul.f32 %v3147_v52, %v7062_v2  ;;  %v3205_v53 = vmul.f32 %v3179_v57, %v7062_v2 }
0x1263   : > { %v3204_v9 = vmul.f32 %v3175_v40, %v7065_v8  ;;  %v3202_v15 = vmul.f32 %v3171_v11, %v7065_v8  ;;  %v3200_v18 = vmul.f32 %v3167_v16, %v7065_v8  ;;  %v3198_v29 = vmul.f32 %v3163_v6, %v7065_v8 }
0x1264   : > { %v3196_v27 = vmul.f32 %v3159_v33, %v7065_v8  ;;  %v3194_v38 = vmul.f32 %v3155_v32, %v7065_v8  ;;  %v3192_v50 = vmul.f32 %v3151_v43, %v7065_v8  ;;  %v3190_v56 = vmul.f32 %v3147_v52, %v7065_v8  ;;  %v6061_v43 = vld [vmem:[%s7730_s14 + $0x10] sm:$0xff]  }
0x1265   : > { %v3214_v13 = vpack.c.bf16 %v3204_v9, %v3203_v3  ;;  %v3213_v17 = vpack.c.bf16 %v3202_v15, %v3201_v35  ;;  %v3212_v26 = vpack.c.bf16 %v3200_v18, %v3199_v19  ;;  %v3211_v34 = vpack.c.bf16 %v3198_v29, %v3197_v30 }
0x1266   : > { %v3210_v37 = vpack.c.bf16 %v3196_v27, %v3195_v31  ;;  %v3209_v46 = vpack.c.bf16 %v3194_v38, %v3193_v41  ;;  %v3208_v21 = vpack.c.bf16 %v3192_v50, %v3191_v51  ;;  %v3207_v49 = vpack.c.bf16 %v3190_v56, %v3189_v14  ;;  %v5354_v14 = vld [vmem:[%s7838_s3 + $0x1] ss:$0 sm:$0xff] }
0x1267   : > { %3225 = vmatpush1.bf16.msra.mxu1 %v3214_v13  ;;  %v3206_v58 = vmul.f32 %v3179_v57, %v7065_v8 }
0x1268   : > { %3226 = vmatprep.subr.bf16.mxu1 %v6319_v10 }
0x1269   : > { %v3215_v59 = vpack.c.bf16 %v3206_v58, %v3205_v53  ;;  %v5355_v53 = vld [vmem:[%s7729_s13 + $0x1] ss:$0 sm:$0xff] }
0x126b   : > { %3227 = vmatpush1.bf16.msra.mxu1 %v3213_v17 }
0x126c   : > { %3228 = vmatprep.subr.bf16.mxu1 %v6319_v10 }
0x126f   : > { %3229 = vmatpush1.bf16.msra.mxu1 %v3212_v26 }
0x1270   : > { %3230 = vmatprep.subr.bf16.mxu1 %v6319_v10 }
0x1273   : > { %3231 = vmatpush1.bf16.msra.mxu1 %v3211_v34 }
0x1274   : > { %3232 = vmatprep.subr.bf16.mxu1 %v6319_v10 }
0x1277   : > { %3233 = vmatpush1.bf16.msra.mxu1 %v3210_v37 }
0x1278   : > { %3234 = vmatprep.subr.bf16.mxu1 %v6319_v10 }
0x127b   : > { %3235 = vmatpush1.bf16.msra.mxu1 %v3209_v46 }
0x127c   : > { %3236 = vmatprep.subr.bf16.mxu1 %v6319_v10 }
0x127f   : > { %3237 = vmatpush1.bf16.msra.mxu1 %v3208_v21 }
0x1280   : > { %3238 = vmatprep.subr.bf16.mxu1 %v6319_v10 }
0x1283   : > { %3239 = vmatpush1.bf16.msra.mxu1 %v3207_v49 }
0x1284   : > { %3254 = vmatprep.subr.bf16.mxu1 %v6319_v10 }
0x1287   : > { %3255 = vmatpush2.bf16.msra.mxu1 %v3215_v59 }
0x1288   : > { %5821 = vmatprep.subr.bf16.mxu1 %v6312_v1 }
0x128a   : > { %3257 = vmatmul.mubr.bf16.vlgmr.msra.gmra.mxu1 %v6239_v47 }
0x128b   : > { %5823 = vmatprep.mubr.msk.bf16.mxu1 %vm6313_vm0, %v6312_v1 }
0x134a   : > { %v3258_v60 = vpop.f32.mrf.mxu1 }
0x134b   : > { %v3259_v48 = vadd.f32 %v5350_v55, %v3258_v60  ;;  %v6062_v60 = vld [vmem:[%s7732_s16 + $0x38] sm:$0xff]  }
0x134c   : > { %v3260_v61 = vpop.f32.mrf.mxu1 }
0x134d   : > { %v3267_v62 = vmul.f32 0.044715, %v3259_v48  ;;  %v3265_v16 = vmul.f32 0.5, %v3259_v48  ;;  %v6063_v61 = vld [vmem:[%s7732_s16 + $0x30] sm:$0xff]  }
0x134e   : > { %v3261_v63 = vpop.f32.mrf.mxu1 }
0x134f   : > { %v3269_v4 = vmul.f32 %v3267_v62, %v3259_v48  ;;  %v3262_v0 = vadd.f32 %v5350_v55, %v3261_v63  ;;  %v6064_v62 = vld [vmem:[%s7732_s16 + $0x28] sm:$0xff]   ;;  %v6065_v63 = vld [vmem:[%s7732_s16 + $0x20] sm:$0xff]  }
0x1350   : > { %v3263_v7 = vpop.f32.mrf.mxu1 }
0x1351   : > { %v3268_v40 = vmul.f32 0.044715, %v3262_v0  ;;  %v3271_v5 = vmul.f32 %v3269_v4, %v3259_v48  ;;  %v3266_v6 = vmul.f32 0.5, %v3262_v0  ;;  %v5361_v4 = vld [vmem:[%s7731_s15 + $0x1] ss:$0 sm:$0xff] }
0x1353   : > { %v3270_v3 = vmul.f32 %v3268_v40, %v3262_v0  ;;  %v3273_v9 = vadd.f32 %v3271_v5, %v3259_v48 }
0x1355   : > { %v3275_v11 = vmul.f32 0.7978846, %v3273_v9  ;;  %v3272_v12 = vmul.f32 %v3270_v3, %v3262_v0 }
0x1357   : > { %6171 = vtanh.f32 %v3275_v11  ;;  %v3274_v13 = vadd.f32 %v3272_v12, %v3262_v0 }
0x1359   : > { %v3276_v15 = vmul.f32 0.7978846, %v3274_v13 }
0x135b   : > { %6173 = vtanh.f32 %v3276_v15  ;;  %v5374_v15 = vld [vmem:[%s7733_s17 + $0x1] ss:$0 sm:$0xff] }
0x1364   : > { %v6172_v35 = vpop.eup %6171 }
0x1365   : > { %v3279_v45 = vadd.f32 1.0, %v6172_v35 }
0x1367   : > { %v3281_v17 = vmul.f32 %v3279_v45, %v3265_v16 }
0x1368   : > { %v6174_v18 = vpop.eup %6173 }
0x1369   : > { %v3283_v19 = vadd.f32 %v3281_v17, %v7062_v2  ;;  %v3280_v20 = vadd.f32 1.0, %v6174_v18 }
0x136b   : > { %v3289_v22 = vsel %vm897_vm1, %v3283_v19, 0.0  ;;  %v3282_v26 = vmul.f32 %v3280_v20, %v3266_v6 }
0x136c   : > { %3290 = vadd.xlane.f32.xlu1 %v3289_v22 }
0x136d   : > { %v3284_v29 = vadd.f32 %v3282_v26, %v7065_v8  ;;  %v6060_v8 = vld [vmem:[%s7730_s14 + $0x18] sm:$0xff]  }
0x136e   : > { %5788 = vmatpush3.bf16.msra.mxu0 %v6060_v8 }
0x136f   : > { %v3292_v30 = vsel %vm897_vm1, %v3284_v29, 0.0  ;;  %5789 = vmatprep.subr.bf16.mxu0 %v6312_v1 }
0x1370   : > { %3293 = vadd.xlane.f32.xlu0 %v3292_v30 }
0x1372   : > { %5790 = vmatpush3.bf16.msra.mxu0 %v6061_v43 }
0x1373   : > { %5795 = vmatprep.subr.bf16.mxu0 %v6312_v1 }
0x13f5   : > { %v3291_v33 = vpop.xlane.xlu1 %3290 }
0x13f6   : > { %v3295_v28 = vmul.f32 0.03125, %v3291_v33 }
0x13f8   : > { %v3297_v34 = vsub.f32 %v3283_v19, %v3295_v28 }
0x13f9   : > { %v3294_v27 = vpop.xlane.xlu0 %3293 }
0x13fa   : > { %v3296_v31 = vmul.f32 0.03125, %v3294_v27  ;;  %v3299_v32 = vmul.f32 %v3297_v34, %v3297_v34 }
0x13fc   : > { %v3298_v37 = vsub.f32 %v3284_v29, %v3296_v31  ;;  %v3301_v2 = vsel %vm897_vm1, %v3299_v32, 0.0 }
0x13fd   : > { %3302 = vadd.xlane.f32.xlu1 %v3301_v2 }
0x13fe   : > { %v3300_v38 = vmul.f32 %v3298_v37, %v3298_v37 }
0x1400   : > { %v3304_v41 = vsel %vm897_vm1, %v3300_v38, 0.0  ;;  %v6066_v38 = vld [vmem:[%s7822_s4 + $0x28] sm:$0xff]  }
0x1401   : > { %3305 = vadd.xlane.f32.xlu0 %v3304_v41  ;;  %v6067_v41 = vld [vmem:[%s7822_s4 + $0x20] sm:$0xff]  }
0x1486   : > { %v3303_v44 = vpop.xlane.xlu1 %3302 }
0x1487   : > { %v3307_v46 = vmul.f32 0.03125, %v3303_v44 }
0x1489   : > { %v3309_v50 = vadd.f32 1e-05, %v3307_v46 }
0x148a   : > { %v3306_v51 = vpop.xlane.xlu0 %3305 }
0x148b   : > { %6175 = vrsqrt.f32 %v3309_v50  ;;  %v3308_v52 = vmul.f32 0.03125, %v3306_v51 }
0x148d   : > { %v3310_v54 = vadd.f32 1e-05, %v3308_v52 }
0x148f   : > { %6177 = vrsqrt.f32 %v3310_v54 }
0x1498   : > { %v6176_v21 = vpop.eup %6175 }
0x1499   : > { %v3313_v56 = vmul.f32 %v6176_v21, %v3297_v34  ;;  %v5382_v21 = vld [vmem:[%s7734_s18 + $0x1] ss:$0 sm:$0xff] }
0x149b   : > { %v3321_v58 = vmul.f32 %v5354_v14, %v3313_v56 }
0x149c   : > { %v6178_v57 = vpop.eup %6177 }
0x149d   : > { %v3314_v49 = vmul.f32 %v6178_v57, %v3298_v37  ;;  %v3329_v47 = vadd.f32 %v5355_v53, %v3321_v58 }
0x149f   : > { %v3322_v59 = vmul.f32 %v5354_v14, %v3314_v49  ;;  %v5383_v49 = vld [vmem:[%s7735_s19 + $0x1] ss:$0 sm:$0xff] }
0x14a1   : > { %v3330_v55 = vadd.f32 %v5355_v53, %v3322_v59 }
0x14a3   : > { %v3331_v48 = vpack.c.bf16 %v3330_v55, %v3329_v47 }
0x14a5   : > { %5792 = vmatmul.mubr.msk.bf16.vlgmr.msra.gmra.mxu0 %vm897_vm1, %v3331_v48 }
0x14a6   : > { %5796 = vmatpush3.bf16.msra.mxu0 %v6062_v60  ;;  %5803 = vmatprep.mubr.msk.bf16.mxu0 %vm6313_vm0, %v6312_v1  ;;  %v5389_v60 = vld [vmem:[%s7824_s29 + $0x2] ss:$0 sm:$0xff] }
0x14a7   : > { %5797 = vmatprep.subr.bf16.mxu0 %v6312_v1 }
0x14aa   : > { %5798 = vmatpush3.bf16.msra.mxu0 %v6063_v61 }
0x14ab   : > { %5799 = vmatprep.subr.bf16.mxu0 %v6312_v1 }
0x14ae   : > { %5800 = vmatpush3.bf16.msra.mxu0 %v6064_v62 }
0x14af   : > { %5801 = vmatprep.subr.bf16.mxu0 %v6312_v1 }
0x14b2   : > { %5802 = vmatpush3.bf16.msra.mxu0 %v6065_v63 }
0x14b3   : > { %5807 = vmatprep.subr.bf16.mxu0 %v6312_v1 }
0x1565   : > { %v3394_v0 = vpop.f32.mrf.mxu0 }
0x1566   : > { %v3395_v40 = vadd.f32 %v5361_v4, %v3394_v0 }
0x1567   : > { %v5793_v7 = vpop.f32.mrf.mxu0 }
0x1568   : > { %v3401_v11 = vmax.f32 %v3395_v40, 0.0 }
0x1569   : > { %v3397_v5 = vpop.f32.mrf.mxu0 }
0x156a   : > { %v3398_v3 = vadd.f32 %v5361_v4, %v3397_v5 }
0x156b   : > { %v5794_v9 = vpop.f32.mrf.mxu0 }
0x156c   : > { %v3402_v12 = vmax.f32 %v3398_v3, 0.0 }
0x156e   : > { %v3403_v13 = vpack.c.bf16 %v3402_v12, %v3401_v11 }
0x1570   : > { %5804 = vmatmul.mubr.msk.bf16.vlgmr.msra.gmra.mxu0 %vm2118_vm5, %v3403_v13 }
0x1571   : > { %5811 = vmatprep.mubr.msk.bf16.mxu0 %vm6313_vm0, %v6312_v1  ;;  %5808 = vmatpush3.bf16.msra.mxu0 %v6066_v38 }
0x1572   : > { %5809 = vmatprep.subr.bf16.mxu0 %v6312_v1 }
0x1575   : > { %5810 = vmatpush3.bf16.msra.mxu0 %v6067_v41  ;;  %v6241_v41 = vld [vmem:[%s7826_s7 + $0x8] sm:$0xff] }
0x1576   : > { %5815 = vmatprep.subr.bf16.mxu0 %v6312_v1 }
0x1630   : > { %v3482_v35 = vpop.f32.mrf.mxu0 }
0x1631   : > { %v3483_v16 = vadd.f32 %v5374_v15, %v3482_v35 }
0x1632   : > { %v5805_v45 = vpop.f32.mrf.mxu0 }
0x1633   : > { %v3489_v17 = vadd.f32 %v3483_v16, %v3329_v47 }
0x1634   : > { %v3485_v18 = vpop.f32.mrf.mxu0 }
0x1635   : > { %v3486_v19 = vadd.f32 %v5374_v15, %v3485_v18  ;;  %v3495_v6 = vsel %vm897_vm1, %v3489_v17, 0.0 }
0x1636   : > { %3496 = vadd.xlane.f32.xlu1 %v3495_v6  ;;  %v5806_v20 = vpop.f32.mrf.mxu0 }
0x1637   : > { %v3490_v22 = vadd.f32 %v3486_v19, %v3330_v55 }
0x1639   : > { %v3498_v26 = vsel %vm897_vm1, %v3490_v22, 0.0 }
0x163a   : > { %3499 = vadd.xlane.f32.xlu0 %v3498_v26 }
0x16bf   : > { %v3497_v29 = vpop.xlane.xlu1 %3496 }
0x16c0   : > { %v3501_v30 = vmul.f32 0.03125, %v3497_v29 }
0x16c2   : > { %v3503_v33 = vsub.f32 %v3489_v17, %v3501_v30 }
0x16c3   : > { %v3500_v28 = vpop.xlane.xlu0 %3499 }
0x16c4   : > { %v3502_v34 = vmul.f32 0.03125, %v3500_v28  ;;  %v3505_v27 = vmul.f32 %v3503_v33, %v3503_v33 }
0x16c6   : > { %v3504_v31 = vsub.f32 %v3490_v22, %v3502_v34  ;;  %v3507_v32 = vsel %vm897_vm1, %v3505_v27, 0.0  ;;  %v6240_v27 = vld [vmem:[%s7826_s7] sm:$0xff] }
0x16c7   : > { %3508 = vadd.xlane.f32.xlu1 %v3507_v32 }
0x16c8   : > { %v3506_v37 = vmul.f32 %v3504_v31, %v3504_v31 }
0x16ca   : > { %v3510_v2 = vsel %vm897_vm1, %v3506_v37, 0.0 }
0x16cb   : > { %3511 = vadd.xlane.f32.xlu0 %v3510_v2 }
0x1750   : > { %v3509_v8 = vpop.xlane.xlu1 %3508 }
0x1751   : > { %v3513_v43 = vmul.f32 0.03125, %v3509_v8 }
0x1753   : > { %v3515_v44 = vadd.f32 1e-05, %v3513_v43 }
0x1754   : > { %v3512_v46 = vpop.xlane.xlu0 %3511 }
0x1755   : > { %6179 = vrsqrt.f32 %v3515_v44  ;;  %v3514_v50 = vmul.f32 0.03125, %v3512_v46 }
0x1757   : > { %v3516_v51 = vadd.f32 1e-05, %v3514_v50 }
0x1759   : > { %6181 = vrsqrt.f32 %v3516_v51 }
0x1762   : > { %v6180_v52 = vpop.eup %6179 }
0x1763   : > { %v3519_v54 = vmul.f32 %v6180_v52, %v3503_v33 }
0x1765   : > { %v3527_v14 = vmul.f32 %v5382_v21, %v3519_v54 }
0x1766   : > { %v6182_v56 = vpop.eup %6181 }
0x1767   : > { %v3520_v57 = vmul.f32 %v6182_v56, %v3504_v31  ;;  %v7182_v53 = vadd.f32 %v5383_v49, %v3527_v14  ;;  %v6242_v14 = vld [vmem:[%s7826_s7 + $0x10] sm:$0xff] }
0x1769   : > { %v3528_v58 = vmul.f32 %v5382_v21, %v3520_v57 }
0x176b   : > { %v7184_v59 = vadd.f32 %v5383_v49, %v3528_v58  ;;  %v6243_v49 = vld [vmem:[%s7826_s7 + $0x20] sm:$0xff] }
0x176d   : > { %v3537_v47 = vpack.c.bf16 %v7184_v59, %v7182_v53 }
0x176f   : > { %5812 = vmatmul.mubr.msk.bf16.vlgmr.msra.gmra.mxu0 %vm897_vm1, %v3537_v47 }
0x1770   : > { %5817 = vmatprep.mubr.msk.bf16.mxu0 %vm6313_vm0, %v6312_v1 }
0x182f   : > { %v3600_v55 = vpop.f32.mrf.mxu0 }
0x1830   : > { %v3601_v62 = vadd.f32 %v5389_v60, %v3600_v55 }
0x1831   : > { %v5813_v48 = vpop.f32.mrf.mxu0 }
0x1833   : > { %v3603_v61 = vpop.f32.mrf.mxu0 }
0x1834   : > { %v3604_v63 = vadd.f32 %v5389_v60, %v3603_v61 }
0x1835   : > { %v5814_v4 = vpop.f32.mrf.mxu0 }
0x1836   : > { %v6025_v0 = vpack.i.bf16 %v3604_v63, %v3601_v62  ;;  %v7197_v7 = vpack.c.bf16 %v3604_v63, %v3601_v62  ;;  %v6244_v4 = vld [vmem:[%s7826_s7 + $0x18] sm:$0xff] }
0x1838   : > { %6026 = vrot.lane.b32.xlu0 %v6025_v0, %s7839_s30  ;;  %6021 = vrot.lane.b32.xlu1 %v6025_v0, %s7840_s9  ;;  %s7844_s30 = sld [smem:[#allocation29_spill]] }
0x1839   : > { %s7850_s9 = sld [smem:[#allocation27_spill]] }
0x183c   : > { %6031 = vrot.lane.b32.xlu1 %v6025_v0, %s7841_s1 }
0x183e   : > { %s7845_s1 = smov %s7844_s30 }
0x1840   : > { %3632 = vrot.lane.b32.xlu1 %v7197_v7, %s7842_s8 }
0x18aa   : > { %v6027_v40 = vpop.permute.xlu0 %6026  ;;  %v6022_v5 = vpop.permute.xlu1 %6021 }
0x18ab   : > { %v6029_v3 = vunpack.i.h.bf16 %v6027_v40  ;;  %v6028_v9 = vunpack.i.l.bf16 %v6027_v40  ;;  %v6024_v11 = vunpack.i.h.bf16 %v6022_v5  ;;  %v6023_v12 = vunpack.i.l.bf16 %v6022_v5  ;;  %v6245_v40 = vld [vmem:[%s7826_s7 + $0x28] sm:$0xff] }
0x18ad   : > { %v7201_v13 = vpack.c.bf16 %v6029_v3, %v6028_v9  ;;  %v7203_v15 = vpack.c.bf16 %v6024_v11, %v6023_v12 }
0x18ae   : > { %v6032_v35 = vpop.permute.xlu1 %6031 }
0x18af   : > { %v6034_v16 = vunpack.i.h.bf16 %v6032_v35  ;;  %v6033_v45 = vunpack.i.l.bf16 %v6032_v35  ;;  %3682 = vrot.lane.b32.xlu0 %v7203_v15, %s7842_s8  ;;  %3732 = vrot.lane.b32.xlu1 %v7201_v13, %s7842_s8 }
0x18b1   : > { %v7209_v17 = vpack.c.bf16 %v6034_v16, %v6033_v45  ;;  %v6246_v45 = vld [vmem:[%s7826_s7 + $0x30] sm:$0xff] }
0x18b2   : > { %v3633_v18 = vpop.permute.xlu1 %3632 }
0x18b3   : > { %v3638_v19 = vsel %vm969_vm2, %v3633_v18, 0  ;;  %3782 = vrot.lane.b32.xlu0 %v7209_v17, %s7842_s8  ;;  %s7857_s8 = sld [smem:[#allocation34_spill]] }
0x18b4   : > { %5816 = vmatpush3.bf16.xpose.msra.mxu0 %v3638_v19 }
0x18b5   : > { %5827 = vmatprep.subr.bf16.mxu0 %v6312_v1 }
0x18bb   : > { %5818 = vmatmul.mubr.msk.bf16.vlgmr.msra.gmra.mxu0 %vm969_vm2, %v7197_v7 }
0x18bc   : > { %5829 = vmatprep.mubr.msk.bf16.mxu0 %vm6313_vm0, %v6312_v1 }
0x1921   : > { %v3683_v6 = vpop.permute.xlu0 %3682  ;;  %v3733_v20 = vpop.permute.xlu1 %3732 }
0x1922   : > { %v3688_v22 = vsel %vm969_vm2, %v3683_v6, 0  ;;  %v3738_v26 = vsel %vm969_vm2, %v3733_v20, 0 }
0x1923   : > { %5822 = vmatpush3.bf16.xpose.msra.mxu1 %v3688_v22  ;;  %5828 = vmatpush3.bf16.xpose.msra.mxu0 %v3738_v26 }
0x1924   : > { %5833 = vmatprep.subr.bf16.mxu1 %v6312_v1  ;;  %5839 = vmatprep.subr.bf16.mxu0 %v6312_v1 }
0x1925   : > { %v3783_v29 = vpop.permute.xlu0 %3782 }
0x1926   : > { %v3788_v30 = vsel %vm969_vm2, %v3783_v29, 0 }
0x192a   : > { %5824 = vmatmul.mubr.msk.bf16.vlgmr.msra.gmra.mxu1 %vm969_vm2, %v7203_v15  ;;  %5830 = vmatmul.mubr.msk.bf16.vlgmr.msra.gmra.mxu0 %vm969_vm2, %v7201_v13 }
0x192b   : > { %5834 = vmatpush3.bf16.xpose.msra.mxu1 %v3788_v30  ;;  %5835 = vmatprep.mubr.msk.bf16.mxu1 %vm6313_vm0, %v6312_v1 }
0x192c   : > { %5845 = vmatprep.subr.bf16.mxu1 %v6312_v1  ;;  %5841 = vmatprep.mubr.msk.bf16.mxu0 %vm6313_vm0, %v6312_v1 }
0x1932   : > { %5836 = vmatmul.mubr.msk.bf16.vlgmr.msra.gmra.mxu1 %vm969_vm2, %v7209_v17 }
0x1933   : > { %5847 = vmatprep.mubr.msk.bf16.mxu1 %vm6313_vm0, %v6312_v1 }
0x197b   : > { %v3674_v33 = vpop.f32.mrf.mxu0 }
0x197c   : > { %v3831_v28 = vmul.f32 0.35355338, %v3674_v33  ;;  %v6247_v33 = vld [vmem:[%s7826_s7 + $0x38] sm:$0xff] }
0x197d   : > { %v5819_v34 = vpop.f32.mrf.mxu0 }
0x197e   : > { %v3839_v31 = vadd.f32 %v6240_v27, %v3831_v28 }
0x197f   : > { %v3677_v32 = vpop.f32.mrf.mxu0 }
0x1980   : > { %v3832_v37 = vmul.f32 0.35355338, %v3677_v32  ;;  %v3847_v2 = vsub.f32 %v3839_v31, %v6608_v42 }
0x1981   : > { %v5820_v38 = vpop.f32.mrf.mxu0 }
0x1982   : > { %v3840_v8 = vadd.f32 %v6241_v41, %v3832_v37  ;;  %v3855_v43 = vsel %vm1197_vm3, %v3847_v2, -inf }
0x1983   : > { %3856 = vmax.xlane.f32.xlu1 %v3855_v43 }
0x1984   : > { %v3848_v44 = vsub.f32 %v3840_v8, %v6608_v42 }
0x1986   : > { %v3858_v46 = vsel %vm1197_vm3, %v3848_v44, -inf }
0x1987   : > { %3859 = vmax.xlane.f32.xlu0 %v3858_v46 }
0x19ea   : > { %v3724_v50 = vpop.f32.mrf.mxu1  ;;  %v3774_v51 = vpop.f32.mrf.mxu0 }
0x19eb   : > { %v3833_v52 = vmul.f32 0.35355338, %v3724_v50  ;;  %v3835_v54 = vmul.f32 0.35355338, %v3774_v51 }
0x19ec   : > { %v5825_v21 = vpop.f32.mrf.mxu1  ;;  %v5831_v56 = vpop.f32.mrf.mxu0 }
0x19ed   : > { %v3841_v57 = vadd.f32 %v6242_v14, %v3833_v52  ;;  %v3843_v58 = vadd.f32 %v6243_v49, %v3835_v54 }
0x19ee   : > { %v3727_v47 = vpop.f32.mrf.mxu1  ;;  %v3777_v55 = vpop.f32.mrf.mxu0 }
0x19ef   : > { %v3834_v60 = vmul.f32 0.35355338, %v3727_v47  ;;  %v3836_v48 = vmul.f32 0.35355338, %v3777_v55  ;;  %v3849_v61 = vsub.f32 %v3841_v57, %v6608_v42  ;;  %v3851_v9 = vsub.f32 %v3843_v58, %v6608_v42 }
0x19f0   : > { %v5826_v62 = vpop.f32.mrf.mxu1  ;;  %v5832_v63 = vpop.f32.mrf.mxu0 }
0x19f1   : > { %v3842_v0 = vadd.f32 %v6244_v4, %v3834_v60  ;;  %v3844_v5 = vadd.f32 %v6245_v40, %v3836_v48  ;;  %v3861_v3 = vsel %vm1197_vm3, %v3849_v61, -inf  ;;  %v3867_v6 = vsel %vm1197_vm3, %v3851_v9, -inf }
0x19f2   : > { %v3824_v11 = vpop.f32.mrf.mxu1  ;;  %3862 = vmax.xlane.f32.xlu0 %v3861_v3 }
0x19f3   : > { %v3837_v12 = vmul.f32 0.35355338, %v3824_v11  ;;  %v3850_v35 = vsub.f32 %v3842_v0, %v6608_v42  ;;  %v3852_v20 = vsub.f32 %v3844_v5, %v6608_v42 }
0x19f4   : > { %v5837_v16 = vpop.f32.mrf.mxu1 }
0x19f5   : > { %v3845_v18 = vadd.f32 %v6246_v45, %v3837_v12  ;;  %v3864_v19 = vsel %vm1197_vm3, %v3850_v35, -inf  ;;  %v3870_v27 = vsel %vm1197_vm3, %v3852_v20, -inf }
0x19f6   : > { %v3827_v22 = vpop.f32.mrf.mxu1  ;;  %3865 = vmax.xlane.f32.xlu1 %v3864_v19  ;;  %3868 = vmax.xlane.f32.xlu0 %v3867_v6 }
0x19f7   : > { %v3838_v26 = vmul.f32 0.35355338, %v3827_v22  ;;  %v3853_v29 = vsub.f32 %v3845_v18, %v6608_v42 }
0x19f8   : > { %v5838_v30 = vpop.f32.mrf.mxu1 }
0x19f9   : > { %v3846_v28 = vadd.f32 %v6247_v33, %v3838_v26  ;;  %v3873_v34 = vsel %vm1197_vm3, %v3853_v29, -inf }
0x19fa   : > { %3874 = vmax.xlane.f32.xlu0 %v3873_v34  ;;  %3871 = vmax.xlane.f32.xlu1 %v3870_v27 }
0x19fb   : > { %v3854_v31 = vsub.f32 %v3846_v28, %v6608_v42 }
0x19fd   : > { %v3876_v32 = vsel %vm1197_vm3, %v3854_v31, -inf }
0x19fe   : > { %3877 = vmax.xlane.f32.xlu1 %v3876_v32 }
0x1a0c   : > { %v3857_v37 = vpop.xlane.xlu1 %3856 }
0x1a0d   : > { %v3879_v38 = vsub.f32 %v3847_v2, %v3857_v37 }
0x1a0f   : > { %3994 = vrot.lane.b32.xlu1 %v7203_v15, %s7843_s0  ;;  %v3887_v8 = vmul.f32 1.442695, %v3879_v38 }
0x1a10   : > { %3947 = vrot.lane.b32.xlu0 %v7197_v7, %s7843_s0  ;;  %v3860_v41 = vpop.xlane.xlu0 %3859 }
0x1a11   : > { %v3880_v43 = vsub.f32 %v3848_v44, %v3860_v41  ;;  %6183 = vpow2.f32 %v3887_v8 }
0x1a13   : > { %v3889_v46 = vmul.f32 1.442695, %v3880_v43 }
0x1a15   : > { %6185 = vpow2.f32 %v3889_v46 }
0x1a1e   : > { %v6184_v50 = vpop.eup %6183 }
0x1a1f   : > { %v3903_v42 = vsel %vm1197_vm3, %v6184_v50, 0.0 }
0x1a22   : > { %v6186_v51 = vpop.eup %6185 }
0x1a23   : > { %v3906_v52 = vsel %vm1197_vm3, %v6186_v51, 0.0 }
0x1a2f   : > { %3904 = vadd.xlane.f32.xlu0 %v3903_v42 }
0x1a33   : > { %3907 = vadd.xlane.f32.xlu1 %v3906_v52  ;;  %v5401_v52 = vld [vmem:[%s7827_s12 + $0x20] sm:$0xf] }
0x1a7b   : > { %v3863_v15 = vpop.xlane.xlu0 %3862 }
0x1a7c   : > { %v3881_v54 = vsub.f32 %v3849_v61, %v3863_v15 }
0x1a7e   : > { %v3891_v21 = vmul.f32 1.442695, %v3881_v54 }
0x1a7f   : > { %v3866_v7 = vpop.xlane.xlu1 %3865  ;;  %v3869_v56 = vpop.xlane.xlu0 %3868 }
0x1a80   : > { %6187 = vpow2.f32 %v3891_v21  ;;  %v3882_v2 = vsub.f32 %v3850_v35, %v3866_v7  ;;  %v3883_v14 = vsub.f32 %v3851_v9, %v3869_v56 }
0x1a82   : > { %v3893_v44 = vmul.f32 1.442695, %v3882_v2  ;;  %v3895_v57 = vmul.f32 1.442695, %v3883_v14  ;;  %v4148_v2 = vsel %vm1489_vm4, %v5401_v52, 0 }
0x1a83   : > { %v3875_v49 = vpop.xlane.xlu0 %3874  ;;  %v3872_v58 = vpop.xlane.xlu1 %3871 }
0x1a84   : > { %6189 = vpow2.f32 %v3893_v44  ;;  %v3885_v47 = vsub.f32 %v3853_v29, %v3875_v49  ;;  %v3884_v55 = vsub.f32 %v3852_v20, %v3872_v58  ;;  %v5402_v49 = vld [vmem:[%s7827_s12 + $0x24] sm:$0xf] }
0x1a85   : > { %6191 = vpow2.f32 %v3895_v57  ;;  %v4195_v58 = vsel %vm1489_vm4, %v5402_v49, 0 }
0x1a86   : > { %v3899_v60 = vmul.f32 1.442695, %v3885_v47  ;;  %v3897_v48 = vmul.f32 1.442695, %v3884_v55 }
0x1a87   : > { %v3948_v62 = vpop.permute.xlu0 %3947  ;;  %v3878_v63 = vpop.xlane.xlu1 %3877 }
0x1a88   : > { %6193 = vpow2.f32 %v3899_v60  ;;  %v3886_v61 = vsub.f32 %v3854_v31, %v3878_v63  ;;  %5840 = vmatpush3.bf16.msra.mxu0 %v3948_v62  ;;  %v5403_v60 = vld [vmem:[%s7827_s12 + $0x28] sm:$0xf] }
0x1a89   : > { %6195 = vpow2.f32 %v3897_v48  ;;  %5851 = vmatprep.subr.bf16.mxu0 %v6312_v1  ;;  %v4242_v63 = vsel %vm1489_vm4, %v5403_v60, 0 }
0x1a8a   : > { %v3901_v4 = vmul.f32 1.442695, %v3886_v61 }
0x1a8b   : > { %v3995_v0 = vpop.permute.xlu1 %3994 }
0x1a8c   : > { %6197 = vpow2.f32 %v3901_v4  ;;  %5846 = vmatpush3.bf16.msra.mxu1 %v3995_v0 }
0x1a8d   : > { %v6188_v40 = vpop.eup %6187  ;;  %5857 = vmatprep.subr.bf16.mxu1 %v6312_v1 }
0x1a8e   : > { %v3909_v5 = vsel %vm1197_vm3, %v6188_v40, 0.0 }
0x1a8f   : > { %3910 = vadd.xlane.f32.xlu0 %v3909_v5 }
0x1a91   : > { %v6190_v3 = vpop.eup %6189 }
0x1a92   : > { %v6192_v9 = vpop.eup %6191  ;;  %v3912_v11 = vsel %vm1197_vm3, %v6190_v3, 0.0 }
0x1a93   : > { %v3915_v12 = vsel %vm1197_vm3, %v6192_v9, 0.0  ;;  %3913 = vadd.xlane.f32.xlu1 %v3912_v11 }
0x1a94   : > { %3916 = vadd.xlane.f32.xlu0 %v3915_v12 }
0x1a95   : > { %v6194_v35 = vpop.eup %6193 }
0x1a96   : > { %v6196_v16 = vpop.eup %6195  ;;  %v3921_v45 = vsel %vm1197_vm3, %v6194_v35, 0.0 }
0x1a97   : > { %v3918_v18 = vsel %vm1197_vm3, %v6196_v16, 0.0 }
0x1a98   : > { %3922 = vadd.xlane.f32.xlu0 %v3921_v45  ;;  %3919 = vadd.xlane.f32.xlu1 %v3918_v18 }
0x1a99   : > { %v6198_v19 = vpop.eup %6197 }
0x1a9a   : > { %v3924_v6 = vsel %vm1197_vm3, %v6198_v19, 0.0 }
0x1a9c   : > { %3925 = vadd.xlane.f32.xlu1 %v3924_v6 }
0x1aad   : > { %4041 = vrot.lane.b32.xlu1 %v7201_v13, %s7843_s0 }
0x1aae   : > { %4088 = vrot.lane.b32.xlu0 %v7209_v17, %s7843_s0 }
0x1ab8   : > { %v3905_v20 = vpop.xlane.xlu0 %3904 }
0x1ab9   : > { %6199 = vrcp.f32 %v3905_v20 }
0x1abc   : > { %v3908_v22 = vpop.xlane.xlu1 %3907 }
0x1abd   : > { %6201 = vrcp.f32 %v3908_v22 }
0x1ac6   : > { %v6200_v26 = vpop.eup %6199 }
0x1ac7   : > { %v3935_v30 = vmul.f32 %v6200_v26, %v6184_v50  ;;  %v6248_v26 = vld [vmem:[%s7829_s6 + $0x4] ss:$8 sps:$4 sm:$0xff]  }
0x1aca   : > { %v6202_v29 = vpop.eup %6201 }
0x1acb   : > { %v3936_v33 = vmul.f32 %v6202_v29, %v6186_v51 }
0x1acd   : > { %v3943_v28 = vpack.c.bf16 %v3936_v33, %v3935_v30 }
0x1acf   : > { %5842 = vmatmul.mubr.msk.bf16.vlgmr.msra.gmra.mxu0 %vm1197_vm3, %v3943_v28 }
0x1ad0   : > { %5853 = vmatprep.mubr.msk.bf16.mxu0 %vm6313_vm0, %v6312_v1 }
0x1b18   : > { %v3911_v34 = vpop.xlane.xlu0 %3910 }
0x1b19   : > { %6203 = vrcp.f32 %v3911_v34 }
0x1b1c   : > { %v3914_v13 = vpop.xlane.xlu1 %3913 }
0x1b1d   : > { %v3917_v27 = vpop.xlane.xlu0 %3916  ;;  %6205 = vrcp.f32 %v3914_v13 }
0x1b1e   : > { %6207 = vrcp.f32 %v3917_v27 }
0x1b21   : > { %v3923_v17 = vpop.xlane.xlu0 %3922  ;;  %v3920_v31 = vpop.xlane.xlu1 %3919 }
0x1b22   : > { %6209 = vrcp.f32 %v3920_v31 }
0x1b23   : > { %6211 = vrcp.f32 %v3923_v17 }
0x1b25   : > { %v3926_v32 = vpop.xlane.xlu1 %3925  ;;  %v4089_v42 = vpop.permute.xlu0 %4088 }
0x1b26   : > { %6213 = vrcp.f32 %v3926_v32  ;;  %v6204_v37 = vpop.eup %6203 }
0x1b27   : > { %v3937_v8 = vmul.f32 %v6204_v37, %v6188_v40  ;;  %v5404_v40 = vld [vmem:[%s7827_s12 + $0x2c] sm:$0xf] }
0x1b29   : > { %v4042_v38 = vpop.permute.xlu1 %4041 }
0x1b2a   : > { %v6206_v41 = vpop.eup %6205  ;;  %5852 = vmatpush3.bf16.msra.mxu0 %v4042_v38 }
0x1b2b   : > { %v3938_v43 = vmul.f32 %v6206_v41, %v6190_v3  ;;  %5863 = vmatprep.subr.bf16.mxu0 %v6312_v1  ;;  %v6208_v50 = vpop.eup %6207 }
0x1b2c   : > { %v3939_v54 = vmul.f32 %v6208_v50, %v6192_v9  ;;  %v4289_v9 = vsel %vm1489_vm4, %v5404_v40, 0 }
0x1b2d   : > { %v3944_v46 = vpack.c.bf16 %v3938_v43, %v3937_v8 }
0x1b2f   : > { %5848 = vmatmul.mubr.msk.bf16.vlgmr.msra.gmra.mxu1 %vm1197_vm3, %v3944_v46  ;;  %v6210_v51 = vpop.eup %6209 }
0x1b30   : > { %5858 = vmatpush3.bf16.msra.mxu1 %v4089_v42  ;;  %5859 = vmatprep.mubr.msk.bf16.mxu1 %vm6313_vm0, %v6312_v1  ;;  %v6212_v15 = vpop.eup %6211  ;;  %v3940_v21 = vmul.f32 %v6210_v51, %v6196_v16 }
0x1b31   : > { %5869 = vmatprep.subr.bf16.mxu1 %v6312_v1  ;;  %v3941_v14 = vmul.f32 %v6212_v15, %v6194_v35 }
0x1b32   : > { %v3945_v56 = vpack.c.bf16 %v3940_v21, %v3939_v54  ;;  %v5410_v54 = vld [vmem:[%s7828_s11 + $0x2] ss:$0 sm:$0xff] }
0x1b33   : > { %v6214_v7 = vpop.eup %6213 }
0x1b34   : > { %v3942_v44 = vmul.f32 %v6214_v7, %v6198_v19  ;;  %5854 = vmatmul.mubr.msk.bf16.vlgmr.msra.gmra.mxu0 %vm1197_vm3, %v3945_v56 }
0x1b35   : > { %5864 = vmatpush3.bf16.msra.mxu0 %v4148_v2  ;;  %5865 = vmatprep.mubr.msk.bf16.mxu0 %vm6313_vm0, %v6312_v1 }
0x1b36   : > { %v3946_v57 = vpack.c.bf16 %v3942_v44, %v3941_v14  ;;  %5875 = vmatprep.subr.bf16.mxu0 %v6312_v1 }
0x1b38   : > { %5860 = vmatmul.mubr.msk.bf16.vlgmr.msra.gmra.mxu1 %vm1197_vm3, %v3946_v57 }
0x1b39   : > { %5871 = vmatprep.mubr.msk.bf16.mxu1 %vm6313_vm0, %v6312_v1  ;;  %5870 = vmatpush3.bf16.msra.mxu1 %v4195_v58 }
0x1b3a   : > { %5881 = vmatprep.subr.bf16.mxu1 %v6312_v1 }
0x1b8f   : > { %v3987_v47 = vpop.f32.mrf.mxu0 }
0x1b91   : > { %v5843_v55 = vpop.f32.mrf.mxu0 }
0x1b93   : > { %v3990_v48 = vpop.f32.mrf.mxu0 }
0x1b94   : > { %v4135_v62 = vpack.c.bf16 %v3990_v48, %v3987_v47 }
0x1b95   : > { %v5844_v61 = vpop.f32.mrf.mxu0 }
0x1b96   : > { %5866 = vmatmul.mubr.msk.bf16.vlgmr.msra.gmra.mxu0 %vm969_vm2, %v4135_v62 }
0x1b97   : > { %5876 = vmatpush3.bf16.msra.mxu0 %v4242_v63  ;;  %5877 = vmatprep.mubr.msk.bf16.mxu0 %vm6313_vm0, %v6312_v1 }
0x1b98   : > { %4552 = vmatprep.subr.bf16.mxu0 %v6319_v10 }
0x1bef   : > { %v4034_v4 = vpop.f32.mrf.mxu1 }
0x1bf1   : > { %v5849_v0 = vpop.f32.mrf.mxu1 }
0x1bf3   : > { %v4037_v5 = vpop.f32.mrf.mxu1 }
0x1bf4   : > { %v4136_v3 = vpack.c.bf16 %v4037_v5, %v4034_v4  ;;  %v4081_v11 = vpop.f32.mrf.mxu0 }
0x1bf5   : > { %v5850_v12 = vpop.f32.mrf.mxu1 }
0x1bf6   : > { %5872 = vmatmul.mubr.msk.bf16.vlgmr.msra.gmra.mxu1 %vm969_vm2, %v4136_v3  ;;  %v5855_v35 = vpop.f32.mrf.mxu0 }
0x1bf7   : > { %5882 = vmatpush3.bf16.msra.mxu1 %v4289_v9  ;;  %5883 = vmatprep.mubr.msk.bf16.mxu1 %vm6313_vm0, %v6312_v1 }
0x1bf8   : > { %v4128_v16 = vpop.f32.mrf.mxu1  ;;  %5887 = vmatprep.subr.bf16.mxu1 %v6312_v1  ;;  %v4084_v45 = vpop.f32.mrf.mxu0 }
0x1bf9   : > { %v4137_v18 = vpack.c.bf16 %v4084_v45, %v4081_v11 }
0x1bfa   : > { %v5861_v19 = vpop.f32.mrf.mxu1  ;;  %v5856_v6 = vpop.f32.mrf.mxu0 }
0x1bfb   : > { %5878 = vmatmul.mubr.msk.bf16.vlgmr.msra.gmra.mxu0 %vm969_vm2, %v4137_v18  ;;  %v5415_v19 = vld [vmem:[%s7831_s28 + $0x20] sm:$0xff] }
0x1bfc   : > { %v4131_v20 = vpop.f32.mrf.mxu1  ;;  %5420 = vmatprep.mubr.msk.bf16.mxu0 %vm1197_vm3, %v6248_v26  ;;  %v4409_v26 = vcombine.high %v5415_v19, %v5415_v19 }
0x1bfd   : > { %v4138_v22 = vpack.c.bf16 %v4131_v20, %v4128_v16 }
0x1bfe   : > { %v5862_v29 = vpop.f32.mrf.mxu1 }
0x1bff   : > { %5884 = vmatmul.mubr.msk.bf16.vlgmr.msra.gmra.mxu1 %vm969_vm2, %v4138_v22 }
0x1c00   : > { %5891 = vmatprep.mubr.msk.bf16.mxu1 %vm6313_vm0, %v6312_v1 }
0x1c56   : > { %v4184_v30 = vpop.f32.mrf.mxu0 }
0x1c57   : > { %v4332_v32 = vsel %vm897_vm1, %v4184_v30, 0.0  ;;  %v4423_v30 = vrot.slane %v4409_v26, %v6737_v23 }
0x1c58   : > { %v5867_v33 = vpop.f32.mrf.mxu0 }
0x1c59   : > { %v4425_v33 = vcombine.high %v4423_v30, %v4423_v30 }
0x1c5a   : > { %v4187_v28 = vpop.f32.mrf.mxu0 }
0x1c5b   : > { %v4339_v51 = vsel %vm897_vm1, %v4187_v28, 0.0  ;;  %v4453_v28 = vrot.slane %v4425_v33, %v6737_v23 }
0x1c5c   : > { %v5868_v34 = vpop.f32.mrf.mxu0 }
0x1cb6   : > { %v4231_v13 = vpop.f32.mrf.mxu1 }
0x1cb7   : > { %v4333_v17 = vsel %vm897_vm1, %v4231_v13, 0.0  ;;  %v5413_v13 = vld [vmem:[%s7832_s10 + $0x2] ss:$0 sm:$0xff] }
0x1cb8   : > { %v5873_v27 = vpop.f32.mrf.mxu1  ;;  %v4334_v41 = vadd.f32 %v4333_v17, %v4332_v32  ;;  %v4439_v32 = vrot.slane %v4423_v30, %v6737_v23 }
0x1cba   : > { %v4234_v31 = vpop.f32.mrf.mxu1 }
0x1cbb   : > { %v4278_v37 = vpop.f32.mrf.mxu0  ;;  %v4340_v43 = vsel %vm897_vm1, %v4234_v31, 0.0  ;;  %v4457_v31 = vcombine.high %v4453_v28, %v4453_v28 }
0x1cbc   : > { %v5874_v38 = vpop.f32.mrf.mxu1  ;;  %v4335_v8 = vsel %vm897_vm1, %v4278_v37, 0.0  ;;  %v4341_v21 = vadd.f32 %v4340_v43, %v4339_v51 }
0x1cbd   : > { %v5879_v46 = vpop.f32.mrf.mxu0  ;;  %v4336_v50 = vadd.f32 %v4335_v8, %v4334_v41  ;;  %v5414_v38 = vld [vmem:[%s7834_s2 + $0x2] ss:$0 sm:$0xff]  ;;  %v4416_v8 = vrot.slane %v5415_v19, %v6737_v23  ;;  %s7854_s2 = sld [smem:[#allocation9_spill]] }
0x1cbf   : > { %v4325_v42 = vpop.f32.mrf.mxu1  ;;  %v4281_v52 = vpop.f32.mrf.mxu0 }
0x1cc0   : > { %v4337_v15 = vsel %vm897_vm1, %v4325_v42, 0.0  ;;  %v4342_v7 = vsel %vm897_vm1, %v4281_v52, 0.0  ;;  %v4455_v42 = vcombine.high %v4439_v32, %v4439_v32 }
0x1cc1   : > { %v4338_v56 = vadd.f32 %v4337_v15, %v4336_v50  ;;  %v5885_v2 = vpop.f32.mrf.mxu1  ;;  %v5880_v14 = vpop.f32.mrf.mxu0  ;;  %v4343_v44 = vadd.f32 %v4342_v7, %v4341_v21  ;;  %v4503_v50 = vrot.slane %v4457_v31, %v6602_v39  ;;  %v4424_v21 = vcombine.high %v4416_v8, %v4416_v8 }
0x1cc2   : > { %v4495_v14 = vrot.slane %v4453_v28, %v6602_v39 }
0x1cc3   : > { %v4354_v57 = vadd.f32 %v5410_v54, %v4338_v56  ;;  %v4328_v49 = vpop.f32.mrf.mxu1 }
0x1cc4   : > { %v4344_v58 = vsel %vm897_vm1, %v4328_v49, 0.0 }
0x1cc5   : > { %v4345_v47 = vadd.f32 %v4344_v58, %v4343_v44  ;;  %v5886_v55 = vpop.f32.mrf.mxu1  ;;  %v4356_v60 = vadd.f32 %v4354_v57, %v7182_v53  ;;  %v4446_v44 = vrot.slane %v4424_v21, %v6737_v23 }
0x1cc7   : > { %v4355_v48 = vadd.f32 %v5410_v54, %v4345_v47  ;;  %v4362_v62 = vsel %vm897_vm1, %v4356_v60, 0.0  ;;  %v4499_v54 = vrot.slane %v4455_v42, %v6602_v39  ;;  %v4491_v47 = vrot.slane %v4439_v32, %v6602_v39 }
0x1cc8   : > { %4363 = vadd.xlane.f32.xlu1 %v4362_v62  ;;  %v4456_v55 = vcombine.high %v4446_v44, %v4446_v44 }
0x1cc9   : > { %v4357_v63 = vadd.f32 %v4355_v48, %v7184_v59 }
0x1ccb   : > { %v4365_v61 = vsel %vm897_vm1, %v4357_v63, 0.0 }
0x1ccc   : > { %4366 = vadd.xlane.f32.xlu0 %v4365_v61  ;;  %v4487_v61 = vrot.slane %v4456_v55, %v6602_v39 }
0x1d51   : > { %v4364_v4 = vpop.xlane.xlu1 %4363 }
0x1d52   : > { %v4368_v0 = vmul.f32 0.03125, %v4364_v4 }
0x1d54   : > { %v4370_v40 = vsub.f32 %v4356_v60, %v4368_v0  ;;  %v4432_v60 = vrot.slane %v4416_v8, %v6737_v23 }
0x1d55   : > { %v4367_v5 = vpop.xlane.xlu0 %4366 }
0x1d56   : > { %v4369_v3 = vmul.f32 0.03125, %v4367_v5  ;;  %v4372_v9 = vmul.f32 %v4370_v40, %v4370_v40  ;;  %v4454_v4 = vcombine.high %v4432_v60, %v4432_v60 }
0x1d58   : > { %v4371_v11 = vsub.f32 %v4357_v63, %v4369_v3  ;;  %v4374_v12 = vsel %vm897_vm1, %v4372_v9, 0.0  ;;  %v4483_v3 = vrot.slane %v4454_v4, %v6602_v39 }
0x1d59   : > { %4375 = vadd.xlane.f32.xlu0 %v4374_v12 }
0x1d5a   : > { %v4373_v35 = vmul.f32 %v4371_v11, %v4371_v11 }
0x1d5c   : > { %v4377_v16 = vsel %vm897_vm1, %v4373_v35, 0.0  ;;  %v4479_v35 = vrot.slane %v4446_v44, %v6602_v39 }
0x1d5d   : > { %4378 = vadd.xlane.f32.xlu1 %v4377_v16  ;;  %v5417_v16 = vld.sshfl [vmem:[%s7831_s28 + $0x28] sm:$0x1 pattern:$0x75316420] }
0x1de2   : > { %v4376_v45 = vpop.xlane.xlu0 %4375 }
0x1de3   : > { %v4380_v18 = vmul.f32 0.03125, %v4376_v45 }
0x1de5   : > { %v4382_v6 = vadd.f32 1e-05, %v4380_v18 }
0x1de6   : > { %v4379_v20 = vpop.xlane.xlu1 %4378 }
0x1de7   : > { %6215 = vrsqrt.f32 %v4382_v6  ;;  %v4381_v22 = vmul.f32 0.03125, %v4379_v20  ;;  %v4475_v6 = vrot.slane %v4432_v60, %v6602_v39  ;;  %v4471_v20 = vrot.slane %v5417_v16, %v6737_v23 }
0x1de9   : > { %v4383_v29 = vadd.f32 1e-05, %v4381_v22  ;;  %v4507_v30 = vrot.slane %v4471_v20, %v6602_v39  ;;  %v5419_v39 = vld [vmem:[%s7836_s27 + $0x2] ss:$0 sm:$0xff] }
0x1deb   : > { %6217 = vrsqrt.f32 %v4383_v29 }
0x1df4   : > { %v6216_v34 = vpop.eup %6215 }
0x1df5   : > { %v4386_v27 = vmul.f32 %v6216_v34, %v4370_v40 }
0x1df7   : > { %v4394_v17 = vmul.f32 %v5413_v13, %v4386_v27 }
0x1df8   : > { %v6218_v37 = vpop.eup %6217 }
0x1df9   : > { %v4387_v41 = vmul.f32 %v6218_v37, %v4371_v11  ;;  %v7373_v43 = vadd.f32 %v5414_v38, %v4394_v17 }
0x1dfb   : > { %v4395_v46 = vmul.f32 %v5413_v13, %v4387_v41  ;;  %v4531_v52 = vmul.f32 %v4503_v50, %v7373_v43  ;;  %v4529_v2 = vmul.f32 %v4499_v54, %v7373_v43  ;;  %v4527_v58 = vmul.f32 %v4495_v14, %v7373_v43  ;;  %v6249_v13 = vld [vmem:[%s7829_s6] ss:$8 sps:$4 sm:$0xff]   ;;  %s6322_s6 = smov [#allocation2]  }
0x1dfc   : > { %v4525_v63 = vmul.f32 %v4491_v47, %v7373_v43  ;;  %v4523_v5 = vmul.f32 %v4487_v61, %v7373_v43  ;;  %v4521_v12 = vmul.f32 %v4483_v3, %v7373_v43  ;;  %v4519_v19 = vmul.f32 %v4479_v35, %v7373_v43 }
0x1dfd   : > { %v7376_v51 = vadd.f32 %v5414_v38, %v4395_v46  ;;  %v4517_v29 = vmul.f32 %v4475_v6, %v7373_v43  ;;  %v4533_v34 = vmul.f32 %v4507_v30, %v7373_v43 }
0x1dff   : > { %v4532_v15 = vmul.f32 %v4503_v50, %v7376_v51  ;;  %v4530_v56 = vmul.f32 %v4499_v54, %v7376_v51  ;;  %v4528_v49 = vmul.f32 %v4495_v14, %v7376_v51  ;;  %v4526_v62 = vmul.f32 %v4491_v47, %v7376_v51 }
0x1e00   : > { %v4524_v40 = vmul.f32 %v4487_v61, %v7376_v51  ;;  %v4522_v11 = vmul.f32 %v4483_v3, %v7376_v51  ;;  %v4520_v18 = vmul.f32 %v4479_v35, %v7376_v51  ;;  %v4518_v26 = vmul.f32 %v4475_v6, %v7376_v51 }
0x1e01   : > { %v4542_v7 = vpack.c.bf16 %v4532_v15, %v4531_v52  ;;  %v4541_v57 = vpack.c.bf16 %v4530_v56, %v4529_v2  ;;  %v4540_v48 = vpack.c.bf16 %v4528_v49, %v4527_v58  ;;  %v4539_v0 = vpack.c.bf16 %v4526_v62, %v4525_v63 }
0x1e02   : > { %v4538_v9 = vpack.c.bf16 %v4524_v40, %v4523_v5  ;;  %v4537_v45 = vpack.c.bf16 %v4522_v11, %v4521_v12  ;;  %v4536_v22 = vpack.c.bf16 %v4520_v18, %v4519_v19  ;;  %v4535_v33 = vpack.c.bf16 %v4518_v26, %v4517_v29  ;;  %v6070_v11 = vld [vmem:[%s7730_s14 + $0x20] sm:$0xff]  }
0x1e03   : > { %4553 = vmatpush1.bf16.msra.mxu0 %v4542_v7  ;;  %v4534_v28 = vmul.f32 %v4507_v30, %v7376_v51 }
0x1e04   : > { %4554 = vmatprep.subr.bf16.mxu0 %v6319_v10 }
0x1e05   : > { %v4543_v23 = vpack.c.bf16 %v4534_v28, %v4533_v34 }
0x1e07   : > { %4555 = vmatpush1.bf16.msra.mxu0 %v4541_v57 }
0x1e08   : > { %4556 = vmatprep.subr.bf16.mxu0 %v6319_v10 }
0x1e0b   : > { %4557 = vmatpush1.bf16.msra.mxu0 %v4540_v48 }
0x1e0c   : > { %4558 = vmatprep.subr.bf16.mxu0 %v6319_v10 }
0x1e0f   : > { %4559 = vmatpush1.bf16.msra.mxu0 %v4539_v0 }
0x1e10   : > { %4560 = vmatprep.subr.bf16.mxu0 %v6319_v10 }
0x1e13   : > { %4561 = vmatpush1.bf16.msra.mxu0 %v4538_v9 }
0x1e14   : > { %4562 = vmatprep.subr.bf16.mxu0 %v6319_v10 }
0x1e17   : > { %4563 = vmatpush1.bf16.msra.mxu0 %v4537_v45 }
0x1e18   : > { %4564 = vmatprep.subr.bf16.mxu0 %v6319_v10 }
0x1e1b   : > { %4565 = vmatpush1.bf16.msra.mxu0 %v4536_v22  ;;  %v5423_v22 = vld [vmem:[%s7838_s3 + $0x2] ss:$0 sm:$0xff] }
0x1e1c   : > { %4566 = vmatprep.subr.bf16.mxu0 %v6319_v10 }
0x1e1f   : > { %4567 = vmatpush1.bf16.msra.mxu0 %v4535_v33  ;;  %v5424_v33 = vld [vmem:[%s7729_s13 + $0x2] ss:$0 sm:$0xff] }
0x1e20   : > { %4582 = vmatprep.subr.bf16.mxu0 %v6319_v10 }
0x1e23   : > { %4583 = vmatpush2.bf16.msra.mxu0 %v4543_v23 }
0x1e24   : > { %5923 = vmatprep.subr.bf16.mxu0 %v6312_v1 }
0x1e26   : > { %4585 = vmatmul.mubr.bf16.vlgmr.msra.gmra.mxu0 %v6249_v13  ;;  %v6071_v13 = vld [vmem:[%s7732_s16 + $0x58] sm:$0xff]  }
0x1e27   : > { %5935 = vmatprep.mubr.msk.bf16.mxu0 %vm6313_vm0, %v6312_v1 }
0x1ee6   : > { %v4586_v27 = vpop.f32.mrf.mxu0 }
0x1ee7   : > { %v4587_v17 = vadd.f32 %v5419_v39, %v4586_v27  ;;  %v6072_v27 = vld [vmem:[%s7732_s16 + $0x50] sm:$0xff]  }
0x1ee8   : > { %v4588_v31 = vpop.f32.mrf.mxu0 }
0x1ee9   : > { %v4595_v10 = vmul.f32 0.044715, %v4587_v17  ;;  %v4593_v56 = vmul.f32 0.5, %v4587_v17  ;;  %v6074_v31 = vld [vmem:[%s7732_s16 + $0x40] sm:$0xff]  }
0x1eea   : > { %v4589_v32 = vpop.f32.mrf.mxu0 }
0x1eeb   : > { %v4597_v37 = vmul.f32 %v4595_v10, %v4587_v17  ;;  %v4590_v38 = vadd.f32 %v5419_v39, %v4589_v32  ;;  %v5430_v10 = vld [vmem:[%s7731_s15 + $0x2] ss:$0 sm:$0xff] }
0x1eec   : > { %v4591_v41 = vpop.f32.mrf.mxu0 }
0x1eed   : > { %v4599_v8 = vmul.f32 %v4597_v37, %v4587_v17  ;;  %v4596_v46 = vmul.f32 0.044715, %v4590_v38  ;;  %v4594_v49 = vmul.f32 0.5, %v4590_v38 }
0x1eef   : > { %v4598_v50 = vmul.f32 %v4596_v46, %v4590_v38  ;;  %v4601_v42 = vadd.f32 %v4599_v8, %v4587_v17  ;;  %v6073_v17 = vld [vmem:[%s7732_s16 + $0x48] sm:$0xff]  }
0x1ef1   : > { %v4600_v52 = vmul.f32 %v4598_v50, %v4590_v38  ;;  %v4603_v15 = vmul.f32 0.7978846, %v4601_v42 }
0x1ef3   : > { %6219 = vtanh.f32 %v4603_v15  ;;  %v4602_v54 = vadd.f32 %v4600_v52, %v4590_v38  ;;  %v5443_v15 = vld [vmem:[%s7733_s17 + $0x2] ss:$0 sm:$0xff] }
0x1ef5   : > { %v4604_v21 = vmul.f32 0.7978846, %v4602_v54 }
0x1ef7   : > { %6221 = vtanh.f32 %v4604_v21 }
0x1f00   : > { %v6220_v7 = vpop.eup %6219 }
0x1f01   : > { %v4607_v2 = vadd.f32 1.0, %v6220_v7 }
0x1f03   : > { %v4609_v14 = vmul.f32 %v4607_v2, %v4593_v56 }
0x1f04   : > { %v6222_v44 = vpop.eup %6221 }
0x1f05   : > { %v4611_v57 = vadd.f32 %v4609_v14, %v7373_v43  ;;  %v4608_v58 = vadd.f32 1.0, %v6222_v44 }
0x1f07   : > { %v4617_v47 = vsel %vm897_vm1, %v4611_v57, 0.0  ;;  %v4610_v55 = vmul.f32 %v4608_v58, %v4594_v49 }
0x1f08   : > { %4618 = vadd.xlane.f32.xlu0 %v4617_v47 }
0x1f09   : > { %v4612_v60 = vadd.f32 %v4610_v55, %v7376_v51  ;;  %v6069_v51 = vld [vmem:[%s7730_s14 + $0x28] sm:$0xff]  }
0x1f0a   : > { %5888 = vmatpush3.bf16.msra.mxu1 %v6069_v51  ;;  %v4913_v51 = vld [vmem:[%s7844_s30] sm:$0xff] }
0x1f0b   : > { %v4620_v48 = vsel %vm897_vm1, %v4612_v60, 0.0  ;;  %5889 = vmatprep.subr.bf16.mxu1 %v6312_v1 }
0x1f0c   : > { %4621 = vadd.xlane.f32.xlu1 %v4620_v48 }
0x1f0e   : > { %5890 = vmatpush3.bf16.msra.mxu1 %v6070_v11  ;;  %v4914_v11 = vld [vmem:[%s7845_s1 + $0x8] sm:$0xff]  ;;  %s7851_s1 = smov %s7850_s9 }
0x1f0f   : > { %5895 = vmatprep.subr.bf16.mxu1 %v6312_v1 }
0x1f91   : > { %v4619_v62 = vpop.xlane.xlu0 %4618 }
0x1f92   : > { %v4623_v63 = vmul.f32 0.03125, %v4619_v62  ;;  %v4919_v62 = vrot.slane %v7182_v53, 7 }
0x1f94   : > { %v4625_v61 = vsub.f32 %v4611_v57, %v4623_v63 }
0x1f95   : > { %v4622_v4 = vpop.xlane.xlu1 %4621 }
0x1f96   : > { %v4624_v0 = vmul.f32 0.03125, %v4622_v4  ;;  %v4627_v40 = vmul.f32 %v4625_v61, %v4625_v61 }
0x1f98   : > { %v4626_v5 = vsub.f32 %v4612_v60, %v4624_v0  ;;  %v4629_v43 = vsel %vm897_vm1, %v4627_v40, 0.0  ;;  %v4920_v60 = vrot.slane %v7184_v59, 7  ;;  %v4917_v0 = vld [vmem:[%s7739_s23] sm:$0xff]  ;;  %v4918_v40 = vld [vmem:[%s7739_s23 + $0x8] sm:$0xff] }
0x1f99   : > { %4630 = vadd.xlane.f32.xlu0 %v4629_v43 }
0x1f9a   : > { %v4628_v3 = vmul.f32 %v4626_v5, %v4626_v5  ;;  %v4922_v43 = vsel %vm4894_vm6, %v4920_v60, %v4919_v62 }
0x1f9c   : > { %v4632_v9 = vsel %vm897_vm1, %v4628_v3, 0.0 }
0x1f9d   : > { %4633 = vadd.xlane.f32.xlu1 %v4632_v9 }
0x2022   : > { %v4631_v12 = vpop.xlane.xlu0 %4630 }
0x2023   : > { %v4635_v35 = vmul.f32 0.03125, %v4631_v12  ;;  %v4931_v12 = vrot.slane %v7184_v59, 1 }
0x2025   : > { %v4637_v16 = vadd.f32 1e-05, %v4635_v35  ;;  %v4923_v35 = vmul.f32 %v4922_v43, %v4917_v0 }
0x2026   : > { %v4634_v45 = vpop.xlane.xlu1 %4633 }
0x2027   : > { %6223 = vrsqrt.f32 %v4637_v16  ;;  %v4636_v18 = vmul.f32 0.03125, %v4634_v45 }
0x2029   : > { %v4638_v19 = vadd.f32 1e-05, %v4636_v18  ;;  %v4930_v18 = vrot.slane %v7182_v53, 1 }
0x202b   : > { %6225 = vrsqrt.f32 %v4638_v19  ;;  %v4915_v19 = vmul.f32 %v4913_v51, %v7182_v53 }
0x2034   : > { %v6224_v6 = vpop.eup %6223 }
0x2035   : > { %v4641_v20 = vmul.f32 %v6224_v6, %v4625_v61  ;;  %v4916_v6 = vmul.f32 %v4914_v11, %v7184_v59 }
0x2037   : > { %v4649_v30 = vmul.f32 %v5423_v22, %v4641_v20 }
0x2038   : > { %v6226_v26 = vpop.eup %6225 }
0x2039   : > { %v4642_v29 = vmul.f32 %v6226_v26, %v4626_v5  ;;  %v4657_v34 = vadd.f32 %v5424_v33, %v4649_v30  ;;  %v4921_v5 = vsel %vm4894_vm6, %v4919_v62, %v4920_v60  ;;  %v5460_v26 = vld [vmem:[%s7739_s23 + $0x18] sm:$0xff]  ;;  %v4933_v30 = vsel %vm4906_vm7, %v4931_v12, %v4930_v18 }
0x203a   : > { %v4924_v16 = vmul.f32 %v4921_v5, %v4918_v40 }
0x203b   : > { %v4650_v28 = vmul.f32 %v5423_v22, %v4642_v29  ;;  %v5459_v22 = vld [vmem:[%s7739_s23 + $0x10] sm:$0xff]  ;;  %v4932_v29 = vsel %vm4906_vm7, %v4930_v18, %v4931_v12  ;;  %v4870_v18 = vld [vmem:[%s7849_s26 + $0x8] sm:$0xff] }
0x203d   : > { %v4658_v23 = vadd.f32 %v5424_v33, %v4650_v28  ;;  %v4942_v33 = vrot.slane %v7184_v59, 4  ;;  %v4925_v28 = vadd.f32 %v4923_v35, %v4915_v19  ;;  %v4872_v35 = vrot.slane %v6871_v25, 4 }
0x203f   : > { %v4659_v39 = vpack.c.bf16 %v4658_v23, %v4657_v34 }
0x2041   : > { %5892 = vmatmul.mubr.msk.bf16.vlgmr.msra.gmra.mxu1 %vm897_vm1, %v4659_v39  ;;  %v4935_v39 = vmul.f32 %v5460_v26, %v4933_v30 }
0x2042   : > { %5896 = vmatpush3.bf16.msra.mxu1 %v6071_v13  ;;  %5903 = vmatprep.mubr.msk.bf16.mxu1 %vm6313_vm0, %v6312_v1  ;;  %v4934_v13 = vmul.f32 %v5459_v22, %v4932_v29  ;;  %v4866_v22 = vld [vmem:[%s7851_s1 + $0x8] sm:$0xff] }
0x2043   : > { %5897 = vmatprep.subr.bf16.mxu1 %v6312_v1 }
0x2046   : > { %5898 = vmatpush3.bf16.msra.mxu1 %v6072_v27  ;;  %v5461_v27 = vld [vmem:[%s7739_s23 + $0x20] sm:$0xff] }
0x2047   : > { %5899 = vmatprep.subr.bf16.mxu1 %v6312_v1 }
0x204a   : > { %5900 = vmatpush3.bf16.msra.mxu1 %v6073_v17  ;;  %v5462_v17 = vld [vmem:[%s7739_s23 + $0x28] sm:$0xff] }
0x204b   : > { %5901 = vmatprep.subr.bf16.mxu1 %v6312_v1 }
0x204e   : > { %5902 = vmatpush3.bf16.msra.mxu1 %v6074_v31 }
0x204f   : > { %5907 = vmatprep.subr.bf16.mxu1 %v6312_v1 }
0x2101   : > { %v4722_v32 = vpop.f32.mrf.mxu1 }
0x2102   : > { %v4723_v38 = vadd.f32 %v5430_v10, %v4722_v32 }
0x2103   : > { %v5893_v37 = vpop.f32.mrf.mxu1 }
0x2104   : > { %v4729_v50 = vmax.f32 %v4723_v38, 0.0  ;;  %v5463_v38 = vld [vmem:[%s7739_s23 + $0x30] sm:$0xff] }
0x2105   : > { %v4725_v41 = vpop.f32.mrf.mxu1 }
0x2106   : > { %v4726_v8 = vadd.f32 %v5430_v10, %v4725_v41  ;;  %v4936_v10 = vadd.f32 %v4934_v13, %v4925_v28  ;;  %v5464_v41 = vld [vmem:[%s7739_s23 + $0x38] sm:$0xff]  ;;  %v5453_v28 = vld [vmem:[%s7849_s26 + $0x10] sm:$0xff] }
0x2107   : > { %v5894_v46 = vpop.f32.mrf.mxu1 }
0x2108   : > { %v4730_v42 = vmax.f32 %v4726_v8, 0.0 }
0x210a   : > { %v4731_v52 = vpack.c.bf16 %v4730_v42, %v4729_v50 }
0x210c   : > { %5904 = vmatmul.mubr.msk.bf16.vlgmr.msra.gmra.mxu1 %vm2118_vm5, %v4731_v52 }
0x210d   : > { %5919 = vmatprep.mubr.msk.bf16.mxu1 %vm6313_vm0, %v6312_v1 }
0x21cc   : > { %v4810_v54 = vpop.f32.mrf.mxu1 }
0x21cd   : > { %v4811_v21 = vadd.f32 %v5443_v15, %v4810_v54 }
0x21ce   : > { %v5905_v7 = vpop.f32.mrf.mxu1 }
0x21cf   : > { %v4817_v56 = vadd.f32 %v4811_v21, %v4657_v34  ;;  %v4926_v34 = vadd.f32 %v4924_v16, %v4916_v6  ;;  %v6075_v21 = vld [vmem:[%s7846_s5 + $0x28] sm:$0xff]   ;;  %v6076_v7 = vld [vmem:[%s7847_s24 + $0x20] sm:$0xff]   ;;  %v4871_v16 = vrot.slane %v6869_v24, 4  ;;  %s7853_s5 = sld [smem:[#allocation31_spill]] }
0x21d0   : > { %v4813_v2 = vpop.f32.mrf.mxu1  ;;  %5908 = vmatpush3.bf16.msra.mxu1 %v6075_v21 }
0x21d1   : > { %v4814_v14 = vadd.f32 %v5443_v15, %v4813_v2  ;;  %v4823_v44 = vsel %vm897_vm1, %v4817_v56, 0.0  ;;  %5909 = vmatprep.subr.bf16.mxu1 %v6312_v1  ;;  %v6078_v2 = vld [vmem:[%s7847_s24 + $0x10] sm:$0xff]   ;;  %v4876_v19 = vsel %vm4875_vm8, %v4871_v16, %v4872_v35  ;;  %v4877_v6 = vsel %vm4875_vm8, %v4872_v35, %v4871_v16 }
0x21d2   : > { %4824 = vadd.xlane.f32.xlu0 %v4823_v44  ;;  %v5906_v57 = vpop.f32.mrf.mxu1  ;;  %v4879_v29 = vmul.f32 %v4876_v19, %v4870_v18 }
0x21d3   : > { %v4818_v49 = vadd.f32 %v4814_v14, %v4658_v23  ;;  %v4941_v23 = vrot.slane %v7182_v53, 4  ;;  %v4937_v53 = vadd.f32 %v4935_v39, %v4926_v34  ;;  %v6079_v14 = vld [vmem:[%s7847_s24 + $0x8] sm:$0xff]   ;;  %v5454_v34 = vld [vmem:[%s7849_s26 + $0x18] sm:$0xff] }
0x21d4   : > { %5910 = vmatpush3.bf16.msra.mxu1 %v6076_v7 }
0x21d5   : > { %v4826_v58 = vsel %vm897_vm1, %v4818_v49, 0.0  ;;  %v4943_v59 = vsel %vm4875_vm8, %v4941_v23, %v4942_v33  ;;  %v4944_v31 = vsel %vm4875_vm8, %v4942_v33, %v4941_v23  ;;  %5911 = vmatprep.subr.bf16.mxu1 %v6312_v1  ;;  %v4868_v33 = vmul.f32 %v4866_v22, %v6871_v25 }
0x21d6   : > { %4827 = vadd.xlane.f32.xlu1 %v4826_v58  ;;  %v4945_v32 = vmul.f32 %v5461_v27, %v4944_v31  ;;  %v4946_v37 = vmul.f32 %v5462_v17, %v4943_v59  ;;  %v4952_v50 = vmul.f32 %v5463_v38, %v4943_v59  ;;  %v4953_v42 = vmul.f32 %v5464_v41, %v4944_v31  ;;  %v5455_v31 = vld [vmem:[%s7849_s26 + $0x20] sm:$0xff] }
0x21d7   : > { %v4893_v23 = vrot.slane %v6871_v25, 7  ;;  %v4881_v39 = vadd.f32 %v4879_v29, %v4868_v33  ;;  %v4892_v27 = vrot.slane %v6869_v24, 7  ;;  %v4885_v17 = vmul.f32 %v5453_v28, %v4876_v19 }
0x21d8   : > { %v4947_v8 = vadd.f32 %v4945_v32, %v4936_v10  ;;  %v4948_v46 = vadd.f32 %v4946_v37, %v4937_v53  ;;  %v4886_v59 = vmul.f32 %v5454_v34, %v4877_v6  ;;  %v5456_v10 = vld [vmem:[%s7849_s26 + $0x28] sm:$0xff]  ;;  %v4905_v37 = vrot.slane %v6871_v25, 1 }
0x21d9   : > { %v4895_v53 = vsel %vm4894_vm6, %v4892_v27, %v4893_v23  ;;  %v4896_v32 = vsel %vm4894_vm6, %v4893_v23, %v4892_v27 }
0x21da   : > { %v4954_v52 = vadd.f32 %v4952_v50, %v4947_v8  ;;  %v4955_v15 = vadd.f32 %v4953_v42, %v4948_v46  ;;  %v4888_v41 = vadd.f32 %v4886_v59, %v4881_v39  ;;  %v4904_v8 = vrot.slane %v6869_v24, 1  ;;  %v5457_v42 = vld [vmem:[%s7849_s26 + $0x30] sm:$0xff] }
0x21db   : > { %v4897_v46 = vmul.f32 %v5455_v31, %v4896_v32  ;;  %v4898_v50 = vmul.f32 %v5456_v10, %v4895_v53 }
0x21dc   : > { %v6035_v54 = vpack.i.bf16 %v4955_v15, %v4954_v52  ;;  %v5458_v52 = vld [vmem:[%s7849_s26 + $0x38] sm:$0xff]  ;;  %v4907_v15 = vsel %vm4906_vm7, %v4904_v8, %v4905_v37  ;;  %v4908_v25 = vsel %vm4906_vm7, %v4905_v37, %v4904_v8 }
0x21dd   : > { %v4900_v7 = vadd.f32 %v4898_v50, %v4888_v41 }
0x225b   : > { %v4825_v47 = vpop.xlane.xlu0 %4824 }
0x225c   : > { %v4829_v55 = vmul.f32 0.03125, %v4825_v47 }
0x225e   : > { %v7478_v48 = vsub.f32 %v4817_v56, %v4829_v55  ;;  %v6077_v56 = vld [vmem:[%s7847_s24 + $0x18] sm:$0xff]  }
0x225f   : > { %v4828_v63 = vpop.xlane.xlu1 %4827  ;;  %5912 = vmatpush3.bf16.msra.mxu1 %v6077_v56  ;;  %v4910_v56 = vmul.f32 %v5458_v52, %v4908_v25 }
0x2260   : > { %v4830_v61 = vmul.f32 0.03125, %v4828_v63  ;;  %v4833_v4 = vmul.f32 %v7478_v48, %v7478_v48  ;;  %5913 = vmatprep.subr.bf16.mxu1 %v6312_v1  ;;  %v5451_v63 = vld [vmem:[%s7734_s18 + $0x2] ss:$0 sm:$0xff] }
0x2262   : > { %v7494_v3 = vsub.f32 %v4818_v49, %v4830_v61  ;;  %v4835_v9 = vsel %vm897_vm1, %v4833_v4, 0.0  ;;  %v6080_v61 = vld [vmem:[%s7847_s24] sm:$0xff]  }
0x2263   : > { %4836 = vadd.xlane.f32.xlu0 %v4835_v9  ;;  %5914 = vmatpush3.bf16.msra.mxu1 %v6078_v2 }
0x2264   : > { %v4834_v45 = vmul.f32 %v7494_v3, %v7494_v3  ;;  %5915 = vmatprep.subr.bf16.mxu1 %v6312_v1 }
0x2266   : > { %v4838_v20 = vsel %vm897_vm1, %v4834_v45, 0.0  ;;  %v4869_v45 = vld [vmem:[%s7849_s26] sm:$0xff] }
0x2267   : > { %4839 = vadd.xlane.f32.xlu1 %v4838_v20  ;;  %5916 = vmatpush3.bf16.msra.mxu1 %v6079_v14  ;;  %v4865_v20 = vld [vmem:[%s7850_s9] sm:$0xff]  ;;  %v4878_v26 = vmul.f32 %v4877_v6, %v4869_v45  ;;  %s7852_s9 = sld [smem:[#allocation6_spill]] }
0x2268   : > { %5917 = vmatprep.subr.bf16.mxu1 %v6312_v1  ;;  %v4867_v30 = vmul.f32 %v4865_v20, %v6869_v24  ;;  %v4909_v24 = vmul.f32 %v5457_v42, %v4907_v15 }
0x226a   : > { %v4880_v13 = vadd.f32 %v4878_v26, %v4867_v30 }
0x226b   : > { %5918 = vmatpush3.bf16.msra.mxu1 %v6080_v61 }
0x226c   : > { %v4887_v38 = vadd.f32 %v4885_v17, %v4880_v13 }
0x226e   : > { %v4899_v21 = vadd.f32 %v4897_v46, %v4887_v38 }
0x2279   : > { %6036 = vrot.lane.b32.xlu0 %v6035_v54, %s6321_s21  ;;  %s7848_s21 = sld [smem:[#allocation32_spill]] }
0x227f   : > { %v6081_v5 = vld [vmem:[%s7848_s21 + $0x28] sm:$0xff]   ;;  %v6082_v9 = vld [vmem:[%s7848_s21 + $0x20] sm:$0xff]   ;;  %v6083_v12 = vld [vmem:[%s7848_s21 + $0x18] sm:$0xff]  }
0x2280   : > { %5924 = vmatpush3.bf16.msra.mxu0 %v6081_v5  ;;  %v6084_v61 = vld [vmem:[%s7848_s21 + $0x10] sm:$0xff]  }
0x2281   : > { %5925 = vmatprep.subr.bf16.mxu0 %v6312_v1 }
0x2284   : > { %5926 = vmatpush3.bf16.msra.mxu0 %v6082_v9 }
0x2285   : > { %5927 = vmatprep.subr.bf16.mxu0 %v6312_v1 }
0x2288   : > { %5928 = vmatpush3.bf16.msra.mxu0 %v6083_v12 }
0x2289   : > { %5929 = vmatprep.subr.bf16.mxu0 %v6312_v1 }
0x228c   : > { %5930 = vmatpush3.bf16.msra.mxu0 %v6084_v61 }
0x228d   : > { %5931 = vmatprep.subr.bf16.mxu0 %v6312_v1 }
0x22ec   : > { %v4837_v44 = vpop.xlane.xlu0 %4836 }
0x22ed   : > { %v4841_v57 = vmul.f32 0.03125, %v4837_v44  ;;  %v4911_v44 = vadd.f32 %v4909_v24, %v4899_v21 }
0x22ef   : > { %v4843_v49 = vadd.f32 1e-05, %v4841_v57  ;;  %v4912_v57 = vadd.f32 %v4910_v56, %v4900_v7 }
0x22f0   : > { %v4840_v58 = vpop.xlane.xlu1 %4839  ;;  %v6037_v54 = vpop.permute.xlu0 %6036 }
0x22f1   : > { %6227 = vrsqrt.f32 %v4843_v49  ;;  %v4842_v47 = vmul.f32 0.03125, %v4840_v58  ;;  %v6039_v2 = vunpack.i.h.bf16 %v6037_v54  ;;  %v6038_v14 = vunpack.i.l.bf16 %v6037_v54 }
0x22f3   : > { %v4844_v55 = vadd.f32 1e-05, %v4842_v47 }
0x22f5   : > { %6229 = vrsqrt.f32 %v4844_v55  ;;  %v4973_v55 = vsel %vm897_vm1, %v4912_v57, %v6039_v2 }
0x22fe   : > { %v6228_v60 = vpop.eup %6227 }
0x22ff   : > { %v4847_v62 = vmul.f32 %v6228_v60, %v7478_v48  ;;  %v5452_v48 = vld [vmem:[%s7735_s19 + $0x2] ss:$0 sm:$0xff]  ;;  %v4972_v60 = vsel %vm897_vm1, %v4911_v44, %v6038_v14 }
0x2301   : > { %v4855_v40 = vmul.f32 %v5451_v63, %v4847_v62 }
0x2302   : > { %v6230_v4 = vpop.eup %6229 }
0x2303   : > { %v4848_v0 = vmul.f32 %v6230_v4, %v7494_v3  ;;  %v7578_v51 = vadd.f32 %v5452_v48, %v4855_v40  ;;  %v6085_v4 = vld [vmem:[%s7848_s21 + $0x8] sm:$0xff]   ;;  %v5465_v40 = vld [vmem:[%s7853_s5] ss:$0 sm:$0xff]  ;;  %s5487_s5 = sshll.u32 %s7854_s2, 8 }
0x2304   : > { %5932 = vmatpush3.bf16.msra.mxu0 %v6085_v4  ;;  %s7670_s4 = scalar_lea.hbm %s7857_s8, %s5487_s5 }
0x2305   : > { %v4856_v43 = vmul.f32 %v5451_v63, %v4848_v0  ;;  %5933 = vmatprep.subr.bf16.mxu0 %v6312_v1  ;;  %v6086_v0 = vld [vmem:[%s7848_s21] sm:$0xff]  }
0x2306   : > { %v5473_v1 = vld [vmem:[%s7855_s25] ss:$0 sm:$0xff]  ;;  %s7858_s25 = smov %s7857_s8 }
0x2307   : > { %v7580_v3 = vadd.f32 %v5452_v48, %v4856_v43 }
0x2308   : > { %5934 = vmatpush3.bf16.msra.mxu0 %v6086_v0 }
0x2309   : > { %v6040_v11 = vpack.i.bf16 %v7580_v3, %v7578_v51 }
0x230b   : > { %6041 = vrot.lane.b32.xlu1 %v6040_v11, %s7843_s0  ;;  %s847_s0 = sand.u32 1, %s7852_s9   ;;  %s6254_s9 = sshll.u32 %s6322_s6, 4  ;;  %s6255_s9 = int_to_ptr.vmem [resolvable:$false] %s6254_s9 }
0x230c   : > { %s5274_s20 = sshll.u32 %s847_s0, 4  ;;  %s7676_s2 = scalar_lea.sflag [#allocation3], %s847_s0 }
0x230d   : > { %s849_s1 = scalar_lea.vmem [#allocation2], %s5274_s20  ;;  %s6256_s5 = scalar_lea.vmem %s6255_s9, 512 }
0x230e   : > { %s5199_s3 = sshll.u32 %s849_s1, 4  ;;  %s7672_s3 = int_to_ptr.vmem [resolvable:$true] %s5199_s3 }
0x230f   : > { %s6250_s20 = scalar_lea.vmem %s7672_s3, 256  ;;  %p6257_p0 = scmp.lt.s32.totalorder %s7672_s3, %s6255_s9 }
0x2310   : > { %p6251_p11 = scmp.ne.s32.totalorder %s7672_s3, %s6250_s20  ;;  %p6258_p1 = scmp.lt.s32.totalorder %s6256_s5, %s6250_s20 }
0x2312   : > { %p6252_p12 = pnand %p6251_p11, %p6508_p5  ;;  %p6259_p2 = por %p6258_p1, %p6257_p0 }
0x2314   : > { %p6253_p13 = pneg %p6252_p12 }
0x2316   : > { %p6260_p3 = pnand %p6259_p2, %p6253_p13 }
0x237d   : > { %v6042_v49 = vpop.permute.xlu1 %6041 }
0x237e   : > { %v6044_v58 = vunpack.i.h.bf16 %v6042_v49  ;;  %v6043_v47 = vunpack.i.l.bf16 %v6042_v49 }
0x2380   : > { %v4975_v62 = vsel %vm2118_vm5, %v4973_v55, %v6044_v58  ;;  %v4974_v36 = vsel %vm2118_vm5, %v4972_v60, %v6043_v47 }
0x2381   : > { %v4976_v63 = vpack.c.bf16 %v4975_v62, %v4974_v36 }
0x2383   : > { %5920 = vmatmul.mubr.msk.bf16.vlgmr.msra.gmra.mxu1 %vm5032_vm9, %v4976_v63 }
0x2443   : > { %v5070_v5 = vpop.f32.mrf.mxu1 }
0x2444   : > { %v5071_v43 = vadd.f32 %v5465_v40, %v5070_v5 }
0x2445   : > { %v5921_v48 = vpop.f32.mrf.mxu1 }
0x2446   : > { %v5077_v35 = vmax.f32 %v5071_v43, 0.0 }
0x2447   : > { %v5073_v9 = vpop.f32.mrf.mxu1 }
0x2448   : > { %v5074_v11 = vadd.f32 %v5465_v40, %v5073_v9 }
0x2449   : > { %v5922_v12 = vpop.f32.mrf.mxu1 }
0x244a   : > { %v5078_v16 = vmax.f32 %v5074_v11, 0.0 }
0x244c   : > { %v5079_v45 = vpack.c.bf16 %v5078_v16, %v5077_v35 }
0x244e   : > { %5936 = vmatmul.mubr.msk.bf16.vlgmr.msra.gmra.mxu0 %vm5032_vm9, %v5079_v45 }
0x250e   : > { %v5172_v18 = vpop.f32.mrf.mxu0 }
0x250f   : > { %v5173_v19 = vadd.f32 %v5473_v1, %v5172_v18 }
0x2510   : > { %v5937_v6 = vpop.f32.mrf.mxu0 }
0x2511   : > { %v5179_v20 = vmul.f32 0.2, %v5173_v19 }
0x2512   : > { %v5175_v22 = vpop.f32.mrf.mxu0 }
0x2513   : > { %v5181_v26 = vadd.f32 %v5179_v20, %v7578_v51  ;;  %v5176_v29 = vadd.f32 %v5473_v1, %v5175_v22 }
0x2514   : > { %v5938_v30 = vpop.f32.mrf.mxu0 }
0x2515   : > { %5183 = vst.msk [vmem:[%s849_s1] sm:$0xff] %vm897_vm1, %v5181_v26  ;;  %v5180_v33 = vmul.f32 0.2, %v5176_v29 }
0x2517   : > { %v5182_v51 = vadd.f32 %v5180_v33, %v7580_v3 }
0x2519   : > { %5184 = vst.msk [vmem:[%s849_s1 + $0x8] sm:$0xff] %vm897_vm1, %v5182_v51 }
0x251a   : > { %6263 = shalt.err (!%p6260_p3)
}
0x251b   : > { %s6264_s1 = scalar_lea.hbm %s7670_s4, 256  ;;  %s6268_s6 = scalar_lea.hbm %s7858_s25, 512 }
0x251c   : > { %p6265_p4 = scmp.ne.s32.totalorder %s7670_s4, %s6264_s1  ;;  %p6269_p9 = scmp.lt.s32.totalorder %s7670_s4, %s7858_s25 }
0x251d   : > { %p6270_p10 = scmp.lt.s32.totalorder %s6268_s6, %s6264_s1 }
0x251e   : > { %p6266_p7 = pnand %p6265_p4, %p6508_p5 }
0x251f   : > { %p6271_p11 = por %p6270_p10, %p6269_p9 }
0x2520   : > { %p6267_p8 = pneg %p6266_p7 }
0x2522   : > { %p6272_p12 = pnand %p6271_p11, %p6267_p8 }
0x2524   : > { %6275 = shalt.err (!%p6272_p12)
}
0x2525   : > { %s6323_s20 = smov 128   ;;  %s6324_s9 = smov 8  }
0x2526   : > { %5939 = dma.vmem_to_hbm [thread:$0]  (%p6508_p5), %s7672_s3, 256, %s7670_s4, %s7676_s2, %s6323_s20, %s6323_s20, %s6324_s9  }
0x2527 PF: > { %s7859_s5 = sld [smem:[#allocation8_spill]] }
0x2528   : > { %s7860_s0 = sld [smem:[#allocation5_spill]] }
0x252d   : > { %p5945_p13 = scmp.ge.s32.totalorder %s7859_s5, 2 }
0x252e   : > { %s5214_s10 = sand.u32 1, %s7860_s0  }
0x252f   : > { %p5942_p0 = pnand %p5945_p13, %p6512_p6  ;;  %s5215_s7 = scalar_lea.sflag [#allocation3], %s5214_s10 }
0x2531   : > { %p5943_p1 = pneg %p5942_p0 }
0x2533   : > { %6293 = dma.done.wait (%p5943_p1), %s5215_s7, 256  }
0x2534   : > { %6295 = vsyncadd (%p5943_p1), %s5215_s7, 4294967040  ;;  %s7862_s30 = sld [smem:[#allocation10_spill]] }
0x2535   : > { %s7863_s8 = sld [smem:[#allocation6_spill]] }
0x2536   : > { %s7864_s5 = sld [smem:[#allocation7_spill]] }
0x2537   : > { %s7865_s9 = sld [smem:[#allocation11_spill]] }
0x253a   : > { %p38_p2 = scmp.ge.s32.totalorder %s7862_s30, 4  }
0x253c   :  { %40 = sbr.rel (!%p38_p2) target bundleno = 25 (0x19), region = 208 }
0x2541   :  { %5220 = vsyncpa [#allocation3], 1 }
0x2542   :  { %5222 = vsyncpa [#allocation3 + $0x1], 1 }

</bundles_post_ra>
